<compile_context>
chip_gen: v7x
topology: tpu7x:2x2x1
jax: 0.10.0
libtpu: 0.0.40
codegen_flags: <defaults>
</compile_context>

<pallas_src>
import jax
import jax.numpy as jnp
from jax import lax
from jax.experimental import pallas as pl
from jax.experimental.pallas import tpu as pltpu


def _make_fused_tiny_cnn_kernel(H, W, Cin, C1, Cout):
    """Fused Conv3x3+ReLU -> Conv3x3+ReLU -> Conv1x1 for one batch element."""
    HW = H * W

    def kernel(x_ref, w1_ref, b1_ref, w2_ref, b2_ref, w3_ref, b3_ref,
               o_ref, xp1_ref, xp2_ref):
        # x_ref : (1, H, W, Cin)        NHWC input tile for this batch element
        # w1_ref: (9*Cin, C1)           conv1 weights, (ky, kx, cin) flattened
        # b1_ref: (1, C1)
        # w2_ref: (9*C1, C1)            conv2 weights
        # b2_ref: (1, C1)
        # w3_ref: (C1, Cout)            1x1 conv weights
        # b3_ref: (Cout, 1)
        # o_ref : (1, Cout, H*W)        lane-dense output tile
        # xp1_ref: VMEM (H+2, W+2, Cin) zero-padded scratch for layer 1
        # xp2_ref: VMEM (H+2, W+2, C1)  zero-padded scratch for layer 2

        def conv3x3_relu(padded_ref, interior, w_ref, b_ref, cin):
            # In-kernel 'same' padding: zero the scratch, fill the interior.
            padded_ref[...] = jnp.zeros_like(padded_ref)
            padded_ref[pl.ds(1, H), pl.ds(1, W), :] = interior
            xp = padded_ref[...]                                    # (H+2, W+2, cin)
            # im2col: 9 shifted patches concatenated along channels -> one matmul.
            cols = [xp[ky:ky + H, kx:kx + W, :].reshape(HW, cin)
                    for ky in range(3) for kx in range(3)]
            patches = jnp.concatenate(cols, axis=1)                 # (HW, 9*cin)
            h = jnp.dot(patches, w_ref[...],
                        preferred_element_type=jnp.float32)         # (HW, C1)
            return jnp.maximum(h + b_ref[...], 0.0)

        h1 = conv3x3_relu(xp1_ref, x_ref[0], w1_ref, b1_ref, Cin)          # (HW, C1)
        h2 = conv3x3_relu(xp2_ref, h1.reshape(H, W, C1), w2_ref, b2_ref, C1)

        # 1x1 conv fused as epilogue, lane-dense: out[c, p] = sum_k w3[k, c] * h2[p, k]
        out = lax.dot_general(w3_ref[...], h2,
                              dimension_numbers=(((0,), (1,)), ((), ())),
                              preferred_element_type=jnp.float32)    # (Cout, HW)
        out = out + b3_ref[...]                                      # (Cout, 1) bcast
        o_ref[0] = out.astype(o_ref.dtype)

    return kernel


def tiny_cnn_forward(params, x_nchw):
    """TinyCNN.forward: NCHW in, NCHW out (matches the PyTorch module)."""
    (w1, b1), (w2, b2), (w3, b3) = params
    N, Cin, H, W = x_nchw.shape
    KH, KW, _, C1 = w1.shape
    Cout = w3.shape[-1]
    HW = H * W
    assert (KH, KW) == (3, 3) and w2.shape[:2] == (3, 3) and w3.shape[:2] == (1, 1)

    x_nhwc = jnp.transpose(x_nchw, (0, 2, 3, 1))      # NCHW -> NHWC (channels on lanes)
    w1_2d = w1.reshape(9 * Cin, C1)                   # (ky, kx, cin) rows -> im2col K
    w2_2d = w2.reshape(9 * C1, C1)
    w3_2d = w3.reshape(C1, Cout)
    b1_2d = b1.reshape(1, C1)
    b2_2d = b2.reshape(1, C1)
    b3_2d = b3.reshape(Cout, 1)

    kernel = _make_fused_tiny_cnn_kernel(H, W, Cin, C1, Cout)
    out = pl.pallas_call(
        kernel,
        out_shape=jax.ShapeDtypeStruct((N, Cout, HW), x_nchw.dtype),
        grid=(N,),
        in_specs=[
            pl.BlockSpec((1, H, W, Cin), lambda n: (n, 0, 0, 0)),
            pl.BlockSpec((9 * Cin, C1), lambda n: (0, 0)),
            pl.BlockSpec((1, C1), lambda n: (0, 0)),
            pl.BlockSpec((9 * C1, C1), lambda n: (0, 0)),
            pl.BlockSpec((1, C1), lambda n: (0, 0)),
            pl.BlockSpec((C1, Cout), lambda n: (0, 0)),
            pl.BlockSpec((Cout, 1), lambda n: (0, 0)),
        ],
        out_specs=pl.BlockSpec((1, Cout, HW), lambda n: (n, 0, 0)),
        scratch_shapes=[
            pltpu.VMEM((H + 2, W + 2, Cin), jnp.float32),
            pltpu.VMEM((H + 2, W + 2, C1), jnp.float32),
        ],
        compiler_params=pltpu.CompilerParams(
            dimension_semantics=("parallel",)),
    )(x_nhwc, w1_2d, b1_2d, w2_2d, b2_2d, w3_2d, b3_2d)

    return out.reshape(N, Cout, H, W)                 # lane-dense (Cout, HW) -> NCHW


def init_tiny_cnn_params(key, in_ch, out_ch=1):
    """Deterministic synthetic params matching nn.Conv2d shapes (HWIO layout)."""
    ks = jax.random.split(key, 6)

    def conv_init(kw, kb, kh, kw_, cin, cout):
        fan_in = cin * kh * kw_
        bound = 1.0 / jnp.sqrt(fan_in)
        w = jax.random.uniform(kw, (kh, kw_, cin, cout), jnp.float32, -bound, bound)
        b = jax.random.uniform(kb, (cout,), jnp.float32, -bound, bound)
        return w, b

    w1, b1 = conv_init(ks[0], ks[1], 3, 3, in_ch, 32)
    w2, b2 = conv_init(ks[2], ks[3], 3, 3, 32, 32)
    w3, b3 = conv_init(ks[4], ks[5], 1, 1, 32, out_ch)
    return (w1, b1), (w2, b2), (w3, b3)


def _reference_forward(params, x_nchw):
    """Pure-JAX reference (lax.conv) for a correctness spot-check."""
    (w1, b1), (w2, b2), (w3, b3) = params
    x = jnp.transpose(x_nchw, (0, 2, 3, 1))
    dn = ("NHWC", "HWIO", "NHWC")

    def conv(x, w, b, pad):
        y = lax.conv_general_dilated(x, w, (1, 1), [(pad, pad), (pad, pad)],
                                     dimension_numbers=dn)
        return y + b[None, None, None, :]

    x = jax.nn.relu(conv(x, w1, b1, 1))
    x = jax.nn.relu(conv(x, w2, b2, 1))
    x = conv(x, w3, b3, 0)
    return jnp.transpose(x, (0, 3, 1, 2))


if __name__ == "__main__":
    key = jax.random.PRNGKey(0)
    k_param, k_x = jax.random.split(key)

    N, in_ch, H, W = 2, 4, 16, 16
    out_ch = 1

    params = init_tiny_cnn_params(k_param, in_ch, out_ch)
    x = jax.random.normal(k_x, (N, in_ch, H, W), jnp.float32)

    fwd = jax.jit(tiny_cnn_forward)
    y = jax.block_until_ready(fwd(params, x))
    assert y.shape == (N, out_ch, H, W), y.shape

    y_ref = jax.block_until_ready(_reference_forward(params, x))
    assert jnp.allclose(y, y_ref, atol=2e-3, rtol=2e-3), (
        float(jnp.max(jnp.abs(y - y_ref))))

    print("KERNEL_OK")
</pallas_src>

<mosaic_0001>
module attributes {stable_mosaic.version = 11 : i64} {
  func.func @kernel(%arg0: i32, %arg1: memref<1x16x16x4xf32, #tpu.memory_space<vmem>>, %arg2: memref<36x32xf32, #tpu.memory_space<vmem>>, %arg3: memref<1x32xf32, #tpu.memory_space<vmem>>, %arg4: memref<288x32xf32, #tpu.memory_space<vmem>>, %arg5: memref<1x32xf32, #tpu.memory_space<vmem>>, %arg6: memref<32x1xf32, #tpu.memory_space<vmem>>, %arg7: memref<1x1xf32, #tpu.memory_space<vmem>>, %arg8: memref<1x1x256xf32, #tpu.memory_space<vmem>>, %arg9: memref<18x18x4xf32, #tpu.memory_space<vmem>>, %arg10: memref<18x18x32xf32, #tpu.memory_space<vmem>>) attributes {dimension_semantics = [#tpu.dimension_semantics<parallel>], iteration_bounds = array<i64: 2>, scalar_prefetch = 0 : i64, scratch_operands = 2 : i64, tpu.core_type = #tpu.core_type<tc>, window_params = [{transform_indices = @transform_0, window_bounds = array<i64: 1, 16, 16, 4>}, {pipeline_mode = #tpu.pipeline_mode<synchronous>, transform_indices = @transform_1, window_bounds = array<i64: 36, 32>}, {pipeline_mode = #tpu.pipeline_mode<synchronous>, transform_indices = @transform_2, window_bounds = array<i64: 1, 32>}, {pipeline_mode = #tpu.pipeline_mode<synchronous>, transform_indices = @transform_3, window_bounds = array<i64: 288, 32>}, {pipeline_mode = #tpu.pipeline_mode<synchronous>, transform_indices = @transform_4, window_bounds = array<i64: 1, 32>}, {pipeline_mode = #tpu.pipeline_mode<synchronous>, transform_indices = @transform_5, window_bounds = array<i64: 32, 1>}, {pipeline_mode = #tpu.pipeline_mode<synchronous>, transform_indices = @transform_6, window_bounds = array<i64: 1, 1>}, {transform_indices = @transform_7, window_bounds = array<i64: 1, 1, 256>}]} {
    %c0 = arith.constant 0 : index
    %c0_0 = arith.constant 0 : index
    %c0_1 = arith.constant 0 : index
    %c0_2 = arith.constant 0 : index
    %0 = vector.load %arg1[%c0, %c0_0, %c0_1, %c0_2] : memref<1x16x16x4xf32, #tpu.memory_space<vmem>>, vector<1x16x16x4xf32>
    %1 = vector.shape_cast %0 : vector<1x16x16x4xf32> to vector<16x16x4xf32>
    %cst = arith.constant 0.000000e+00 : f32
    %2 = vector.broadcast %cst : f32 to vector<18x18x4xf32>
    %c0_3 = arith.constant 0 : index
    %c0_4 = arith.constant 0 : index
    %c0_5 = arith.constant 0 : index
    %3 = vector.load %arg9[%c0_3, %c0_4, %c0_5] : memref<18x18x4xf32, #tpu.memory_space<vmem>>, vector<18x18x4xf32>
    tpu.vector_store %arg9[%c0_3, %c0_4, %c0_5], %2 {strides = array<i32>} : memref<18x18x4xf32, #tpu.memory_space<vmem>>, vector<18x18x4xf32>,
    %c1 = arith.constant 1 : index
    %c1_6 = arith.constant 1 : index
    %c0_7 = arith.constant 0 : index
    %4 = vector.load %arg9[%c1, %c1_6, %c0_7] : memref<18x18x4xf32, #tpu.memory_space<vmem>>, vector<16x16x4xf32>
    tpu.vector_store %arg9[%c1, %c1_6, %c0_7], %1 {strides = array<i32>} : memref<18x18x4xf32, #tpu.memory_space<vmem>>, vector<16x16x4xf32>,
    %c0_8 = arith.constant 0 : index
    %c0_9 = arith.constant 0 : index
    %c0_10 = arith.constant 0 : index
    %5 = vector.load %arg9[%c0_8, %c0_9, %c0_10] : memref<18x18x4xf32, #tpu.memory_space<vmem>>, vector<18x18x4xf32>
    %6 = vector.extract_strided_slice %5 {offsets = [0, 0, 0], sizes = [16, 16, 4], strides = [1, 1, 1]} : vector<18x18x4xf32> to vector<16x16x4xf32>
    %7 = vector.shape_cast %6 : vector<16x16x4xf32> to vector<256x4xf32>
    %8 = vector.extract_strided_slice %5 {offsets = [0, 1, 0], sizes = [16, 16, 4], strides = [1, 1, 1]} : vector<18x18x4xf32> to vector<16x16x4xf32>
    %9 = vector.shape_cast %8 : vector<16x16x4xf32> to vector<256x4xf32>
    %10 = vector.extract_strided_slice %5 {offsets = [0, 2, 0], sizes = [16, 16, 4], strides = [1, 1, 1]} : vector<18x18x4xf32> to vector<16x16x4xf32>
    %11 = vector.shape_cast %10 : vector<16x16x4xf32> to vector<256x4xf32>
    %12 = vector.extract_strided_slice %5 {offsets = [1, 0, 0], sizes = [16, 16, 4], strides = [1, 1, 1]} : vector<18x18x4xf32> to vector<16x16x4xf32>
    %13 = vector.shape_cast %12 : vector<16x16x4xf32> to vector<256x4xf32>
    %14 = vector.extract_strided_slice %5 {offsets = [1, 1, 0], sizes = [16, 16, 4], strides = [1, 1, 1]} : vector<18x18x4xf32> to vector<16x16x4xf32>
    %15 = vector.shape_cast %14 : vector<16x16x4xf32> to vector<256x4xf32>
    %16 = vector.extract_strided_slice %5 {offsets = [1, 2, 0], sizes = [16, 16, 4], strides = [1, 1, 1]} : vector<18x18x4xf32> to vector<16x16x4xf32>
    %17 = vector.shape_cast %16 : vector<16x16x4xf32> to vector<256x4xf32>
    %18 = vector.extract_strided_slice %5 {offsets = [2, 0, 0], sizes = [16, 16, 4], strides = [1, 1, 1]} : vector<18x18x4xf32> to vector<16x16x4xf32>
    %19 = vector.shape_cast %18 : vector<16x16x4xf32> to vector<256x4xf32>
    %20 = vector.extract_strided_slice %5 {offsets = [2, 1, 0], sizes = [16, 16, 4], strides = [1, 1, 1]} : vector<18x18x4xf32> to vector<16x16x4xf32>
    %21 = vector.shape_cast %20 : vector<16x16x4xf32> to vector<256x4xf32>
    %22 = vector.extract_strided_slice %5 {offsets = [2, 2, 0], sizes = [16, 16, 4], strides = [1, 1, 1]} : vector<18x18x4xf32> to vector<16x16x4xf32>
    %23 = vector.shape_cast %22 : vector<16x16x4xf32> to vector<256x4xf32>
    %24 = tpu.concatenate %7, %9, %11, %13, %15, %17, %19, %21, %23 in 1 : vector<256x4xf32>, vector<256x4xf32>, vector<256x4xf32>, vector<256x4xf32>, vector<256x4xf32>, vector<256x4xf32>, vector<256x4xf32>, vector<256x4xf32>, vector<256x4xf32> -> vector<256x36xf32>
    %c0_11 = arith.constant 0 : index
    %c0_12 = arith.constant 0 : index
    %25 = vector.load %arg2[%c0_11, %c0_12] : memref<36x32xf32, #tpu.memory_space<vmem>>, vector<36x32xf32>
    %cst_13 = arith.constant dense<0.000000e+00> : vector<256x32xf32>
    %26 = tpu.matmul %24, %25, %cst_13 {dimension_numbers = #tpu.dot_dimension_numbers<[1], [0], [0], [1], [0, 0, 1, 1], [], []>} : vector<256x36xf32>, vector<36x32xf32>, vector<256x32xf32> -> vector<256x32xf32>
    %c0_14 = arith.constant 0 : index
    %c0_15 = arith.constant 0 : index
    %27 = vector.load %arg3[%c0_14, %c0_15] : memref<1x32xf32, #tpu.memory_space<vmem>>, vector<1x32xf32>
    %28 = vector.broadcast %27 : vector<1x32xf32> to vector<256x32xf32>
    %29 = arith.addf %26, %28 : vector<256x32xf32>
    %cst_16 = arith.constant 0.000000e+00 : f32
    %30 = vector.broadcast %cst_16 : f32 to vector<256x32xf32>
    %31 = arith.maximumf %29, %30 : vector<256x32xf32>
    %32 = vector.shape_cast %31 : vector<256x32xf32> to vector<16x16x32xf32>
    %cst_17 = arith.constant 0.000000e+00 : f32
    %33 = vector.broadcast %cst_17 : f32 to vector<18x18x32xf32>
    %c0_18 = arith.constant 0 : index
    %c0_19 = arith.constant 0 : index
    %c0_20 = arith.constant 0 : index
    %34 = vector.load %arg10[%c0_18, %c0_19, %c0_20] : memref<18x18x32xf32, #tpu.memory_space<vmem>>, vector<18x18x32xf32>
    tpu.vector_store %arg10[%c0_18, %c0_19, %c0_20], %33 {strides = array<i32>} : memref<18x18x32xf32, #tpu.memory_space<vmem>>, vector<18x18x32xf32>,
    %c1_21 = arith.constant 1 : index
    %c1_22 = arith.constant 1 : index
    %c0_23 = arith.constant 0 : index
    %35 = vector.load %arg10[%c1_21, %c1_22, %c0_23] : memref<18x18x32xf32, #tpu.memory_space<vmem>>, vector<16x16x32xf32>
    tpu.vector_store %arg10[%c1_21, %c1_22, %c0_23], %32 {strides = array<i32>} : memref<18x18x32xf32, #tpu.memory_space<vmem>>, vector<16x16x32xf32>,
    %c0_24 = arith.constant 0 : index
    %c0_25 = arith.constant 0 : index
    %c0_26 = arith.constant 0 : index
    %36 = vector.load %arg10[%c0_24, %c0_25, %c0_26] : memref<18x18x32xf32, #tpu.memory_space<vmem>>, vector<18x18x32xf32>
    %37 = vector.extract_strided_slice %36 {offsets = [0, 0, 0], sizes = [16, 16, 32], strides = [1, 1, 1]} : vector<18x18x32xf32> to vector<16x16x32xf32>
    %38 = vector.shape_cast %37 : vector<16x16x32xf32> to vector<256x32xf32>
    %39 = vector.extract_strided_slice %36 {offsets = [0, 1, 0], sizes = [16, 16, 32], strides = [1, 1, 1]} : vector<18x18x32xf32> to vector<16x16x32xf32>
    %40 = vector.shape_cast %39 : vector<16x16x32xf32> to vector<256x32xf32>
    %41 = vector.extract_strided_slice %36 {offsets = [0, 2, 0], sizes = [16, 16, 32], strides = [1, 1, 1]} : vector<18x18x32xf32> to vector<16x16x32xf32>
    %42 = vector.shape_cast %41 : vector<16x16x32xf32> to vector<256x32xf32>
    %43 = vector.extract_strided_slice %36 {offsets = [1, 0, 0], sizes = [16, 16, 32], strides = [1, 1, 1]} : vector<18x18x32xf32> to vector<16x16x32xf32>
    %44 = vector.shape_cast %43 : vector<16x16x32xf32> to vector<256x32xf32>
    %45 = vector.extract_strided_slice %36 {offsets = [1, 1, 0], sizes = [16, 16, 32], strides = [1, 1, 1]} : vector<18x18x32xf32> to vector<16x16x32xf32>
    %46 = vector.shape_cast %45 : vector<16x16x32xf32> to vector<256x32xf32>
    %47 = vector.extract_strided_slice %36 {offsets = [1, 2, 0], sizes = [16, 16, 32], strides = [1, 1, 1]} : vector<18x18x32xf32> to vector<16x16x32xf32>
    %48 = vector.shape_cast %47 : vector<16x16x32xf32> to vector<256x32xf32>
    %49 = vector.extract_strided_slice %36 {offsets = [2, 0, 0], sizes = [16, 16, 32], strides = [1, 1, 1]} : vector<18x18x32xf32> to vector<16x16x32xf32>
    %50 = vector.shape_cast %49 : vector<16x16x32xf32> to vector<256x32xf32>
    %51 = vector.extract_strided_slice %36 {offsets = [2, 1, 0], sizes = [16, 16, 32], strides = [1, 1, 1]} : vector<18x18x32xf32> to vector<16x16x32xf32>
    %52 = vector.shape_cast %51 : vector<16x16x32xf32> to vector<256x32xf32>
    %53 = vector.extract_strided_slice %36 {offsets = [2, 2, 0], sizes = [16, 16, 32], strides = [1, 1, 1]} : vector<18x18x32xf32> to vector<16x16x32xf32>
    %54 = vector.shape_cast %53 : vector<16x16x32xf32> to vector<256x32xf32>
    %55 = tpu.concatenate %38, %40, %42, %44, %46, %48, %50, %52, %54 in 1 : vector<256x32xf32>, vector<256x32xf32>, vector<256x32xf32>, vector<256x32xf32>, vector<256x32xf32>, vector<256x32xf32>, vector<256x32xf32>, vector<256x32xf32>, vector<256x32xf32> -> vector<256x288xf32>
    %c0_27 = arith.constant 0 : index
    %c0_28 = arith.constant 0 : index
    %56 = vector.load %arg4[%c0_27, %c0_28] : memref<288x32xf32, #tpu.memory_space<vmem>>, vector<288x32xf32>
    %cst_29 = arith.constant dense<0.000000e+00> : vector<256x32xf32>
    %57 = tpu.matmul %55, %56, %cst_29 {dimension_numbers = #tpu.dot_dimension_numbers<[1], [0], [0], [1], [0, 0, 1, 1], [], []>} : vector<256x288xf32>, vector<288x32xf32>, vector<256x32xf32> -> vector<256x32xf32>
    %c0_30 = arith.constant 0 : index
    %c0_31 = arith.constant 0 : index
    %58 = vector.load %arg5[%c0_30, %c0_31] : memref<1x32xf32, #tpu.memory_space<vmem>>, vector<1x32xf32>
    %59 = vector.broadcast %58 : vector<1x32xf32> to vector<256x32xf32>
    %60 = arith.addf %57, %59 : vector<256x32xf32>
    %cst_32 = arith.constant 0.000000e+00 : f32
    %61 = vector.broadcast %cst_32 : f32 to vector<256x32xf32>
    %62 = arith.maximumf %60, %61 : vector<256x32xf32>
    %c0_33 = arith.constant 0 : index
    %c0_34 = arith.constant 0 : index
    %63 = vector.load %arg6[%c0_33, %c0_34] : memref<32x1xf32, #tpu.memory_space<vmem>>, vector<32x1xf32>
    %cst_35 = arith.constant dense<0.000000e+00> : vector<1x256xf32>
    %64 = tpu.matmul %63, %62, %cst_35 {dimension_numbers = #tpu.dot_dimension_numbers<[0], [1], [1], [0], [0, 1, 1, 0], [], []>} : vector<32x1xf32>, vector<256x32xf32>, vector<1x256xf32> -> vector<1x256xf32>
    %c0_36 = arith.constant 0 : index
    %c0_37 = arith.constant 0 : index
    %65 = vector.load %arg7[%c0_36, %c0_37] : memref<1x1xf32, #tpu.memory_space<vmem>>, vector<1x1xf32>
    %66 = vector.broadcast %65 : vector<1x1xf32> to vector<1x256xf32>
    %67 = arith.addf %64, %66 : vector<1x256xf32>
    %c0_38 = arith.constant 0 : index
    %c0_39 = arith.constant 0 : index
    %c0_40 = arith.constant 0 : index
    %68 = vector.load %arg8[%c0_38, %c0_39, %c0_40] : memref<1x1x256xf32, #tpu.memory_space<vmem>>, vector<1x1x256xf32>
    %69 = vector.shape_cast %68 : vector<1x1x256xf32> to vector<1x256xf32>
    %70 = vector.shape_cast %67 : vector<1x256xf32> to vector<1x1x256xf32>
    tpu.vector_store %arg8[%c0_38, %c0_39, %c0_40], %70 {strides = array<i32>} : memref<1x1x256xf32, #tpu.memory_space<vmem>>, vector<1x1x256xf32>,
    return
  }
  func.func @transform_0(%arg0: i32) -> (i32, i32, i32, i32) {
    %c0_i32 = arith.constant 0 : i32
    %c0_i32_0 = arith.constant 0 : i32
    %c0_i32_1 = arith.constant 0 : i32
    %c0_i32_2 = arith.constant 0 : i32
    return %arg0, %c0_i32, %c0_i32_0, %c0_i32_1 : i32, i32, i32, i32
  }
  func.func @transform_1(%arg0: i32) -> (i32, i32) {
    %c0_i32 = arith.constant 0 : i32
    %c0_i32_0 = arith.constant 0 : i32
    %c0_i32_1 = arith.constant 0 : i32
    return %c0_i32, %c0_i32_0 : i32, i32
  }
  func.func @transform_2(%arg0: i32) -> (i32, i32) {
    %c0_i32 = arith.constant 0 : i32
    %c0_i32_0 = arith.constant 0 : i32
    %c0_i32_1 = arith.constant 0 : i32
    return %c0_i32, %c0_i32_0 : i32, i32
  }
  func.func @transform_3(%arg0: i32) -> (i32, i32) {
    %c0_i32 = arith.constant 0 : i32
    %c0_i32_0 = arith.constant 0 : i32
    %c0_i32_1 = arith.constant 0 : i32
    return %c0_i32, %c0_i32_0 : i32, i32
  }
  func.func @transform_4(%arg0: i32) -> (i32, i32) {
    %c0_i32 = arith.constant 0 : i32
    %c0_i32_0 = arith.constant 0 : i32
    %c0_i32_1 = arith.constant 0 : i32
    return %c0_i32, %c0_i32_0 : i32, i32
  }
  func.func @transform_5(%arg0: i32) -> (i32, i32) {
    %c0_i32 = arith.constant 0 : i32
    %c0_i32_0 = arith.constant 0 : i32
    %c0_i32_1 = arith.constant 0 : i32
    return %c0_i32, %c0_i32_0 : i32, i32
  }
  func.func @transform_6(%arg0: i32) -> (i32, i32) {
    %c0_i32 = arith.constant 0 : i32
    %c0_i32_0 = arith.constant 0 : i32
    %c0_i32_1 = arith.constant 0 : i32
    return %c0_i32, %c0_i32_0 : i32, i32
  }
  func.func @transform_7(%arg0: i32) -> (i32, i32, i32) {
    %c0_i32 = arith.constant 0 : i32
    %c0_i32_0 = arith.constant 0 : i32
    %c0_i32_1 = arith.constant 0 : i32
    return %arg0, %c0_i32, %c0_i32_0 : i32, i32, i32
  }
}

</mosaic_0001>

<bundles_post_ra>
// kernel: tiny_cnn_forward.1
= control target key start
LH: loop header
LB: loop body
LE: loop exit
PB: predicated region body
PF: predicated region fallthrough
CT: control target
= control target key end

     0   :  { %s5220_s26 = smov 0   ;;  %s8169_s0 = inlined_call_operand.vmem [shape: f32[2,16,16,4], index: 0, kind: input, shape index: {}]   ;;  %s8170_s1 = inlined_call_operand.vmem [shape: f32[36,32], index: 1, kind: input, shape index: {}]   ;;  %s8171_s2 = inlined_call_operand.vmem [shape: f32[1,32], index: 2, kind: input, shape index: {}]   ;;  %s8172_s3 = inlined_call_operand.vmem [shape: f32[288,32], index: 3, kind: input, shape index: {}]   ;;  %s8173_s4 = inlined_call_operand.vmem [shape: f32[1,32], index: 4, kind: input, shape index: {}]   ;;  %s8174_s5 = inlined_call_operand.vmem [shape: f32[32,1], index: 5, kind: input, shape index: {}]   ;;  %s8175_s6 = inlined_call_operand.<no memory space> [shape: f32[1,1], index: 6, kind: input, shape index: {}]   ;;  %s8176_s7 = inlined_call_operand.vmem [shape: f32[2,1,256], index: 7, kind: output, shape index: {}]  }
   0x1   :  { %v12_v0 = vstv %s8175_s6 }
   0x2   :  { %13 = vst [vmem:[#allocation4] sm:$0x1] %v12_v0 }
   0x3 LB: > { %s4150_s27 = sadd.s32 4294967295, %s5161_s26   ;;  %p4154_p0 = scmp.ge.s32.totalorder %s5161_s26, 1  ;;  %s5161_s26 = sphi %s5220_s26, %s19_s26  }
   0x4   : > { %p239_p1 = scmp.lt.s32.totalorder %s5161_s26, 3 }
   0x6   : > { %p240_p2 = pnand %p4154_p0, %p239_p1 }
   0x8   : > { %243 = sbr.rel (%p240_p2) target bundleno = 1486 (0x5ce), region = 48 }
   0xf   : > { %vm311_vm0 = vcmask 31744   ;;  %v5163_v1 = vmov 0.0   ;;  %vm314_vm1 = vcmask 25600   ;;  %p5302_p3 = scmp.lt.s32.totalorder %s4150_s27, 1  ;;  %vm583_vm2 = vcmask 1045504   ;;  %s5164_s9 = smov 8  }
  0x10   : > { %312 = vst.msk [vmem:[#allocation2] sm:$0xff] %vm311_vm0, %v5163_v1  ;;  %313 = vst.msk [vmem:[#allocation2 + $0x8] sm:$0xff] %vm311_vm0, %v5163_v1  ;;  %vm502_vm3 = vcmask 1046528   ;;  %s5165_s10 = smov 4   ;;  %s5166_s11 = smov 12   ;;  %v1721_v42 = vld [vmem:[%s8170_s1] sm:$0xff] }
  0x11   : > { %316 = vst.msk [vmem:[#allocation2 + $0x18] sm:$0xff] %vm311_vm0, %v5163_v1  ;;  %317 = vst.msk [vmem:[#allocation2 + $0x20] sm:$0xff] %vm311_vm0, %v5163_v1  ;;  %s8186_s27 = smov (!%p5302_p3, %s4150_s27), 1  ;;  %s5167_s12 = smov 16   ;;  %v1722_v43 = vld [vmem:[%s8170_s1 + $0x8] sm:$0xff]  ;;  %vm1688_vm4 = vcmask 261120  }
  0x12   : > { %319 = vst.msk [vmem:[#allocation2 + $0x30] sm:$0xff] %vm311_vm0, %v5163_v1  ;;  %320 = vst.msk [vmem:[#allocation2 + $0x38] sm:$0xff] %vm311_vm0, %v5163_v1  ;;  %s4260_s28 = sshll.u32 %s8186_s27, 8  ;;  %s5168_s13 = smov 20   ;;  %v4482_v44 = vpack.c.bf16 %v1722_v43, %v1721_v42  ;;  %v1723_v47 = vld [vmem:[%s8170_s1 + $0x10] sm:$0xff]  ;;  %v1724_v48 = vld [vmem:[%s8170_s1 + $0x18] sm:$0xff] }
  0x13   : > { %322 = vst.msk [vmem:[#allocation2 + $0x48] sm:$0xff] %vm311_vm0, %v5163_v1  ;;  %323 = vst.msk [vmem:[#allocation2 + $0x50] sm:$0xff] %vm311_vm0, %v5163_v1  ;;  %s5352_s8 = scalar_lea.vmem %s8169_s0, %s4260_s28  ;;  %s5169_s18 = smov 24   ;;  %v4486_v50 = vpack.c.bf16 %v1724_v48, %v1723_v47  ;;  %v1725_v52 = vld [vmem:[%s8170_s1 + $0x20] sm:$0xf]  ;;  %vm1830_vm5 = vcmask 1043456  }
  0x14   : > { %325 = vst.msk [vmem:[#allocation2 + $0x60] sm:$0xff] %vm311_vm0, %v5163_v1  ;;  %326 = vst.msk [vmem:[#allocation2 + $0x68] sm:$0xff] %vm311_vm0, %v5163_v1  ;;  %v279_v2 = vld [vmem:[%s5352_s8] sm:$0xff]  ;;  %v280_v3 = vld [vmem:[%s5352_s8 + $0x8] sm:$0xff]  ;;  %4483 = vmatprep.subr.bf16.mxu0 %v4482_v44  ;;  %s5170_s23 = smov 28   ;;  %s5171_s6 = smov 32  }
  0x15   : > { %328 = vst.msk [vmem:[#allocation2 + $0x78] sm:$0xff] %vm311_vm0, %v5163_v1  ;;  %329 = vst.msk [vmem:[#allocation2 + $0x80] sm:$0xff] %vm311_vm0, %v5163_v1  ;;  %v281_v4 = vld [vmem:[%s5352_s8 + $0x10] sm:$0xff]  ;;  %v282_v7 = vld [vmem:[%s5352_s8 + $0x18] sm:$0xff]  ;;  %4485 = vmatpush3.bf16.msra.mxu0 %v4482_v44  ;;  %vm1490_vm6 = vcmask 64512   ;;  %vm1523_vm7 = vcmask 97280  }
  0x16   : > { %331 = vst.msk [vmem:[#allocation2 + $0x90] sm:$0xff] %vm311_vm0, %v5163_v1  ;;  %332 = vst.msk [vmem:[#allocation2 + $0x98] sm:$0xff] %vm311_vm0, %v5163_v1  ;;  %v283_v15 = vld [vmem:[%s5352_s8 + $0x20] sm:$0xff]  ;;  %v284_v16 = vld [vmem:[%s5352_s8 + $0x28] sm:$0xff]  ;;  %4487 = vmatprep.subr.bf16.mxu0 %v4486_v50  ;;  %vm1556_vm8 = vcmask 130048   ;;  %vm1589_vm9 = vcmask 162816  }
  0x17   : > { %334 = vst.msk [vmem:[#allocation2 + $0xa8] sm:$0xff] %vm311_vm0, %v5163_v1  ;;  %335 = vst.msk [vmem:[#allocation2 + $0xb0] sm:$0xff] %vm311_vm0, %v5163_v1  ;;  %v5357_v5 = vld [vmem:[#allocation2] sm:$0xff]  ;;  %v5359_v6 = vld [vmem:[#allocation2 + $0x8] sm:$0xff]  ;;  %vm1622_vm10 = vcmask 195584   ;;  %vm1655_vm11 = vcmask 228352  }
  0x18   : > { %337 = vst.msk [vmem:[#allocation2 + $0xc0] sm:$0xff] %vm311_vm0, %v5163_v1  ;;  %338 = vst.msk [vmem:[#allocation2 + $0xc8] sm:$0xff] %vm311_vm0, %v5163_v1  ;;  %v584_v8 = vrot.slane %v5357_v5, 2  ;;  %v585_v9 = vrot.slane %v5359_v6, 2  ;;  %v503_v10 = vrot.slane %v5357_v5, 1  ;;  %v504_v11 = vrot.slane %v5359_v6, 1 }
  0x19   : > { %340 = vst.msk [vmem:[#allocation2 + $0xd8] sm:$0xff] %vm311_vm0, %v5163_v1  ;;  %341 = vst.msk [vmem:[#allocation2 + $0xe0] sm:$0xff] %vm311_vm0, %v5163_v1  ;;  %v285_v17 = vld [vmem:[%s5352_s8 + $0x30] sm:$0xff]  ;;  %v286_v20 = vld [vmem:[%s5352_s8 + $0x38] sm:$0xff]  ;;  %4489 = vmatpush3.bf16.msra.mxu0 %v4486_v50  ;;  %vm1733_vm12 = vcmask 293888   ;;  %vm2093_vm13 = vcmask 254976  }
  0x1a   : > { %343 = vst.msk [vmem:[#allocation2 + $0xf0] sm:$0xff] %vm311_vm0, %v5163_v1  ;;  %344 = vst.msk [vmem:[#allocation2 + $0xf8] sm:$0xff] %vm311_vm0, %v5163_v1  ;;  %v586_v18 = vsel %vm583_vm2, %v584_v8, %v585_v9  ;;  %v505_v19 = vsel %vm502_vm3, %v503_v10, %v504_v11  ;;  %v287_v21 = vld [vmem:[%s5352_s8 + $0x40] sm:$0xff]  ;;  %v288_v22 = vld [vmem:[%s5352_s8 + $0x48] sm:$0xff]  ;;  %4376 = vmatprep.subr.msk.mxu0 %vm1830_vm5, %v1725_v52  ;;  %vm3107_vm14 = vcmask 523264   ;;  %vm3140_vm15 = vcmask 785408  }
  0x1b   : > { %346 = vst.msk [vmem:[#allocation2 + $0x108] sm:$0xff] %vm311_vm0, %v5163_v1  ;;  %347 = vst.msk [vmem:[#allocation2 + $0x110] sm:$0xff] %vm311_vm0, %v5163_v1  ;;  %786 = vrot.lane.b32.xlu1 %v586_v18, %s5164_s9  ;;  %690 = vrot.lane.b32.xlu0 %v505_v19, %s5165_s10  ;;  %v289_v34 = vld [vmem:[%s5352_s8 + $0x50] sm:$0xff]  ;;  %v290_v35 = vld [vmem:[%s5352_s8 + $0x58] sm:$0xff] }
  0x1c   : > { %349 = vst.msk [vmem:[#allocation2 + $0x120] sm:$0xff] %vm311_vm0, %v5163_v1  ;;  %350 = vst.msk [vmem:[#allocation2 + $0x128] sm:$0xff] %vm311_vm0, %v5163_v1  ;;  %v291_v59 = vld [vmem:[%s5352_s8 + $0x60] sm:$0xff]  ;;  %v292_v60 = vld [vmem:[%s5352_s8 + $0x68] sm:$0xff] }
  0x1d   : > { %352 = vst.msk [vmem:[#allocation2 + $0x138] sm:$0xff] %vm311_vm0, %v5163_v1  ;;  %353 = vst.msk [vmem:[#allocation2 + $0x140] sm:$0xff] %vm311_vm0, %v5163_v1  ;;  %4377 = vmatpush3.msk.msra.mxu0 %vm1830_vm5, %v1725_v52 }
  0x1e   : > { %355 = vst.msk [vmem:[#allocation2 + $0x150] sm:$0xff] %vm311_vm0, %v5163_v1  ;;  %356 = vst.msk [vmem:[#allocation2 + $0x158] sm:$0xff] %vm311_vm0, %v5163_v1 }
  0x1f   : > { %358 = vst.msk [vmem:[#allocation2 + $0x168] sm:$0xff] %vm311_vm0, %v5163_v1  ;;  %359 = vst.msk [vmem:[#allocation2 + $0x170] sm:$0xff] %vm311_vm0, %v5163_v1 }
  0x20   : > { %361 = vst.msk [vmem:[#allocation2 + $0x180] sm:$0xff] %vm311_vm0, %v5163_v1  ;;  %362 = vst.msk [vmem:[#allocation2 + $0x188] sm:$0xff] %vm311_vm0, %v5163_v1 }
  0x21   : > { %364 = vst.msk [vmem:[#allocation2 + $0x198] sm:$0xff] %vm311_vm0, %v5163_v1  ;;  %365 = vst.msk [vmem:[#allocation2 + $0x1a0] sm:$0xff] %vm311_vm0, %v5163_v1 }
  0x22   : > { %315 = vst.msk [vmem:[#allocation2 + $0x10] sm:$0x3] %vm314_vm1, %v5163_v1  ;;  %318 = vst.msk [vmem:[#allocation2 + $0x28] sm:$0x3] %vm314_vm1, %v5163_v1 }
  0x23   : > { %321 = vst.msk [vmem:[#allocation2 + $0x40] sm:$0x3] %vm314_vm1, %v5163_v1  ;;  %324 = vst.msk [vmem:[#allocation2 + $0x58] sm:$0x3] %vm314_vm1, %v5163_v1 }
  0x24   : > { %327 = vst.msk [vmem:[#allocation2 + $0x70] sm:$0x3] %vm314_vm1, %v5163_v1  ;;  %330 = vst.msk [vmem:[#allocation2 + $0x88] sm:$0x3] %vm314_vm1, %v5163_v1 }
  0x25   : > { %333 = vst.msk [vmem:[#allocation2 + $0xa0] sm:$0x3] %vm314_vm1, %v5163_v1  ;;  %336 = vst.msk [vmem:[#allocation2 + $0xb8] sm:$0x3] %vm314_vm1, %v5163_v1 }
  0x26   : > { %339 = vst.msk [vmem:[#allocation2 + $0xd0] sm:$0x3] %vm314_vm1, %v5163_v1  ;;  %342 = vst.msk [vmem:[#allocation2 + $0xe8] sm:$0x3] %vm314_vm1, %v5163_v1 }
  0x27   : > { %345 = vst.msk [vmem:[#allocation2 + $0x100] sm:$0x3] %vm314_vm1, %v5163_v1  ;;  %348 = vst.msk [vmem:[#allocation2 + $0x118] sm:$0x3] %vm314_vm1, %v5163_v1 }
  0x28   : > { %351 = vst.msk [vmem:[#allocation2 + $0x130] sm:$0x3] %vm314_vm1, %v5163_v1  ;;  %354 = vst.msk [vmem:[#allocation2 + $0x148] sm:$0x3] %vm314_vm1, %v5163_v1 }
  0x29   : > { %357 = vst.msk [vmem:[#allocation2 + $0x160] sm:$0x3] %vm314_vm1, %v5163_v1  ;;  %360 = vst.msk [vmem:[#allocation2 + $0x178] sm:$0x3] %vm314_vm1, %v5163_v1  ;;  %v402_v12 = vld [vmem:[#allocation2 + $0x10] sm:$0x3] }
  0x2a   : > { %363 = vst.msk [vmem:[#allocation2 + $0x190] sm:$0x3] %vm314_vm1, %v5163_v1  ;;  %366 = vst.msk [vmem:[#allocation2 + $0x1a8] sm:$0x3] %vm314_vm1, %v5163_v1  ;;  %v587_v13 = vrot.slane %v402_v12, 2  ;;  %v506_v14 = vrot.slane %v402_v12, 1 }
  0x2b   : > { %368 = vst.msk [vmem:[#allocation2 + $0x19] sm:$0xff] %vm311_vm0, %v279_v2  ;;  %369 = vst.msk [vmem:[#allocation2 + $0x21] sm:$0xff] %vm311_vm0, %v280_v3 }
  0x2c   : > { %370 = vst.msk [vmem:[#allocation2 + $0x31] sm:$0xff] %vm311_vm0, %v281_v4  ;;  %371 = vst.msk [vmem:[#allocation2 + $0x39] sm:$0xff] %vm311_vm0, %v282_v7  ;;  %v588_v23 = vsel %vm583_vm2, %v585_v9, %v587_v13  ;;  %v507_v24 = vsel %vm502_vm3, %v504_v11, %v506_v14  ;;  %v293_v13 = vld [vmem:[%s5352_s8 + $0x70] sm:$0xff]  ;;  %v294_v14 = vld [vmem:[%s5352_s8 + $0x78] sm:$0xff] }
  0x2d   : > { %372 = vst.msk [vmem:[#allocation2 + $0x49] sm:$0xff] %vm311_vm0, %v283_v15  ;;  %373 = vst.msk [vmem:[#allocation2 + $0x51] sm:$0xff] %vm311_vm0, %v284_v16  ;;  %788 = vrot.lane.b32.xlu1 %v588_v23, %s5164_s9  ;;  %692 = vrot.lane.b32.xlu0 %v507_v24, %s5165_s10 }
  0x2e   : > { %374 = vst.msk [vmem:[#allocation2 + $0x61] sm:$0xff] %vm311_vm0, %v285_v17  ;;  %375 = vst.msk [vmem:[#allocation2 + $0x69] sm:$0xff] %vm311_vm0, %v286_v20 }
  0x2f   : > { %376 = vst.msk [vmem:[#allocation2 + $0x79] sm:$0xff] %vm311_vm0, %v287_v21  ;;  %377 = vst.msk [vmem:[#allocation2 + $0x81] sm:$0xff] %vm311_vm0, %v288_v22 }
  0x30   : > { %378 = vst.msk [vmem:[#allocation2 + $0x91] sm:$0xff] %vm311_vm0, %v289_v34  ;;  %379 = vst.msk [vmem:[#allocation2 + $0x99] sm:$0xff] %vm311_vm0, %v290_v35 }
  0x31   : > { %2091 = vst.msk [vmem:[#allocation3] sm:$0xff] %vm1688_vm4, %v5163_v1  ;;  %2092 = vst.msk [vmem:[#allocation3 + $0x8] sm:$0xff] %vm1688_vm4, %v5163_v1 }
  0x32   : > { %v5388_v25 = vld [vmem:[#allocation2 + $0x20] sm:$0xff]  ;;  %v5390_v26 = vld [vmem:[#allocation2 + $0x18] sm:$0xff]  ;;  %v405_v29 = vld [vmem:[#allocation2 + $0x28] sm:$0x3]  ;;  %2095 = vst.msk [vmem:[#allocation3 + $0x18] sm:$0xff] %vm1688_vm4, %v5163_v1 }
  0x33   : > { %v508_v27 = vrot.slane %v5390_v26, 1  ;;  %v509_v28 = vrot.slane %v5388_v25, 1  ;;  %884 = vrot.lane.b32.xlu1 %v5388_v25, %s5166_s11  ;;  %882 = vrot.lane.b32.xlu0 %v5390_v26, %s5166_s11  ;;  %v589_v31 = vrot.slane %v5390_v26, 2  ;;  %v590_v32 = vrot.slane %v5388_v25, 2  ;;  %v5415_v39 = vld [vmem:[#allocation2 + $0x30] sm:$0xff]  ;;  %v5418_v41 = vld [vmem:[#allocation2 + $0x38] sm:$0xff] }
  0x34   : > { %v511_v33 = vrot.slane %v405_v29, 1  ;;  %v592_v38 = vrot.slane %v405_v29, 2  ;;  %v513_v45 = vrot.slane %v5415_v39, 1  ;;  %v514_v46 = vrot.slane %v5418_v41, 1  ;;  %2096 = vst.msk [vmem:[#allocation3 + $0x20] sm:$0xff] %vm1688_vm4, %v5163_v1  ;;  %2098 = vst.msk [vmem:[#allocation3 + $0x30] sm:$0xff] %vm1688_vm4, %v5163_v1 }
  0x35   : > { %v510_v30 = vsel %vm502_vm3, %v508_v27, %v509_v28  ;;  %v591_v36 = vsel %vm583_vm2, %v589_v31, %v590_v32  ;;  %2099 = vst.msk [vmem:[#allocation3 + $0x38] sm:$0xff] %vm1688_vm4, %v5163_v1  ;;  %2101 = vst.msk [vmem:[#allocation3 + $0x48] sm:$0xff] %vm1688_vm4, %v5163_v1  ;;  %v408_v51 = vld [vmem:[#allocation2 + $0x40] sm:$0x3]  ;;  %v594_v53 = vrot.slane %v5415_v39, 2  ;;  %v595_v54 = vrot.slane %v5418_v41, 2 }
  0x36   : > { %v512_v37 = vsel %vm502_vm3, %v509_v28, %v511_v33  ;;  %v593_v40 = vsel %vm583_vm2, %v590_v32, %v592_v38  ;;  %2102 = vst.msk [vmem:[#allocation3 + $0x50] sm:$0xff] %vm1688_vm4, %v5163_v1  ;;  %2104 = vst.msk [vmem:[#allocation3 + $0x60] sm:$0xff] %vm1688_vm4, %v5163_v1  ;;  %v515_v49 = vsel %vm502_vm3, %v513_v45, %v514_v46  ;;  %v516_v55 = vrot.slane %v408_v51, 1  ;;  %v5539_v62 = vld [vmem:[#allocation2 + $0x48] sm:$0xff]  ;;  %v5541_v63 = vld [vmem:[#allocation2 + $0x50] sm:$0xff] }
  0x37   : > { %694 = vrot.lane.b32.xlu1 %v510_v30, %s5165_s10  ;;  %978 = vrot.lane.b32.xlu0 %v510_v30, %s5167_s12  ;;  %2105 = vst.msk [vmem:[#allocation3 + $0x68] sm:$0xff] %vm1688_vm4, %v5163_v1  ;;  %2107 = vst.msk [vmem:[#allocation3 + $0x78] sm:$0xff] %vm1688_vm4, %v5163_v1  ;;  %v596_v56 = vsel %vm583_vm2, %v594_v53, %v595_v54  ;;  %v597_v58 = vrot.slane %v408_v51, 2  ;;  %v518_v0 = vrot.slane %v5539_v62, 1  ;;  %v519_v2 = vrot.slane %v5541_v63, 1  ;;  %v5575_v16 = vld [vmem:[#allocation2 + $0x60] sm:$0xff] }
  0x38   : > { %2108 = vst.msk [vmem:[#allocation3 + $0x80] sm:$0xff] %vm1688_vm4, %v5163_v1  ;;  %2110 = vst.msk [vmem:[#allocation3 + $0x90] sm:$0xff] %vm1688_vm4, %v5163_v1  ;;  %v517_v57 = vsel %vm502_vm3, %v514_v46, %v516_v55  ;;  %v411_v4 = vld [vmem:[#allocation2 + $0x58] sm:$0x3]  ;;  %v599_v7 = vrot.slane %v5539_v62, 2  ;;  %v600_v8 = vrot.slane %v5541_v63, 2 }
  0x39   : > { %2111 = vst.msk [vmem:[#allocation3 + $0x98] sm:$0xff] %vm1688_vm4, %v5163_v1  ;;  %2113 = vst.msk [vmem:[#allocation3 + $0xa8] sm:$0xff] %vm1688_vm4, %v5163_v1  ;;  %v598_v61 = vsel %vm583_vm2, %v595_v54, %v597_v58  ;;  %v520_v3 = vsel %vm502_vm3, %v518_v0, %v519_v2  ;;  %v521_v9 = vrot.slane %v411_v4, 1  ;;  %v602_v12 = vrot.slane %v411_v4, 2  ;;  %v5577_v17 = vld [vmem:[#allocation2 + $0x68] sm:$0xff]  ;;  %v295_v30 = vld [vmem:[%s5352_s8 + $0x80] sm:$0xff] }
  0x3a   : > { %2114 = vst.msk [vmem:[#allocation3 + $0xb0] sm:$0xff] %vm1688_vm4, %v5163_v1  ;;  %2116 = vst.msk [vmem:[#allocation3 + $0xc0] sm:$0xff] %vm1688_vm4, %v5163_v1  ;;  %v601_v10 = vsel %vm583_vm2, %v599_v7, %v600_v8  ;;  %v523_v18 = vrot.slane %v5575_v16, 1  ;;  %v524_v19 = vrot.slane %v5577_v17, 1  ;;  %v414_v21 = vld [vmem:[#allocation2 + $0x70] sm:$0x3] }
  0x3b   : > { %1074 = vrot.lane.b32.xlu1 %v591_v36, %s5168_s13  ;;  %980 = vrot.lane.b32.xlu0 %v512_v37, %s5167_s12  ;;  %2117 = vst.msk [vmem:[#allocation3 + $0xc8] sm:$0xff] %vm1688_vm4, %v5163_v1  ;;  %2119 = vst.msk [vmem:[#allocation3 + $0xd8] sm:$0xff] %vm1688_vm4, %v5163_v1  ;;  %v522_v11 = vsel %vm502_vm3, %v519_v2, %v521_v9  ;;  %v603_v15 = vsel %vm583_vm2, %v600_v8, %v602_v12  ;;  %v604_v22 = vrot.slane %v5575_v16, 2  ;;  %v296_v31 = vld [vmem:[%s5352_s8 + $0x88] sm:$0xff]  ;;  %v5613_v35 = vld [vmem:[#allocation2 + $0x78] sm:$0xff] }
  0x3c   : > { %2120 = vst.msk [vmem:[#allocation3 + $0xe0] sm:$0xff] %vm1688_vm4, %v5163_v1  ;;  %2122 = vst.msk [vmem:[#allocation3 + $0xf0] sm:$0xff] %vm1688_vm4, %v5163_v1  ;;  %v525_v20 = vsel %vm502_vm3, %v523_v18, %v524_v19  ;;  %v605_v23 = vrot.slane %v5577_v17, 2  ;;  %v526_v24 = vrot.slane %v414_v21, 1  ;;  %v607_v29 = vrot.slane %v414_v21, 2  ;;  %v5619_v38 = vld [vmem:[#allocation2 + $0x80] sm:$0xff] }
  0x3d   : > { %2123 = vst.msk [vmem:[#allocation3 + $0xf8] sm:$0xff] %vm1688_vm4, %v5163_v1  ;;  %2125 = vst.msk [vmem:[#allocation3 + $0x108] sm:$0xff] %vm1688_vm4, %v5163_v1  ;;  %v529_v42 = vrot.slane %v5619_v38, 1  ;;  %v417_v48 = vld [vmem:[#allocation2 + $0x88] sm:$0x3]  ;;  %v610_v50 = vrot.slane %v5619_v38, 2 }
  0x3e   : > { %2126 = vst.msk [vmem:[#allocation3 + $0x110] sm:$0xff] %vm1688_vm4, %v5163_v1  ;;  %2128 = vst.msk [vmem:[#allocation3 + $0x120] sm:$0xff] %vm1688_vm4, %v5163_v1  ;;  %v606_v27 = vsel %vm583_vm2, %v604_v22, %v605_v23  ;;  %v527_v28 = vsel %vm502_vm3, %v524_v19, %v526_v24  ;;  %v608_v32 = vsel %vm583_vm2, %v605_v23, %v607_v29  ;;  %v531_v51 = vrot.slane %v417_v48, 1  ;;  %v298_v0 = vld [vmem:[%s5352_s8 + $0x98] sm:$0xff]  ;;  %v420_v4 = vld [vmem:[#allocation2 + $0xa0] sm:$0x3] }
  0x3f   : > { %790 = vrot.lane.b32.xlu1 %v591_v36, %s5164_s9  ;;  %696 = vrot.lane.b32.xlu0 %v512_v37, %s5165_s10  ;;  %2129 = vst.msk [vmem:[#allocation3 + $0x128] sm:$0xff] %vm1688_vm4, %v5163_v1  ;;  %2131 = vst.msk [vmem:[#allocation3 + $0x138] sm:$0xff] %vm1688_vm4, %v5163_v1  ;;  %v612_v58 = vrot.slane %v417_v48, 2  ;;  %v5679_v9 = vld [vmem:[#allocation2 + $0x90] sm:$0xff] }
  0x40   : > { %2132 = vst.msk [vmem:[#allocation3 + $0x140] sm:$0xff] %vm1688_vm4, %v5163_v1  ;;  %2134 = vst.msk [vmem:[#allocation3 + $0x150] sm:$0xff] %vm1688_vm4, %v5163_v1  ;;  %v5652_v55 = vsel %vm502_vm3, %v529_v42, %v531_v51  ;;  %v533_v12 = vrot.slane %v5679_v9, 1 }
  0x41   : > { %2135 = vst.msk [vmem:[#allocation3 + $0x158] sm:$0xff] %vm1688_vm4, %v5163_v1  ;;  %2137 = vst.msk [vmem:[#allocation3 + $0x168] sm:$0xff] %vm1688_vm4, %v5163_v1  ;;  %v5669_v2 = vsel %vm583_vm2, %v610_v50, %v612_v58 }
  0x42   : > { %2138 = vst.msk [vmem:[#allocation3 + $0x170] sm:$0xff] %vm1688_vm4, %v5163_v1  ;;  %2140 = vst.msk [vmem:[#allocation3 + $0x180] sm:$0xff] %vm1688_vm4, %v5163_v1 }
  0x43   : > { %1170 = vrot.lane.b32.xlu1 %v5415_v39, %s5169_s18  ;;  %1076 = vrot.lane.b32.xlu0 %v593_v40, %s5168_s13  ;;  %2141 = vst.msk [vmem:[#allocation3 + $0x188] sm:$0xff] %vm1688_vm4, %v5163_v1  ;;  %2143 = vst.msk [vmem:[#allocation3 + $0x198] sm:$0xff] %vm1688_vm4, %v5163_v1 }
  0x44   : > { %2144 = vst.msk [vmem:[#allocation3 + $0x1a0] sm:$0xff] %vm1688_vm4, %v5163_v1 }
  0x45   : > { %380 = vst.msk [vmem:[#allocation2 + $0xa9] sm:$0xff] %vm311_vm0, %v291_v59  ;;  %381 = vst.msk [vmem:[#allocation2 + $0xb1] sm:$0xff] %vm311_vm0, %v292_v60 }
  0x46   : > { %382 = vst.msk [vmem:[#allocation2 + $0xc1] sm:$0xff] %vm311_vm0, %v293_v13  ;;  %383 = vst.msk [vmem:[#allocation2 + $0xc9] sm:$0xff] %vm311_vm0, %v294_v14 }
  0x47   : > { %886 = vrot.lane.b32.xlu1 %v5415_v39, %s5166_s11  ;;  %792 = vrot.lane.b32.xlu0 %v593_v40, %s5164_s9  ;;  %384 = vst.msk [vmem:[#allocation2 + $0xd9] sm:$0xff] %vm311_vm0, %v295_v30  ;;  %385 = vst.msk [vmem:[#allocation2 + $0xe1] sm:$0xff] %vm311_vm0, %v296_v31  ;;  %v528_v40 = vrot.slane %v5613_v35, 1  ;;  %v617_v31 = vrot.slane %v420_v4, 2 }
  0x48   : > { %387 = vst.msk [vmem:[#allocation2 + $0xf9] sm:$0xff] %vm311_vm0, %v298_v0 }
  0x49   : > { %v5632_v45 = vsel %vm502_vm3, %v528_v40, %v529_v42  ;;  %2097 = vst.msk [vmem:[#allocation3 + $0x28] sm:$0x3] %vm2093_vm13, %v5163_v1  ;;  %2094 = vst.msk [vmem:[#allocation3 + $0x10] sm:$0x3] %vm2093_vm13, %v5163_v1 }
  0x4a   : > { %2100 = vst.msk [vmem:[#allocation3 + $0x40] sm:$0x3] %vm2093_vm13, %v5163_v1  ;;  %2103 = vst.msk [vmem:[#allocation3 + $0x58] sm:$0x3] %vm2093_vm13, %v5163_v1 }
  0x4b   : > { %1266 = vrot.lane.b32.xlu1 %v515_v49, %s5170_s23  ;;  %1172 = vrot.lane.b32.xlu0 %v5418_v41, %s5169_s18  ;;  %2106 = vst.msk [vmem:[#allocation3 + $0x70] sm:$0x3] %vm2093_vm13, %v5163_v1  ;;  %2109 = vst.msk [vmem:[#allocation3 + $0x88] sm:$0x3] %vm2093_vm13, %v5163_v1 }
  0x4c   : > { %v423_v0 = vld [vmem:[#allocation2 + $0xb8] sm:$0x3]  ;;  %2112 = vst.msk [vmem:[#allocation3 + $0xa0] sm:$0x3] %vm2093_vm13, %v5163_v1  ;;  %2115 = vst.msk [vmem:[#allocation3 + $0xb8] sm:$0x3] %vm2093_vm13, %v5163_v1 }
  0x4d   : > { %2118 = vst.msk [vmem:[#allocation3 + $0xd0] sm:$0x3] %vm2093_vm13, %v5163_v1  ;;  %2121 = vst.msk [vmem:[#allocation3 + $0xe8] sm:$0x3] %vm2093_vm13, %v5163_v1 }
  0x4e   : > { %2124 = vst.msk [vmem:[#allocation3 + $0x100] sm:$0x3] %vm2093_vm13, %v5163_v1  ;;  %2127 = vst.msk [vmem:[#allocation3 + $0x118] sm:$0x3] %vm2093_vm13, %v5163_v1 }
  0x4f   : > { %982 = vrot.lane.b32.xlu1 %v515_v49, %s5167_s12  ;;  %888 = vrot.lane.b32.xlu0 %v5418_v41, %s5166_s11  ;;  %2130 = vst.msk [vmem:[#allocation3 + $0x130] sm:$0x3] %vm2093_vm13, %v5163_v1  ;;  %2133 = vst.msk [vmem:[#allocation3 + $0x148] sm:$0x3] %vm2093_vm13, %v5163_v1 }
  0x50   : > { %2136 = vst.msk [vmem:[#allocation3 + $0x160] sm:$0x3] %vm2093_vm13, %v5163_v1  ;;  %2139 = vst.msk [vmem:[#allocation3 + $0x178] sm:$0x3] %vm2093_vm13, %v5163_v1 }
  0x51   : > { %2142 = vst.msk [vmem:[#allocation3 + $0x190] sm:$0x3] %vm2093_vm13, %v5163_v1  ;;  %2145 = vst.msk [vmem:[#allocation3 + $0x1a8] sm:$0x3] %vm2093_vm13, %v5163_v1 }
  0x53   : > { %1362 = vrot.lane.b32.xlu1 %v596_v56, %s5171_s6  ;;  %1268 = vrot.lane.b32.xlu0 %v517_v57, %s5170_s23 }
  0x57   : > { %984 = vrot.lane.b32.xlu1 %v517_v57, %s5167_s12  ;;  %698 = vrot.lane.b32.xlu0 %v515_v49, %s5165_s10  ;;  %v609_v49 = vrot.slane %v5613_v35, 2 }
  0x59   : > { %v5649_v54 = vsel %vm583_vm2, %v609_v49, %v610_v50 }
  0x5b   : > { %1364 = vrot.lane.b32.xlu1 %v598_v61, %s5171_s6  ;;  %1078 = vrot.lane.b32.xlu0 %v596_v56, %s5168_s13 }
  0x5f   : > { %794 = vrot.lane.b32.xlu1 %v596_v56, %s5164_s9  ;;  %700 = vrot.lane.b32.xlu0 %v517_v57, %s5165_s10 }
  0x63   : > { %1174 = vrot.lane.b32.xlu1 %v5539_v62, %s5169_s18  ;;  %1080 = vrot.lane.b32.xlu0 %v598_v61, %s5168_s13 }
  0x67   : > { %890 = vrot.lane.b32.xlu1 %v5539_v62, %s5166_s11  ;;  %796 = vrot.lane.b32.xlu0 %v598_v61, %s5164_s9  ;;  %v297_v61 = vld [vmem:[%s5352_s8 + $0x90] sm:$0xff] }
  0x68   : > { %386 = vst.msk [vmem:[#allocation2 + $0xf1] sm:$0xff] %vm311_vm0, %v297_v61  ;;  %v5768_v61 = vld [vmem:[#allocation2 + $0xb0] sm:$0xff] }
  0x6b   : > { %1270 = vrot.lane.b32.xlu1 %v520_v3, %s5170_s23  ;;  %1176 = vrot.lane.b32.xlu0 %v5541_v63, %s5169_s18 }
  0x6f   : > { %986 = vrot.lane.b32.xlu1 %v520_v3, %s5167_s12  ;;  %892 = vrot.lane.b32.xlu0 %v5541_v63, %s5166_s11 }
  0x73   : > { %1366 = vrot.lane.b32.xlu1 %v601_v10, %s5171_s6  ;;  %1272 = vrot.lane.b32.xlu0 %v522_v11, %s5170_s23 }
  0x77   : > { %988 = vrot.lane.b32.xlu1 %v522_v11, %s5167_s12  ;;  %702 = vrot.lane.b32.xlu0 %v520_v3, %s5165_s10  ;;  %v5671_v3 = vld [vmem:[#allocation2 + $0x98] sm:$0xff] }
  0x78   : > { %v615_v21 = vrot.slane %v5671_v3, 2 }
  0x7b   : > { %1368 = vrot.lane.b32.xlu1 %v603_v15, %s5171_s6  ;;  %1082 = vrot.lane.b32.xlu0 %v601_v10, %s5168_s13 }
  0x7f   : > { %798 = vrot.lane.b32.xlu1 %v601_v10, %s5164_s9  ;;  %704 = vrot.lane.b32.xlu0 %v522_v11, %s5165_s10  ;;  %v534_v10 = vrot.slane %v5671_v3, 1  ;;  %v536_v11 = vrot.slane %v420_v4, 1 }
  0x81   : > { %v5694_v18 = vsel %vm502_vm3, %v534_v10, %v536_v11  ;;  %v539_v11 = vrot.slane %v5768_v61, 1 }
  0x83   : > { %1178 = vrot.lane.b32.xlu1 %v5575_v16, %s5169_s18  ;;  %1084 = vrot.lane.b32.xlu0 %v603_v15, %s5168_s13 }
  0x87   : > { %894 = vrot.lane.b32.xlu1 %v5575_v16, %s5166_s11  ;;  %800 = vrot.lane.b32.xlu0 %v603_v15, %s5164_s9 }
  0x8b   : > { %1274 = vrot.lane.b32.xlu1 %v525_v20, %s5170_s23  ;;  %1180 = vrot.lane.b32.xlu0 %v5577_v17, %s5169_s18 }
  0x8d   : > { %v5609_v33 = vpop.permute.xlu1 %786  ;;  %v691_v34 = vpop.permute.xlu0 %690 }
  0x8e   : > { %v1458_v13 = vsel %vm311_vm0, %v5357_v5, %v691_v34  ;;  %v5699_v5 = vsel %vm502_vm3, %v533_v12, %v534_v10  ;;  %v5776_v10 = vld [vmem:[#allocation2 + $0xa8] sm:$0xff]  ;;  %v541_v12 = vrot.slane %v423_v0, 1 }
  0x8f   : > { %990 = vrot.lane.b32.xlu1 %v525_v20, %s5167_s12  ;;  %896 = vrot.lane.b32.xlu0 %v5577_v17, %s5166_s11  ;;  %v1491_v19 = vsel %vm1490_vm6, %v1458_v13, %v5609_v33  ;;  %v538_v13 = vrot.slane %v5776_v10, 1 }
  0x93   : > { %1370 = vrot.lane.b32.xlu1 %v606_v27, %s5171_s6  ;;  %1276 = vrot.lane.b32.xlu0 %v527_v28, %s5170_s23 }
  0x97   : > { %992 = vrot.lane.b32.xlu1 %v527_v28, %s5167_s12  ;;  %706 = vrot.lane.b32.xlu0 %v525_v20, %s5165_s10  ;;  %v614_v20 = vrot.slane %v5679_v9, 2 }
  0x99   : > { %v5716_v30 = vsel %vm583_vm2, %v614_v20, %v615_v21  ;;  %v5792_v20 = vsel %vm502_vm3, %v539_v11, %v541_v12 }
  0x9b   : > { %1372 = vrot.lane.b32.xlu1 %v608_v32, %s5171_s6  ;;  %1086 = vrot.lane.b32.xlu0 %v606_v27, %s5168_s13 }
  0x9f   : > { %802 = vrot.lane.b32.xlu1 %v606_v27, %s5164_s9  ;;  %708 = vrot.lane.b32.xlu0 %v527_v28, %s5165_s10  ;;  %v5615_v36 = vpop.permute.xlu1 %788  ;;  %v5617_v37 = vpop.permute.xlu0 %692 }
  0xa3   : > { %1182 = vrot.lane.b32.xlu1 %v5613_v35, %s5169_s18  ;;  %1088 = vrot.lane.b32.xlu0 %v608_v32, %s5168_s13 }
  0xa5   : > { %v5626_v43 = vpop.permute.xlu1 %884  ;;  %v883_v44 = vpop.permute.xlu0 %882 }
  0xa6   : > { %v1524_v22 = vsel %vm1523_vm7, %v1491_v19, %v883_v44 }
  0xa7   : > { %898 = vrot.lane.b32.xlu1 %v5613_v35, %s5166_s11  ;;  %804 = vrot.lane.b32.xlu0 %v608_v32, %s5164_s9  ;;  %v1459_v32 = vsel %vm311_vm0, %v5359_v6, %v5617_v37  ;;  %v5731_v6 = vsel %vm583_vm2, %v615_v21, %v617_v31 }
  0xa8   : > { %v1492_v44 = vsel %vm1490_vm6, %v1459_v32, %v5615_v36 }
  0xa9   : > { %v5634_v46 = vpop.permute.xlu1 %694  ;;  %v979_v47 = vpop.permute.xlu0 %978  ;;  %v1525_v37 = vsel %vm1523_vm7, %v1492_v44, %v5626_v43 }
  0xaa   : > { %v1557_v27 = vsel %vm1556_vm8, %v1524_v22, %v979_v47  ;;  %v1460_v19 = vsel %vm311_vm0, %v5390_v26, %v5634_v46  ;;  %v5797_v22 = vsel %vm502_vm3, %v538_v13, %v539_v11  ;;  %v5876_v11 = vld [vmem:[#allocation2 + $0xc0] sm:$0xff] }
  0xab   : > { %1278 = vrot.lane.b32.xlu1 %v5632_v45, %s5170_s23  ;;  %1184 = vrot.lane.b32.xlu0 %v5619_v38, %s5169_s18 }
  0xad   : > { %v1075_v52 = vpop.permute.xlu1 %1074  ;;  %v5642_v53 = vpop.permute.xlu0 %980 }
  0xae   : > { %v1590_v28 = vsel %vm1589_vm9, %v1557_v27, %v1075_v52  ;;  %v619_v27 = vrot.slane %v5776_v10, 2 }
  0xaf   : > { %994 = vrot.lane.b32.xlu1 %v5632_v45, %s5167_s12  ;;  %900 = vrot.lane.b32.xlu0 %v5619_v38, %s5166_s11 }
  0xb1   : > { %v5654_v56 = vpop.permute.xlu1 %790  ;;  %v5656_v57 = vpop.permute.xlu0 %696 }
  0xb2   : > { %v1493_v21 = vsel %vm1490_vm6, %v1460_v19, %v5654_v56  ;;  %v1461_v44 = vsel %vm311_vm0, %v5388_v25, %v5656_v57 }
  0xb3   : > { %1374 = vrot.lane.b32.xlu1 %v5649_v54, %s5171_s6  ;;  %1280 = vrot.lane.b32.xlu0 %v5652_v55, %s5170_s23 }
  0xb5   : > { %v1171_v59 = vpop.permute.xlu1 %1170  ;;  %v1077_v60 = vpop.permute.xlu0 %1076 }
  0xb6   : > { %v1623_v29 = vsel %vm1622_vm10, %v1590_v28, %v1171_v59  ;;  %v620_v28 = vrot.slane %v5768_v61, 2 }
  0xb7   : > { %1090 = vrot.lane.b32.xlu1 %v5649_v54, %s5168_s13  ;;  %996 = vrot.lane.b32.xlu0 %v5652_v55, %s5167_s12 }
  0xb9   : > { %v5675_v7 = vpop.permute.xlu1 %886  ;;  %v5677_v8 = vpop.permute.xlu0 %792 }
  0xba   : > { %v1526_v26 = vsel %vm1523_vm7, %v1493_v21, %v5675_v7  ;;  %v622_v7 = vrot.slane %v423_v0, 2 }
  0xbb   : > { %1092 = vrot.lane.b32.xlu1 %v5669_v2, %s5168_s13  ;;  %1376 = vrot.lane.b32.xlu0 %v5669_v2, %s5171_s6 }
  0xbd   : > { %v1267_v14 = vpop.permute.xlu1 %1266  ;;  %v1173_v15 = vpop.permute.xlu0 %1172 }
  0xbe   : > { %v1656_v33 = vsel %vm1655_vm11, %v1623_v29, %v1267_v14 }
  0xbf   : > { %1188 = vrot.lane.b32.xlu1 %v5671_v3, %s5169_s18  ;;  %1186 = vrot.lane.b32.xlu0 %v5679_v9, %s5169_s18 }
  0xc1   : > { %v5704_v23 = vpop.permute.xlu1 %982  ;;  %v5706_v24 = vpop.permute.xlu0 %888 }
  0xc2   : > { %v1559_v31 = vsel %vm1556_vm8, %v1526_v26, %v5704_v23 }
  0xc3   : > { %1284 = vrot.lane.b32.xlu1 %v5694_v18, %s5170_s23  ;;  %1282 = vrot.lane.b32.xlu0 %v5699_v5, %s5170_s23 }
  0xc5   : > { %v1363_v34 = vpop.permute.xlu1 %1362  ;;  %v1269_v40 = vpop.permute.xlu0 %1268 }
  0xc6   : > { %v1689_v42 = vsel %vm1688_vm4, %v1656_v33, %v1363_v34  ;;  %v5816_v33 = vsel %vm583_vm2, %v619_v27, %v620_v28 }
  0xc7   : > { %710 = vrot.lane.b32.xlu1 %v5632_v45, %s5165_s10  ;;  %1378 = vrot.lane.b32.xlu0 %v5716_v30, %s5171_s6  ;;  %v1558_v45 = vsel %vm1556_vm8, %v1525_v37, %v5642_v53  ;;  %v1494_v37 = vsel %vm1490_vm6, %v1461_v44, %v5677_v8 }
  0xc8   : > { %4378 = vmatprep.mubr.msk.f32.mxu0 %vm1733_vm12, %v1689_v42  ;;  %v1591_v49 = vsel %vm1589_vm9, %v1558_v45, %v1077_v60  ;;  %v300_v60 = vld [vmem:[%s5352_s8 + $0xa8] sm:$0xff]  ;;  %v5831_v45 = vsel %vm583_vm2, %v620_v28, %v622_v7 }
  0xc9   : > { %v5735_v47 = vpop.permute.xlu1 %984  ;;  %v5737_v48 = vpop.permute.xlu0 %698  ;;  %v1624_v36 = vsel %vm1622_vm10, %v1591_v49, %v1173_v15  ;;  %389 = vst.msk [vmem:[#allocation2 + $0x111] sm:$0xff] %vm311_vm0, %v300_v60  ;;  %v1527_v49 = vsel %vm1523_vm7, %v1494_v37, %v5706_v24 }
  0xca   : > { %v1657_v43 = vsel %vm1655_vm11, %v1624_v36, %v1269_v40  ;;  %v1560_v57 = vsel %vm1556_vm8, %v1527_v49, %v5735_v47  ;;  %v1462_v21 = vsel %vm311_vm0, %v5415_v39, %v5737_v48 }
  0xcb   : > { %712 = vrot.lane.b32.xlu1 %v5652_v55, %s5165_s10  ;;  %1380 = vrot.lane.b32.xlu0 %v5731_v6, %s5171_s6 }
  0xcd   : > { %v1365_v50 = vpop.permute.xlu1 %1364  ;;  %v1079_v51 = vpop.permute.xlu0 %1078 }
  0xce   : > { %v1690_v52 = vsel %vm1688_vm4, %v1657_v43, %v1365_v50  ;;  %v1592_v32 = vsel %vm1589_vm9, %v1559_v31, %v1079_v51  ;;  %v624_v31 = vrot.slane %v5876_v11, 2 }
  0xcf   : > { %808 = vrot.lane.b32.xlu1 %v5669_v2, %s5164_s9  ;;  %806 = vrot.lane.b32.xlu0 %v5649_v54, %s5164_s9  ;;  %v299_v54 = vld [vmem:[%s5352_s8 + $0xa0] sm:$0xff] }
  0xd0   : > { %4379 = vmatmul.mubr.msk.f32.vlgmr.msra.gmra.mrb[0].mxu0 %vm1733_vm12, %v1690_v52  ;;  %388 = vst.msk [vmem:[#allocation2 + $0x109] sm:$0xff] %vm311_vm0, %v299_v54  ;;  %v426_v54 = vld [vmem:[#allocation2 + $0xd0] sm:$0x3] }
  0xd1   : > { %v5754_v53 = vpop.permute.xlu1 %794  ;;  %v5756_v55 = vpop.permute.xlu0 %700  ;;  %v546_v13 = vrot.slane %v426_v54, 1 }
  0xd2   : > { %v1495_v28 = vsel %vm1490_vm6, %v1462_v21, %v5754_v53  ;;  %v1463_v37 = vsel %vm311_vm0, %v5418_v41, %v5756_v55 }
  0xd3   : > { %904 = vrot.lane.b32.xlu1 %v5671_v3, %s5166_s11  ;;  %902 = vrot.lane.b32.xlu0 %v5679_v9, %s5166_s11 }
  0xd5   : > { %v1175_v58 = vpop.permute.xlu1 %1174  ;;  %v1081_v59 = vpop.permute.xlu0 %1080 }
  0xd6   : > { %v1625_v56 = vsel %vm1622_vm10, %v1592_v32, %v1175_v58 }
  0xd7   : > { %1000 = vrot.lane.b32.xlu1 %v5694_v18, %s5167_s12  ;;  %998 = vrot.lane.b32.xlu0 %v5699_v5, %s5167_s12 }
  0xd9   : > { %v5772_v2 = vpop.permute.xlu1 %890  ;;  %v5774_v4 = vpop.permute.xlu0 %796 }
  0xda   : > { %v1528_v39 = vsel %vm1523_vm7, %v1495_v28, %v5772_v2  ;;  %v627_v2 = vrot.slane %v426_v54, 2  ;;  %v1496_v49 = vsel %vm1490_vm6, %v1463_v37, %v5774_v4 }
  0xdb   : > { %1096 = vrot.lane.b32.xlu1 %v5731_v6, %s5168_s13  ;;  %1094 = vrot.lane.b32.xlu0 %v5716_v30, %s5168_s13 }
  0xdd   : > { %v1271_v14 = vpop.permute.xlu1 %1270  ;;  %v1177_v15 = vpop.permute.xlu0 %1176 }
  0xde   : > { %v1658_v34 = vsel %vm1655_vm11, %v1625_v56, %v1271_v14  ;;  %v543_v14 = vrot.slane %v5876_v11, 1 }
  0xdf   : > { %1192 = vrot.lane.b32.xlu1 %v5768_v61, %s5169_s18  ;;  %1190 = vrot.lane.b32.xlu0 %v5776_v10, %s5169_s18 }
  0xe1   : > { %v5803_v46 = vpop.permute.xlu1 %986  ;;  %v5805_v29 = vpop.permute.xlu0 %892 }
  0xe2   : > { %v1561_v7 = vsel %vm1556_vm8, %v1528_v39, %v5803_v46 }
  0xe3   : > { %1288 = vrot.lane.b32.xlu1 %v5792_v20, %s5170_s23  ;;  %1286 = vrot.lane.b32.xlu0 %v5797_v22, %s5170_s23 }
  0xe5   : > { %v1367_v40 = vpop.permute.xlu1 %1366  ;;  %v1273_v42 = vpop.permute.xlu0 %1272 }
  0xe6   : > { %v1691_v23 = vsel %vm1688_vm4, %v1658_v34, %v1367_v40 }
  0xe7   : > { %714 = vrot.lane.b32.xlu1 %v5699_v5, %s5165_s10  ;;  %1382 = vrot.lane.b32.xlu0 %v5816_v33, %s5171_s6  ;;  %v1593_v5 = vsel %vm1589_vm9, %v1560_v57, %v1081_v59  ;;  %v5868_v59 = vld [vmem:[#allocation2 + $0xc8] sm:$0xff] }
  0xe8   : > { %4381 = vmatprep.mubr.msk.f32.mxu0 %vm1733_vm12, %v1691_v23  ;;  %v1626_v8 = vsel %vm1622_vm10, %v1593_v5, %v1177_v15  ;;  %v544_v12 = vrot.slane %v5868_v59, 1  ;;  %v625_v32 = vrot.slane %v5868_v59, 2  ;;  %v1529_v5 = vsel %vm1523_vm7, %v1496_v49, %v5805_v29 }
  0xe9   : > { %v5835_v36 = vpop.permute.xlu1 %988  ;;  %v5837_v25 = vpop.permute.xlu0 %702  ;;  %v1659_v24 = vsel %vm1655_vm11, %v1626_v8, %v1273_v42 }
  0xea   : > { %v5892_v27 = vsel %vm502_vm3, %v544_v12, %v546_v13  ;;  %v5897_v26 = vsel %vm502_vm3, %v543_v14, %v544_v12  ;;  %v5916_v40 = vsel %vm583_vm2, %v624_v31, %v625_v32  ;;  %v5931_v57 = vsel %vm583_vm2, %v625_v32, %v627_v2  ;;  %v5978_v12 = vld [vmem:[#allocation2 + $0xd8] sm:$0xff] }
  0xeb   : > { %716 = vrot.lane.b32.xlu1 %v5694_v18, %s5165_s10  ;;  %1384 = vrot.lane.b32.xlu0 %v5831_v45, %s5171_s6  ;;  %v1562_v55 = vsel %vm1556_vm8, %v1529_v5, %v5835_v36  ;;  %v1464_v28 = vsel %vm311_vm0, %v5539_v62, %v5837_v25 }
  0xed   : > { %v1369_v43 = vpop.permute.xlu1 %1368  ;;  %v1083_v50 = vpop.permute.xlu0 %1082 }
  0xee   : > { %v1692_v51 = vsel %vm1688_vm4, %v1659_v24, %v1369_v43  ;;  %v1594_v34 = vsel %vm1589_vm9, %v1561_v7, %v1083_v50  ;;  %v629_v7 = vrot.slane %v5978_v12, 2 }
  0xef   : > { %812 = vrot.lane.b32.xlu1 %v5731_v6, %s5164_s9  ;;  %810 = vrot.lane.b32.xlu0 %v5716_v30, %s5164_s9  ;;  %v301_v30 = vld [vmem:[%s5352_s8 + $0xb0] sm:$0xff]  ;;  %v302_v6 = vld [vmem:[%s5352_s8 + $0xb8] sm:$0xff] }
  0xf0   : > { %4382 = vmatmul.mubr.msk.f32.gmra.mrb[2].mxu0 %vm1733_vm12, %v1692_v51  ;;  %390 = vst.msk [vmem:[#allocation2 + $0x121] sm:$0xff] %vm311_vm0, %v301_v30  ;;  %391 = vst.msk [vmem:[#allocation2 + $0x129] sm:$0xff] %vm311_vm0, %v302_v6  ;;  %v429_v30 = vld [vmem:[#allocation2 + $0xe8] sm:$0x3] }
  0xf1   : > { %v5854_v18 = vpop.permute.xlu1 %798  ;;  %v5856_v47 = vpop.permute.xlu0 %704  ;;  %v551_v14 = vrot.slane %v429_v30, 1 }
  0xf2   : > { %v1497_v32 = vsel %vm1490_vm6, %v1464_v28, %v5854_v18  ;;  %v1465_v49 = vsel %vm311_vm0, %v5541_v63, %v5856_v47 }
  0xf3   : > { %908 = vrot.lane.b32.xlu1 %v5768_v61, %s5166_s11  ;;  %906 = vrot.lane.b32.xlu0 %v5776_v10, %s5166_s11 }
  0xf5   : > { %v1179_v52 = vpop.permute.xlu1 %1178  ;;  %v1085_v58 = vpop.permute.xlu0 %1084 }
  0xf6   : > { %v1627_v53 = vsel %vm1622_vm10, %v1594_v34, %v1179_v52 }
  0xf7   : > { %1004 = vrot.lane.b32.xlu1 %v5792_v20, %s5167_s12  ;;  %1002 = vrot.lane.b32.xlu0 %v5797_v22, %s5167_s12 }
  0xf9   : > { %v5872_v60 = vpop.permute.xlu1 %894  ;;  %v5874_v0 = vpop.permute.xlu0 %800 }
  0xfa   : > { %v1530_v62 = vsel %vm1523_vm7, %v1497_v32, %v5872_v60  ;;  %v632_v60 = vrot.slane %v429_v30, 2  ;;  %v1498_v63 = vsel %vm1490_vm6, %v1465_v49, %v5874_v0 }
  0xfb   : > { %1100 = vrot.lane.b32.xlu1 %v5831_v45, %s5168_s13  ;;  %1098 = vrot.lane.b32.xlu0 %v5816_v33, %s5168_s13 }
  0xfd   : > { %v1275_v15 = vpop.permute.xlu1 %1274  ;;  %v1181_v19 = vpop.permute.xlu0 %1180 }
  0xfe   : > { %v1660_v42 = vsel %vm1655_vm11, %v1627_v53, %v1275_v15  ;;  %v548_v15 = vrot.slane %v5978_v12, 1 }
  0xff   : > { %1196 = vrot.lane.b32.xlu1 %v5868_v59, %s5169_s18  ;;  %1194 = vrot.lane.b32.xlu0 %v5876_v11, %s5169_s18 }
 0x101   : > { %v5903_v48 = vpop.permute.xlu1 %990  ;;  %v5905_v56 = vpop.permute.xlu0 %896 }
 0x102   : > { %v1563_v2 = vsel %vm1556_vm8, %v1530_v62, %v5903_v48 }
 0x103   : > { %1292 = vrot.lane.b32.xlu1 %v5892_v27, %s5170_s23  ;;  %1290 = vrot.lane.b32.xlu0 %v5897_v26, %s5170_s23 }
 0x105   : > { %v1371_v23 = vpop.permute.xlu1 %1370  ;;  %v1277_v44 = vpop.permute.xlu0 %1276 }
 0x106   : > { %v1693_v46 = vsel %vm1688_vm4, %v1660_v42, %v1371_v23 }
 0x107   : > { %718 = vrot.lane.b32.xlu1 %v5797_v22, %s5165_s10  ;;  %1386 = vrot.lane.b32.xlu0 %v5916_v40, %s5171_s6  ;;  %v1595_v22 = vsel %vm1589_vm9, %v1562_v55, %v1085_v58  ;;  %v5970_v58 = vld [vmem:[#allocation2 + $0xe0] sm:$0xff] }
 0x108   : > { %4384 = vmatprep.mubr.msk.f32.mxu0 %vm1733_vm12, %v1693_v46  ;;  %v1628_v4 = vsel %vm1622_vm10, %v1595_v22, %v1181_v19  ;;  %v549_v13 = vrot.slane %v5970_v58, 1  ;;  %v630_v34 = vrot.slane %v5970_v58, 2 }
 0x109   : > { %v5935_v8 = vpop.permute.xlu1 %992  ;;  %v5937_v41 = vpop.permute.xlu0 %706  ;;  %v1661_v29 = vsel %vm1655_vm11, %v1628_v4, %v1277_v44 }
 0x10a   : > { %v5994_v31 = vsel %vm502_vm3, %v549_v13, %v551_v14  ;;  %v5999_v39 = vsel %vm502_vm3, %v548_v15, %v549_v13  ;;  %v6018_v23 = vsel %vm583_vm2, %v629_v7, %v630_v34  ;;  %v6069_v47 = vsel %vm583_vm2, %v630_v34, %v632_v60  ;;  %v6120_v14 = vld [vmem:[#allocation2 + $0xf8] sm:$0xff]  ;;  %v6122_v15 = vld [vmem:[#allocation2 + $0xf0] sm:$0xff] }
 0x10b   : > { %720 = vrot.lane.b32.xlu1 %v5792_v20, %s5165_s10  ;;  %1388 = vrot.lane.b32.xlu0 %v5931_v57, %s5171_s6  ;;  %v554_v7 = vrot.slane %v6120_v14, 1  ;;  %v553_v62 = vrot.slane %v6122_v15, 1 }
 0x10d   : > { %v1373_v24 = vpop.permute.xlu1 %1372  ;;  %v1087_v43 = vpop.permute.xlu0 %1086  ;;  %v6146_v60 = vsel %vm502_vm3, %v553_v62, %v554_v7 }
 0x10e   : > { %v1694_v50 = vsel %vm1688_vm4, %v1661_v29, %v1373_v24  ;;  %v1596_v42 = vsel %vm1589_vm9, %v1563_v2, %v1087_v43  ;;  %v1466_v43 = vsel %vm311_vm0, %v5575_v16, %v5937_v41 }
 0x10f   : > { %816 = vrot.lane.b32.xlu1 %v5831_v45, %s5164_s9  ;;  %814 = vrot.lane.b32.xlu0 %v5816_v33, %s5164_s9  ;;  %v303_v33 = vld [vmem:[%s5352_s8 + $0xc0] sm:$0xff]  ;;  %v304_v45 = vld [vmem:[%s5352_s8 + $0xc8] sm:$0xff] }
 0x110   : > { %4385 = vmatmul.mubr.msk.f32.gmra.mrb[4].mxu0 %vm1733_vm12, %v1694_v50  ;;  %392 = vst.msk [vmem:[#allocation2 + $0x139] sm:$0xff] %vm311_vm0, %v303_v33  ;;  %393 = vst.msk [vmem:[#allocation2 + $0x141] sm:$0xff] %vm311_vm0, %v304_v45  ;;  %v306_v33 = vld [vmem:[%s5352_s8 + $0xd8] sm:$0xff] }
 0x111   : > { %v5954_v20 = vpop.permute.xlu1 %802  ;;  %v5956_v36 = vpop.permute.xlu0 %708  ;;  %395 = vst.msk [vmem:[#allocation2 + $0x159] sm:$0xff] %vm311_vm0, %v306_v33  ;;  %v435_v33 = vld [vmem:[#allocation2 + $0x118] sm:$0x3] }
 0x112   : > { %v1467_v16 = vsel %vm311_vm0, %v5577_v17, %v5956_v36 }
 0x113   : > { %912 = vrot.lane.b32.xlu1 %v5868_v59, %s5166_s11  ;;  %910 = vrot.lane.b32.xlu0 %v5876_v11, %s5166_s11 }
 0x115   : > { %v1183_v51 = vpop.permute.xlu1 %1182  ;;  %v5962_v52 = vpop.permute.xlu0 %1088 }
 0x116   : > { %v1629_v18 = vsel %vm1622_vm10, %v1596_v42, %v1183_v51 }
 0x117   : > { %1008 = vrot.lane.b32.xlu1 %v5892_v27, %s5167_s12  ;;  %1006 = vrot.lane.b32.xlu0 %v5897_v26, %s5167_s12 }
 0x119   : > { %v5974_v6 = vpop.permute.xlu1 %898  ;;  %v5976_v54 = vpop.permute.xlu0 %804 }
 0x11a   : > { %v1500_v45 = vsel %vm1490_vm6, %v1467_v16, %v5976_v54 }
 0x11b   : > { %1104 = vrot.lane.b32.xlu1 %v5931_v57, %s5168_s13  ;;  %1102 = vrot.lane.b32.xlu0 %v5916_v40, %s5168_s13 }
 0x11d   : > { %v1279_v19 = vpop.permute.xlu1 %1278  ;;  %v1185_v21 = vpop.permute.xlu0 %1184 }
 0x11e   : > { %v1662_v44 = vsel %vm1655_vm11, %v1629_v18, %v1279_v19  ;;  %v432_v19 = vld [vmem:[#allocation2 + $0x100] sm:$0x3] }
 0x11f   : > { %1200 = vrot.lane.b32.xlu1 %v5970_v58, %s5169_s18  ;;  %1198 = vrot.lane.b32.xlu0 %v5978_v12, %s5169_s18  ;;  %v556_v34 = vrot.slane %v432_v19, 1 }
 0x121   : > { %v6005_v25 = vpop.permute.xlu1 %994  ;;  %v6007_v53 = vpop.permute.xlu0 %900  ;;  %v6143_v18 = vsel %vm502_vm3, %v554_v7, %v556_v34 }
 0x122   : > { %v1533_v17 = vsel %vm1523_vm7, %v1500_v45, %v6007_v53 }
 0x123   : > { %1296 = vrot.lane.b32.xlu1 %v5994_v31, %s5170_s23  ;;  %1294 = vrot.lane.b32.xlu0 %v5999_v39, %s5170_s23 }
 0x125   : > { %v1375_v46 = vpop.permute.xlu1 %1374  ;;  %v1281_v37 = vpop.permute.xlu0 %1280 }
 0x126   : > { %v1695_v48 = vsel %vm1688_vm4, %v1662_v44, %v1375_v46  ;;  %v634_v44 = vrot.slane %v6122_v15, 2  ;;  %v635_v46 = vrot.slane %v6120_v14, 2 }
 0x127   : > { %722 = vrot.lane.b32.xlu1 %v5897_v26, %s5165_s10  ;;  %1390 = vrot.lane.b32.xlu0 %v6018_v23, %s5171_s6  ;;  %v1531_v26 = vsel %vm1523_vm7, %v1498_v63, %v5905_v56  ;;  %v637_v63 = vrot.slane %v432_v19, 2 }
 0x128   : > { %4387 = vmatprep.mubr.msk.f32.mxu0 %vm1733_vm12, %v1695_v48  ;;  %v1564_v22 = vsel %vm1556_vm8, %v1531_v26, %v5935_v8  ;;  %v6155_v49 = vsel %vm583_vm2, %v634_v44, %v635_v46  ;;  %v642_v44 = vrot.slane %v435_v33, 2 }
 0x129   : > { %v1091_v5 = vpop.permute.xlu1 %1090  ;;  %v997_v55 = vpop.permute.xlu0 %996  ;;  %v1597_v4 = vsel %vm1589_vm9, %v1564_v22, %v5962_v52 }
 0x12a   : > { %v1630_v1 = vsel %vm1622_vm10, %v1597_v4, %v1185_v21  ;;  %v1566_v54 = vsel %vm1556_vm8, %v1533_v17, %v997_v55  ;;  %v6162_v55 = vsel %vm583_vm2, %v635_v46, %v637_v63 }
 0x12b   : > { %724 = vrot.lane.b32.xlu1 %v5892_v27, %s5165_s10  ;;  %1392 = vrot.lane.b32.xlu0 %v6069_v47, %s5171_s6  ;;  %v1663_v0 = vsel %vm1655_vm11, %v1630_v1, %v1281_v37 }
 0x12d   : > { %v1093_v29 = vpop.permute.xlu1 %1092  ;;  %v1377_v56 = vpop.permute.xlu0 %1376 }
 0x12e   : > { %v1696_v24 = vsel %vm1688_vm4, %v1663_v0, %v1377_v56  ;;  %v1599_v28 = vsel %vm1589_vm9, %v1566_v54, %v1093_v29 }
 0x12f   : > { %820 = vrot.lane.b32.xlu1 %v5931_v57, %s5164_s9  ;;  %818 = vrot.lane.b32.xlu0 %v5916_v40, %s5164_s9  ;;  %v1499_v57 = vsel %vm1490_vm6, %v1466_v43, %v5954_v20  ;;  %v305_v20 = vld [vmem:[%s5352_s8 + $0xd0] sm:$0xff] }
 0x130   : > { %4388 = vmatmul.mubr.msk.f32.gmra.mrb[6].mxu0 %vm1733_vm12, %v1696_v24  ;;  %v1532_v40 = vsel %vm1523_vm7, %v1499_v57, %v5974_v6  ;;  %394 = vst.msk [vmem:[#allocation2 + $0x151] sm:$0xff] %vm311_vm0, %v305_v20  ;;  %v308_v57 = vld [vmem:[%s5352_s8 + $0xe8] sm:$0xff] }
 0x131   : > { %v1189_v27 = vpop.permute.xlu1 %1188  ;;  %v1187_v8 = vpop.permute.xlu0 %1186  ;;  %v1565_v52 = vsel %vm1556_vm8, %v1532_v40, %v6005_v25  ;;  %397 = vst.msk [vmem:[#allocation2 + $0x171] sm:$0xff] %vm311_vm0, %v308_v57  ;;  %v6198_v20 = vld [vmem:[#allocation2 + $0x108] sm:$0xff]  ;;  %v438_v57 = vld [vmem:[#allocation2 + $0x130] sm:$0x3] }
 0x132   : > { %v1598_v41 = vsel %vm1589_vm9, %v1565_v52, %v1091_v5  ;;  %v1632_v32 = vsel %vm1622_vm10, %v1599_v28, %v1189_v27  ;;  %v558_v19 = vrot.slane %v6198_v20, 1  ;;  %v639_v62 = vrot.slane %v6198_v20, 2 }
 0x133   : > { %916 = vrot.lane.b32.xlu1 %v5970_v58, %s5166_s11  ;;  %914 = vrot.lane.b32.xlu0 %v5978_v12, %s5166_s11  ;;  %v1631_v30 = vsel %vm1622_vm10, %v1598_v41, %v1187_v8  ;;  %v6196_v41 = vld [vmem:[#allocation2 + $0x110] sm:$0xff] }
 0x135   : > { %v1285_v50 = vpop.permute.xlu1 %1284  ;;  %v1283_v51 = vpop.permute.xlu0 %1282 }
 0x136   : > { %v1664_v36 = vsel %vm1655_vm11, %v1631_v30, %v1283_v51  ;;  %v1665_v25 = vsel %vm1655_vm11, %v1632_v32, %v1285_v50 }
 0x137   : > { %1012 = vrot.lane.b32.xlu1 %v5994_v31, %s5167_s12  ;;  %1010 = vrot.lane.b32.xlu0 %v5999_v39, %s5167_s12 }
 0x139   : > { %v711_v6 = vpop.permute.xlu1 %710  ;;  %v1379_v13 = vpop.permute.xlu0 %1378 }
 0x13a   : > { %v1697_v21 = vsel %vm1688_vm4, %v1664_v36, %v1379_v13  ;;  %v1468_v56 = vsel %vm311_vm0, %v5613_v35, %v711_v6  ;;  %v307_v35 = vld [vmem:[%s5352_s8 + $0xe0] sm:$0xff]  ;;  %v559_v6 = vrot.slane %v6196_v41, 1  ;;  %v561_v13 = vrot.slane %v435_v33, 1 }
 0x13b   : > { %1108 = vrot.lane.b32.xlu1 %v6069_v47, %s5168_s13  ;;  %1106 = vrot.lane.b32.xlu0 %v6018_v23, %s5168_s13  ;;  %396 = vst.msk [vmem:[#allocation2 + $0x169] sm:$0xff] %vm311_vm0, %v307_v35  ;;  %v436_v35 = vld [vmem:[#allocation2 + $0x120] sm:$0xff] }
 0x13c   : > { %4390 = vmatprep.mubr.msk.f32.mxu0 %vm1733_vm12, %v1697_v21  ;;  %v6219_v7 = vsel %vm502_vm3, %v559_v6, %v561_v13  ;;  %v6222_v34 = vsel %vm502_vm3, %v558_v19, %v559_v6  ;;  %v563_v33 = vrot.slane %v436_v35, 1  ;;  %v644_v19 = vrot.slane %v436_v35, 2 }
 0x13d   : > { %v713_v53 = vpop.permute.xlu1 %712  ;;  %v1381_v2 = vpop.permute.xlu0 %1380 }
 0x13e   : > { %v1698_v42 = vsel %vm1688_vm4, %v1665_v25, %v1381_v2  ;;  %v1469_v8 = vsel %vm311_vm0, %v5619_v38, %v713_v53  ;;  %v640_v25 = vrot.slane %v6196_v41, 2 }
 0x13f   : > { %1204 = vrot.lane.b32.xlu1 %v6120_v14, %s5169_s18  ;;  %1202 = vrot.lane.b32.xlu0 %v6122_v15, %s5169_s18 }
 0x140   : > { %4391 = vmatmul.mubr.msk.f32.gmra.mrb[8].mxu0 %vm1733_vm12, %v1698_v42  ;;  %v6231_v42 = vsel %vm583_vm2, %v639_v62, %v640_v25  ;;  %v647_v62 = vrot.slane %v438_v57, 2 }
 0x141   : > { %v809_v37 = vpop.permute.xlu1 %808  ;;  %v807_v48 = vpop.permute.xlu0 %806 }
 0x142   : > { %v1502_v40 = vsel %vm1490_vm6, %v1469_v8, %v809_v37 }
 0x143   : > { %1300 = vrot.lane.b32.xlu1 %v6143_v18, %s5170_s23  ;;  %1298 = vrot.lane.b32.xlu0 %v6146_v60, %s5170_s23 }
 0x145   : > { %v905_v26 = vpop.permute.xlu1 %904  ;;  %v903_v5 = vpop.permute.xlu0 %902 }
 0x146   : > { %v1535_v38 = vsel %vm1523_vm7, %v1502_v40, %v905_v26 }
 0x147   : > { %726 = vrot.lane.b32.xlu1 %v5999_v39, %s5165_s10  ;;  %1394 = vrot.lane.b32.xlu0 %v6155_v49, %s5171_s6 }
 0x149   : > { %v1001_v22 = vpop.permute.xlu1 %1000  ;;  %v999_v4 = vpop.permute.xlu0 %998 }
 0x14a   : > { %v1568_v45 = vsel %vm1556_vm8, %v1535_v38, %v1001_v22 }
 0x14b   : > { %728 = vrot.lane.b32.xlu1 %v5994_v31, %s5165_s10  ;;  %1396 = vrot.lane.b32.xlu0 %v6162_v55, %s5171_s6  ;;  %v1501_v31 = vsel %vm1490_vm6, %v1468_v56, %v807_v48  ;;  %v6238_v48 = vsel %vm583_vm2, %v640_v25, %v642_v44 }
 0x14d   : > { %v1097_v1 = vpop.permute.xlu1 %1096  ;;  %v1095_v0 = vpop.permute.xlu0 %1094 }
 0x14e   : > { %v1601_v17 = vsel %vm1589_vm9, %v1568_v45, %v1097_v1 }
 0x14f   : > { %824 = vrot.lane.b32.xlu1 %v6069_v47, %s5164_s9  ;;  %822 = vrot.lane.b32.xlu0 %v6018_v23, %s5164_s9  ;;  %v1534_v47 = vsel %vm1523_vm7, %v1501_v31, %v903_v5  ;;  %v310_v31 = vld [vmem:[%s5352_s8 + $0xf8] sm:$0xff] }
 0x150   : > { %v1567_v23 = vsel %vm1556_vm8, %v1534_v47, %v999_v4  ;;  %399 = vst.msk [vmem:[#allocation2 + $0x189] sm:$0xff] %vm311_vm0, %v310_v31 }
 0x151   : > { %v1193_v39 = vpop.permute.xlu1 %1192  ;;  %v1191_v29 = vpop.permute.xlu0 %1190  ;;  %v1600_v43 = vsel %vm1589_vm9, %v1567_v23, %v1095_v0 }
 0x152   : > { %v1633_v50 = vsel %vm1622_vm10, %v1600_v43, %v1191_v29  ;;  %v1634_v36 = vsel %vm1622_vm10, %v1601_v17, %v1193_v39  ;;  %v437_v43 = vld [vmem:[#allocation2 + $0x128] sm:$0xff] }
 0x153   : > { %920 = vrot.lane.b32.xlu1 %v6120_v14, %s5166_s11  ;;  %918 = vrot.lane.b32.xlu0 %v6122_v15, %s5166_s11 }
 0x155   : > { %v1289_v24 = vpop.permute.xlu1 %1288  ;;  %v1287_v27 = vpop.permute.xlu0 %1286 }
 0x156   : > { %v1666_v51 = vsel %vm1655_vm11, %v1633_v50, %v1287_v27  ;;  %v1667_v54 = vsel %vm1655_vm11, %v1634_v36, %v1289_v24 }
 0x157   : > { %1016 = vrot.lane.b32.xlu1 %v6143_v18, %s5167_s12  ;;  %1014 = vrot.lane.b32.xlu0 %v6146_v60, %s5167_s12 }
 0x159   : > { %v715_v52 = vpop.permute.xlu1 %714  ;;  %v1383_v16 = vpop.permute.xlu0 %1382 }
 0x15a   : > { %v1699_v30 = vsel %vm1688_vm4, %v1666_v51, %v1383_v16  ;;  %v1470_v1 = vsel %vm311_vm0, %v5679_v9, %v715_v52  ;;  %v309_v9 = vld [vmem:[%s5352_s8 + $0xf0] sm:$0xff]  ;;  %v564_v52 = vrot.slane %v437_v43, 1  ;;  %v566_v16 = vrot.slane %v438_v57, 1  ;;  %s4157_s8 = sshll.u32 %s8186_s27, 1 }
 0x15b   : > { %1112 = vrot.lane.b32.xlu1 %v6162_v55, %s5168_s13  ;;  %1110 = vrot.lane.b32.xlu0 %v6155_v49, %s5168_s13  ;;  %398 = vst.msk [vmem:[#allocation2 + $0x181] sm:$0xff] %vm311_vm0, %v309_v9 }
 0x15c   : > { %4393 = vmatprep.mubr.msk.f32.mxu0 %vm1733_vm12, %v1699_v30  ;;  %v6287_v6 = vsel %vm502_vm3, %v564_v52, %v566_v16  ;;  %v6290_v13 = vsel %vm502_vm3, %v563_v33, %v564_v52  ;;  %v6355_v33 = vld [vmem:[%s8171_s2] ss:$0 sm:$0xff] }
 0x15d   : > { %v717_v21 = vpop.permute.xlu1 %716  ;;  %v1385_v28 = vpop.permute.xlu0 %1384 }
 0x15e   : > { %v1700_v32 = vsel %vm1688_vm4, %v1667_v54, %v1385_v28  ;;  %v1471_v29 = vsel %vm311_vm0, %v5671_v3, %v717_v21  ;;  %v645_v54 = vrot.slane %v437_v43, 2 }
 0x15f   : > { %1208 = vrot.lane.b32.xlu1 %v6196_v41, %s5169_s18  ;;  %1206 = vrot.lane.b32.xlu0 %v6198_v20, %s5169_s18 }
 0x160   : > { %4394 = vmatmul.mubr.msk.f32.gmra.mrb[10].mxu0 %vm1733_vm12, %v1700_v32  ;;  %v6297_v32 = vsel %vm583_vm2, %v644_v19, %v645_v54 }
 0x161   : > { %v813_v53 = vpop.permute.xlu1 %812  ;;  %v811_v2 = vpop.permute.xlu0 %810 }
 0x162   : > { %v1504_v47 = vsel %vm1490_vm6, %v1471_v29, %v813_v53  ;;  %v440_v29 = vld [vmem:[#allocation2 + $0x140] sm:$0xff] }
 0x163   : > { %1304 = vrot.lane.b32.xlu1 %v6219_v7, %s5170_s23  ;;  %1302 = vrot.lane.b32.xlu0 %v6222_v34, %s5170_s23 }
 0x165   : > { %v909_v46 = vpop.permute.xlu1 %908  ;;  %v907_v37 = vpop.permute.xlu0 %906 }
 0x166   : > { %v1537_v3 = vsel %vm1523_vm7, %v1504_v47, %v909_v46 }
 0x167   : > { %730 = vrot.lane.b32.xlu1 %v6146_v60, %s5165_s10  ;;  %1398 = vrot.lane.b32.xlu0 %v6231_v42, %s5171_s6 }
 0x169   : > { %v1005_v63 = vpop.permute.xlu1 %1004  ;;  %v1003_v26 = vpop.permute.xlu0 %1002 }
 0x16a   : > { %v1570_v40 = vsel %vm1556_vm8, %v1537_v3, %v1005_v63  ;;  %v569_v3 = vrot.slane %v440_v29, 1 }
 0x16b   : > { %732 = vrot.lane.b32.xlu1 %v6143_v18, %s5165_s10  ;;  %1400 = vrot.lane.b32.xlu0 %v6238_v48, %s5171_s6  ;;  %v1503_v18 = vsel %vm1490_vm6, %v1470_v1, %v811_v2  ;;  %v6304_v2 = vsel %vm583_vm2, %v645_v54, %v647_v62 }
 0x16d   : > { %v1101_v5 = vpop.permute.xlu1 %1100  ;;  %v1099_v22 = vpop.permute.xlu0 %1098 }
 0x16e   : > { %v1603_v38 = vsel %vm1589_vm9, %v1570_v40, %v1101_v5 }
 0x16f   : > { %828 = vrot.lane.b32.xlu1 %v6162_v55, %s5164_s9  ;;  %826 = vrot.lane.b32.xlu0 %v6155_v49, %s5164_s9  ;;  %v1536_v55 = vsel %vm1523_vm7, %v1503_v18, %v907_v37 }
 0x170   : > { %v1569_v49 = vsel %vm1556_vm8, %v1536_v55, %v1003_v26 }
 0x171   : > { %v1197_v60 = vpop.permute.xlu1 %1196  ;;  %v1195_v4 = vpop.permute.xlu0 %1194  ;;  %v1602_v56 = vsel %vm1589_vm9, %v1569_v49, %v1099_v22 }
 0x172   : > { %v1635_v24 = vsel %vm1622_vm10, %v1602_v56, %v1195_v4  ;;  %v1636_v51 = vsel %vm1622_vm10, %v1603_v38, %v1197_v60  ;;  %v441_v56 = vld [vmem:[#allocation2 + $0x148] sm:$0x3] }
 0x173   : > { %924 = vrot.lane.b32.xlu1 %v6196_v41, %s5166_s11  ;;  %922 = vrot.lane.b32.xlu0 %v6198_v20, %s5166_s11  ;;  %v652_v19 = vrot.slane %v441_v56, 2 }
 0x175   : > { %v1293_v0 = vpop.permute.xlu1 %1292  ;;  %v1291_v39 = vpop.permute.xlu0 %1290 }
 0x176   : > { %v1668_v27 = vsel %vm1655_vm11, %v1635_v24, %v1291_v39  ;;  %v1669_v45 = vsel %vm1655_vm11, %v1636_v51, %v1293_v0  ;;  %v650_v51 = vrot.slane %v440_v29, 2 }
 0x177   : > { %1020 = vrot.lane.b32.xlu1 %v6219_v7, %s5167_s12  ;;  %1018 = vrot.lane.b32.xlu0 %v6222_v34, %s5167_s12 }
 0x179   : > { %v719_v23 = vpop.permute.xlu1 %718  ;;  %v1387_v8 = vpop.permute.xlu0 %1386 }
 0x17a   : > { %v1701_v50 = vsel %vm1688_vm4, %v1668_v27, %v1387_v8  ;;  %v1472_v5 = vsel %vm311_vm0, %v5776_v10, %v719_v23  ;;  %v571_v27 = vrot.slane %v441_v56, 1 }
 0x17b   : > { %1116 = vrot.lane.b32.xlu1 %v6238_v48, %s5168_s13  ;;  %1114 = vrot.lane.b32.xlu0 %v6231_v42, %s5168_s13 }
 0x17c   : > { %4396 = vmatprep.mubr.msk.f32.mxu0 %vm1733_vm12, %v1701_v50  ;;  %v6347_v40 = vsel %vm502_vm3, %v569_v3, %v571_v27 }
 0x17d   : > { %v721_v30 = vpop.permute.xlu1 %720  ;;  %v1389_v17 = vpop.permute.xlu0 %1388 }
 0x17e   : > { %v1702_v36 = vsel %vm1688_vm4, %v1669_v45, %v1389_v17 }
 0x17f   : > { %1212 = vrot.lane.b32.xlu1 %v437_v43, %s5169_s18  ;;  %1210 = vrot.lane.b32.xlu0 %v436_v35, %s5169_s18 }
 0x180   : > { %4397 = vmatmul.mubr.msk.f32.gmra.mrb[12].mxu0 %vm1733_vm12, %v1702_v36 }
 0x181   : > { %v817_v21 = vpop.permute.xlu1 %816  ;;  %v815_v28 = vpop.permute.xlu0 %814 }
 0x183   : > { %1308 = vrot.lane.b32.xlu1 %v6287_v6, %s5170_s23  ;;  %1306 = vrot.lane.b32.xlu0 %v6290_v13, %s5170_s23 }
 0x185   : > { %v913_v25 = vpop.permute.xlu1 %912  ;;  %v911_v53 = vpop.permute.xlu0 %910 }
 0x187   : > { %734 = vrot.lane.b32.xlu1 %v6222_v34, %s5165_s10  ;;  %1402 = vrot.lane.b32.xlu0 %v6297_v32, %s5171_s6 }
 0x189   : > { %v1009_v44 = vpop.permute.xlu1 %1008  ;;  %v1007_v46 = vpop.permute.xlu0 %1006 }
 0x18b   : > { %736 = vrot.lane.b32.xlu1 %v6219_v7, %s5165_s10  ;;  %1404 = vrot.lane.b32.xlu0 %v6304_v2, %s5171_s6  ;;  %v1505_v7 = vsel %vm1490_vm6, %v1472_v5, %v815_v28 }
 0x18c   : > { %v1538_v22 = vsel %vm1523_vm7, %v1505_v7, %v911_v53  ;;  %v6372_v53 = vsel %vm583_vm2, %v650_v51, %v652_v19 }
 0x18d   : > { %v1105_v37 = vpop.permute.xlu1 %1104  ;;  %v1103_v63 = vpop.permute.xlu0 %1102 }
 0x18f   : > { %832 = vrot.lane.b32.xlu1 %v6238_v48, %s5164_s9  ;;  %830 = vrot.lane.b32.xlu0 %v6231_v42, %s5164_s9  ;;  %v1571_v48 = vsel %vm1556_vm8, %v1538_v22, %v1007_v46  ;;  %v1473_v42 = vsel %vm311_vm0, %v5768_v61, %v721_v30  ;;  %v439_v61 = vld [vmem:[#allocation2 + $0x138] sm:$0xff] }
 0x190   : > { %v1604_v1 = vsel %vm1589_vm9, %v1571_v48, %v1103_v63  ;;  %v1506_v10 = vsel %vm1490_vm6, %v1473_v42, %v817_v21  ;;  %v568_v23 = vrot.slane %v439_v61, 1  ;;  %v649_v38 = vrot.slane %v439_v61, 2 }
 0x191   : > { %v1201_v34 = vpop.permute.xlu1 %1200  ;;  %v1199_v26 = vpop.permute.xlu0 %1198  ;;  %v1539_v55 = vsel %vm1523_vm7, %v1506_v10, %v913_v25 }
 0x192   : > { %v1637_v18 = vsel %vm1622_vm10, %v1604_v1, %v1199_v26  ;;  %v1572_v9 = vsel %vm1556_vm8, %v1539_v55, %v1009_v44  ;;  %v6350_v50 = vsel %vm502_vm3, %v568_v23, %v569_v3  ;;  %v6363_v36 = vsel %vm583_vm2, %v649_v38, %v650_v51  ;;  %v444_v55 = vld [vmem:[#allocation2 + $0x160] sm:$0x3] }
 0x193   : > { %928 = vrot.lane.b32.xlu1 %v437_v43, %s5166_s11  ;;  %926 = vrot.lane.b32.xlu0 %v436_v35, %s5166_s11  ;;  %v1605_v47 = vsel %vm1589_vm9, %v1572_v9, %v1105_v37  ;;  %v576_v56 = vrot.slane %v444_v55, 1 }
 0x194   : > { %v1638_v24 = vsel %vm1622_vm10, %v1605_v47, %v1201_v34 }
 0x195   : > { %v1297_v60 = vpop.permute.xlu1 %1296  ;;  %v1295_v4 = vpop.permute.xlu0 %1294 }
 0x196   : > { %v1670_v0 = vsel %vm1655_vm11, %v1637_v18, %v1295_v4  ;;  %v1671_v8 = vsel %vm1655_vm11, %v1638_v24, %v1297_v60  ;;  %v443_v18 = vld [vmem:[#allocation2 + $0x158] sm:$0xff] }
 0x197   : > { %1024 = vrot.lane.b32.xlu1 %v6287_v6, %s5167_s12  ;;  %1022 = vrot.lane.b32.xlu0 %v6290_v13, %s5167_s12 }
 0x199   : > { %v723_v39 = vpop.permute.xlu1 %722  ;;  %v1391_v49 = vpop.permute.xlu0 %1390 }
 0x19a   : > { %v1703_v31 = vsel %vm1688_vm4, %v1670_v0, %v1391_v49  ;;  %v1474_v26 = vsel %vm311_vm0, %v5876_v11, %v723_v39 }
 0x19b   : > { %1120 = vrot.lane.b32.xlu1 %v6304_v2, %s5168_s13  ;;  %1118 = vrot.lane.b32.xlu0 %v6297_v32, %s5168_s13 }
 0x19c   : > { %4399 = vmatprep.mubr.msk.f32.mxu0 %vm1733_vm12, %v1703_v31 }
 0x19d   : > { %v725_v43 = vpop.permute.xlu1 %724  ;;  %v1393_v35 = vpop.permute.xlu0 %1392 }
 0x19e   : > { %v1704_v57 = vsel %vm1688_vm4, %v1671_v8, %v1393_v35 }
 0x19f   : > { %1216 = vrot.lane.b32.xlu1 %v440_v29, %s5169_s18  ;;  %1214 = vrot.lane.b32.xlu0 %v439_v61, %s5169_s18 }
 0x1a0   : > { %4400 = vmatmul.mubr.msk.f32.gmra.mrb[14].mxu0 %vm1733_vm12, %v1704_v57 }
 0x1a1   : > { %v821_v52 = vpop.permute.xlu1 %820  ;;  %v819_v16 = vpop.permute.xlu0 %818 }
 0x1a3   : > { %v4380_v45 = vpop.f32.mrb[0].mxu0  ;;  %1312 = vrot.lane.b32.xlu1 %v6347_v40, %s5170_s23  ;;  %1310 = vrot.lane.b32.xlu0 %v6350_v50, %s5170_s23 }
 0x1a4   : > { %v1906_v30 = vadd.f32 %v4380_v45, %v6355_v33  ;;  %v1900_v17 = vpop.f32.mrb[1].mxu0  ;;  %v657_v45 = vrot.slane %v444_v55, 2 }
 0x1a5   : > { %v1901_v54 = vadd.f32 %v6355_v33, %v1900_v17  ;;  %v917_v21 = vpop.permute.xlu1 %916  ;;  %v915_v28 = vpop.permute.xlu0 %914 }
 0x1a6   : > { %v2060_v62 = vmax.f32 %v1906_v30, 0.0 }
 0x1a7   : > { %v2059_v25 = vmax.f32 %v1901_v54, 0.0  ;;  %738 = vrot.lane.b32.xlu1 %v6290_v13, %s5165_s10  ;;  %1406 = vrot.lane.b32.xlu0 %v6363_v36, %s5171_s6 }
 0x1a8   : > { %2148 = vst.msk [vmem:[#allocation3 + $0x21] sm:$0xff] %vm1688_vm4, %v2060_v62 }
 0x1a9   : > { %2147 = vst.msk [vmem:[#allocation3 + $0x19] sm:$0xff] %vm1688_vm4, %v2059_v25  ;;  %v1013_v44 = vpop.permute.xlu1 %1012  ;;  %v1011_v46 = vpop.permute.xlu0 %1010 }
 0x1ab   : > { %740 = vrot.lane.b32.xlu1 %v6287_v6, %s5165_s10  ;;  %1408 = vrot.lane.b32.xlu0 %v6372_v53, %s5171_s6  ;;  %v1507_v6 = vsel %vm1490_vm6, %v1474_v26, %v819_v16 }
 0x1ac   : > { %v1540_v5 = vsel %vm1523_vm7, %v1507_v6, %v915_v28 }
 0x1ad   : > { %v1109_v37 = vpop.permute.xlu1 %1108  ;;  %v1107_v13 = vpop.permute.xlu0 %1106 }
 0x1af   : > { %836 = vrot.lane.b32.xlu1 %v6304_v2, %s5164_s9  ;;  %834 = vrot.lane.b32.xlu0 %v6297_v32, %s5164_s9  ;;  %v1573_v2 = vsel %vm1556_vm8, %v1540_v5, %v1011_v46  ;;  %v1475_v32 = vsel %vm311_vm0, %v5868_v59, %v725_v43  ;;  %v442_v59 = vld [vmem:[#allocation2 + $0x150] sm:$0xff]  ;;  %v655_v43 = vrot.slane %v443_v18, 2 }
 0x1b0   : > { %v1606_v60 = vsel %vm1589_vm9, %v1573_v2, %v1107_v13  ;;  %v1508_v11 = vsel %vm1490_vm6, %v1475_v32, %v821_v52  ;;  %v573_v9 = vrot.slane %v442_v59, 1  ;;  %v654_v8 = vrot.slane %v442_v59, 2 }
 0x1b1   : > { %v1205_v63 = vpop.permute.xlu1 %1204  ;;  %v1203_v34 = vpop.permute.xlu0 %1202  ;;  %v1541_v48 = vsel %vm1523_vm7, %v1508_v11, %v917_v21  ;;  %v6436_v28 = vsel %vm583_vm2, %v655_v43, %v657_v45  ;;  %v447_v11 = vld [vmem:[#allocation2 + $0x178] sm:$0x3]  ;;  %v3269_v45 = vld [vmem:[%s8172_s3] sm:$0xff] }
 0x1b2   : > { %v1639_v4 = vsel %vm1622_vm10, %v1606_v60, %v1203_v34  ;;  %v1574_v0 = vsel %vm1556_vm8, %v1541_v48, %v1013_v44  ;;  %v6427_v16 = vsel %vm583_vm2, %v654_v8, %v655_v43  ;;  %v6469_v60 = vld [vmem:[#allocation2 + $0x168] sm:$0xff] }
 0x1b3   : > { %932 = vrot.lane.b32.xlu1 %v440_v29, %s5166_s11  ;;  %930 = vrot.lane.b32.xlu0 %v439_v61, %s5166_s11  ;;  %v1607_v49 = vsel %vm1589_vm9, %v1574_v0, %v1109_v37  ;;  %v574_v61 = vrot.slane %v443_v18, 1 }
 0x1b4   : > { %v1640_v29 = vsel %vm1622_vm10, %v1607_v49, %v1205_v63 }
 0x1b5   : > { %v1301_v7 = vpop.permute.xlu1 %1300  ;;  %v1299_v22 = vpop.permute.xlu0 %1298  ;;  %v6416_v27 = vsel %vm502_vm3, %v574_v61, %v576_v56  ;;  %v6419_v23 = vsel %vm502_vm3, %v573_v9, %v574_v61  ;;  %v659_v56 = vrot.slane %v6469_v60, 2 }
 0x1b6   : > { %v1672_v42 = vsel %vm1655_vm11, %v1639_v4, %v1299_v22  ;;  %v1673_v31 = vsel %vm1655_vm11, %v1640_v29, %v1301_v7 }
 0x1b7   : > { %1028 = vrot.lane.b32.xlu1 %v6347_v40, %s5167_s12  ;;  %1026 = vrot.lane.b32.xlu0 %v6350_v50, %s5167_s12 }
 0x1b9   : > { %v727_v1 = vpop.permute.xlu1 %726  ;;  %v1395_v10 = vpop.permute.xlu0 %1394 }
 0x1ba   : > { %v1705_v39 = vsel %vm1688_vm4, %v1672_v42, %v1395_v10  ;;  %v1476_v13 = vsel %vm311_vm0, %v5978_v12, %v727_v1 }
 0x1bb   : > { %1124 = vrot.lane.b32.xlu1 %v6372_v53, %s5168_s13  ;;  %1122 = vrot.lane.b32.xlu0 %v6363_v36, %s5168_s13 }
 0x1bc   : > { %4402 = vmatprep.mubr.msk.f32.mxu0 %vm1733_vm12, %v1705_v39 }
 0x1bd   : > { %v729_v47 = vpop.permute.xlu1 %728  ;;  %v1397_v24 = vpop.permute.xlu0 %1396 }
 0x1be   : > { %v1706_v3 = vsel %vm1688_vm4, %v1673_v31, %v1397_v24 }
 0x1bf   : > { %1220 = vrot.lane.b32.xlu1 %v443_v18, %s5169_s18  ;;  %1218 = vrot.lane.b32.xlu0 %v442_v59, %s5169_s18 }
 0x1c0   : > { %4403 = vmatmul.mubr.msk.f32.gmra.mrb[16].mxu0 %vm1733_vm12, %v1706_v3 }
 0x1c1   : > { %v825_v35 = vpop.permute.xlu1 %824  ;;  %v823_v57 = vpop.permute.xlu0 %822 }
 0x1c3   : > { %v4383_v38 = vpop.f32.mrb[2].mxu0  ;;  %1316 = vrot.lane.b32.xlu1 %v6416_v27, %s5170_s23  ;;  %1314 = vrot.lane.b32.xlu0 %v6419_v23, %s5170_s23 }
 0x1c4   : > { %v1916_v51 = vadd.f32 %v4383_v38, %v6355_v33  ;;  %v1910_v52 = vpop.f32.mrb[3].mxu0 }
 0x1c5   : > { %v1911_v30 = vadd.f32 %v6355_v33, %v1910_v52  ;;  %v921_v17 = vpop.permute.xlu1 %920  ;;  %v919_v19 = vpop.permute.xlu0 %918 }
 0x1c6   : > { %v2062_v54 = vmax.f32 %v1916_v51, 0.0 }
 0x1c7   : > { %v2061_v21 = vmax.f32 %v1911_v30, 0.0  ;;  %742 = vrot.lane.b32.xlu1 %v6350_v50, %s5165_s10  ;;  %1410 = vrot.lane.b32.xlu0 %v6427_v16, %s5171_s6  ;;  %v3270_v30 = vld [vmem:[%s8172_s3 + $0x8] sm:$0xff] }
 0x1c8   : > { %2150 = vst.msk [vmem:[#allocation3 + $0x39] sm:$0xff] %vm1688_vm4, %v2062_v54 }
 0x1c9   : > { %2149 = vst.msk [vmem:[#allocation3 + $0x31] sm:$0xff] %vm1688_vm4, %v2061_v21  ;;  %v1017_v62 = vpop.permute.xlu1 %1016  ;;  %v1015_v25 = vpop.permute.xlu0 %1014  ;;  %v5172_v21 = vmov 0.0|0.0  }
 0x1ca   : > { %4490 = vmatprep.subr.bf16.mxu0 %v5172_v21  ;;  %4594 = vmatprep.subr.bf16.mxu1 %v5172_v21 }
 0x1cb   : > { %744 = vrot.lane.b32.xlu1 %v6347_v40, %s5165_s10  ;;  %1412 = vrot.lane.b32.xlu0 %v6436_v28, %s5171_s6  ;;  %v1509_v40 = vsel %vm1490_vm6, %v1476_v13, %v823_v57  ;;  %v3273_v13 = vld [vmem:[%s8172_s3 + $0x20] sm:$0xff] }
 0x1cc   : > { %v1542_v63 = vsel %vm1523_vm7, %v1509_v40, %v919_v19  ;;  %v4491_v19 = vpack.c.bf16 %v3270_v30, %v3269_v45  ;;  %v3274_v40 = vld [vmem:[%s8172_s3 + $0x28] sm:$0xff] }
 0x1cd   : > { %v1113_v44 = vpop.permute.xlu1 %1112  ;;  %v1111_v50 = vpop.permute.xlu0 %1110 }
 0x1ce   : > { %4492 = vmatpush1.bf16.msra.mxu0 %v4491_v19  ;;  %4610 = vmatpush1.bf16.msra.mxu1 %v4491_v19 }
 0x1cf   : > { %840 = vrot.lane.b32.xlu1 %v6372_v53, %s5164_s9  ;;  %838 = vrot.lane.b32.xlu0 %v6363_v36, %s5164_s9  ;;  %v1575_v53 = vsel %vm1556_vm8, %v1542_v63, %v1015_v25  ;;  %v1477_v36 = vsel %vm311_vm0, %v5970_v58, %v729_v47  ;;  %v6467_v58 = vld [vmem:[#allocation2 + $0x170] sm:$0xff] }
 0x1d0   : > { %v1608_v6 = vsel %vm1589_vm9, %v1575_v53, %v1111_v50  ;;  %v1510_v12 = vsel %vm1490_vm6, %v1477_v36, %v825_v35  ;;  %v579_v10 = vrot.slane %v6467_v58, 1  ;;  %v660_v9 = vrot.slane %v6467_v58, 2  ;;  %4493 = vmatprep.subr.bf16.mxu0 %v5172_v21  ;;  %4595 = vmatprep.subr.bf16.mxu1 %v5172_v21 }
 0x1d1   : > { %v1209_v46 = vpop.permute.xlu1 %1208  ;;  %v1207_v37 = vpop.permute.xlu0 %1206  ;;  %v1543_v7 = vsel %vm1523_vm7, %v1510_v12, %v921_v17  ;;  %v662_v35 = vrot.slane %v447_v11, 2 }
 0x1d2   : > { %v1641_v5 = vsel %vm1622_vm10, %v1608_v6, %v1207_v37  ;;  %v1576_v4 = vsel %vm1556_vm8, %v1543_v7, %v1017_v62  ;;  %v6507_v43 = vsel %vm583_vm2, %v659_v56, %v660_v9 }
 0x1d3   : > { %936 = vrot.lane.b32.xlu1 %v443_v18, %s5166_s11  ;;  %934 = vrot.lane.b32.xlu0 %v442_v59, %s5166_s11  ;;  %v1609_v42 = vsel %vm1589_vm9, %v1576_v4, %v1113_v44  ;;  %v581_v18 = vrot.slane %v447_v11, 1  ;;  %v578_v59 = vrot.slane %v6469_v60, 1  ;;  %v6524_v54 = vsel %vm583_vm2, %v660_v9, %v662_v35  ;;  %v3272_v44 = vld [vmem:[%s8172_s3 + $0x18] sm:$0xff] }
 0x1d4   : > { %v1642_v1 = vsel %vm1622_vm10, %v1609_v42, %v1209_v46 }
 0x1d5   : > { %v1305_v34 = vpop.permute.xlu1 %1304  ;;  %v1303_v26 = vpop.permute.xlu0 %1302  ;;  %v6492_v29 = vsel %vm502_vm3, %v579_v10, %v581_v18  ;;  %v6495_v61 = vsel %vm502_vm3, %v578_v59, %v579_v10  ;;  %v6595_v10 = vld [vmem:[#allocation2 + $0x180] sm:$0xff]  ;;  %v6597_v18 = vld [vmem:[#allocation2 + $0x190] sm:$0x3] }
 0x1d6   : > { %v1674_v22 = vsel %vm1655_vm11, %v1641_v5, %v1303_v26  ;;  %v1675_v55 = vsel %vm1655_vm11, %v1642_v1, %v1305_v34  ;;  %v6593_v1 = vld [vmem:[#allocation2 + $0x188] sm:$0xff]  ;;  %v672_v45 = vrot.slane %v6595_v10, 2 }
 0x1d7   : > { %1032 = vrot.lane.b32.xlu1 %v6416_v27, %s5167_s12  ;;  %1030 = vrot.lane.b32.xlu0 %v6419_v23, %s5167_s12  ;;  %v668_v9 = vrot.slane %v6593_v1, 1 }
 0x1d9   : > { %v6465_v2 = vpop.permute.xlu1 %730  ;;  %v1399_v32 = vpop.permute.xlu0 %1398 }
 0x1da   : > { %v1707_v48 = vsel %vm1688_vm4, %v1674_v22, %v1399_v32  ;;  %v1478_v26 = vsel %vm311_vm0, %v6122_v15, %v6465_v2  ;;  %v3277_v2 = vld [vmem:[%s8172_s3 + $0x40] sm:$0xff]  ;;  %v3278_v32 = vld [vmem:[%s8172_s3 + $0x48] sm:$0xff] }
 0x1db   : > { %1128 = vrot.lane.b32.xlu1 %v6436_v28, %s5168_s13  ;;  %1126 = vrot.lane.b32.xlu0 %v6427_v16, %s5168_s13 }
 0x1dc   : > { %4405 = vmatprep.mubr.msk.f32.mxu0 %vm1733_vm12, %v1707_v48 }
 0x1dd   : > { %v6483_v0 = vpop.permute.xlu1 %732  ;;  %v1401_v39 = vpop.permute.xlu0 %1400 }
 0x1de   : > { %v1708_v49 = vsel %vm1688_vm4, %v1675_v55, %v1401_v39  ;;  %v1479_v7 = vsel %vm311_vm0, %v6120_v14, %v6483_v0  ;;  %v3279_v39 = vld [vmem:[%s8172_s3 + $0x50] sm:$0xff] }
 0x1df   : > { %1224 = vrot.lane.b32.xlu1 %v6467_v58, %s5169_s18  ;;  %1222 = vrot.lane.b32.xlu0 %v6469_v60, %s5169_s18 }
 0x1e0   : > { %4406 = vmatmul.mubr.msk.f32.gmra.mrb[18].mxu0 %vm1733_vm12, %v1708_v49  ;;  %v3280_v49 = vld [vmem:[%s8172_s3 + $0x58] sm:$0xff] }
 0x1e1   : > { %v6499_v31 = vpop.permute.xlu1 %828  ;;  %v827_v47 = vpop.permute.xlu0 %826  ;;  %v4506_v35 = vpack.c.bf16 %v3280_v49, %v3279_v39 }
 0x1e2   : > { %v1511_v53 = vsel %vm1490_vm6, %v1478_v26, %v827_v47  ;;  %v670_v47 = vrot.slane %v6597_v18, 1 }
 0x1e3   : > { %v4386_v24 = vpop.f32.mrb[4].mxu0  ;;  %1320 = vrot.lane.b32.xlu1 %v6492_v29, %s5170_s23  ;;  %1318 = vrot.lane.b32.xlu0 %v6495_v61, %s5170_s23 }
 0x1e4   : > { %v1926_v3 = vadd.f32 %v4386_v24, %v6355_v33  ;;  %v1920_v8 = vpop.f32.mrb[5].mxu0  ;;  %v6639_v30 = vsel %vm502_vm3, %v668_v9, %v670_v47  ;;  %v3293_v47 = vld [vmem:[%s8172_s3 + $0xc0] sm:$0xff] }
 0x1e5   : > { %v1921_v57 = vadd.f32 %v6355_v33, %v1920_v8  ;;  %v6510_v38 = vpop.permute.xlu1 %924  ;;  %v923_v51 = vpop.permute.xlu0 %922 }
 0x1e6   : > { %v2064_v52 = vmax.f32 %v1926_v3, 0.0  ;;  %v1544_v36 = vsel %vm1523_vm7, %v1511_v53, %v923_v51  ;;  %v3282_v51 = vld [vmem:[%s8172_s3 + $0x68] sm:$0xff]  ;;  %v3285_v53 = vld [vmem:[%s8172_s3 + $0x80] sm:$0xff] }
 0x1e7   : > { %v2063_v17 = vmax.f32 %v1921_v57, 0.0  ;;  %746 = vrot.lane.b32.xlu1 %v6419_v23, %s5165_s10  ;;  %1414 = vrot.lane.b32.xlu0 %v6507_v43, %s5171_s6  ;;  %v3271_v23 = vld [vmem:[%s8172_s3 + $0x10] sm:$0xff] }
 0x1e8   : > { %2152 = vst.msk [vmem:[#allocation3 + $0x51] sm:$0xff] %vm1688_vm4, %v2064_v52  ;;  %v4494_v50 = vpack.c.bf16 %v3272_v44, %v3271_v23  ;;  %v673_v52 = vrot.slane %v6593_v1, 2  ;;  %v3283_v44 = vld [vmem:[%s8172_s3 + $0x70] sm:$0xff] }
 0x1e9   : > { %2151 = vst.msk [vmem:[#allocation3 + $0x49] sm:$0xff] %vm1688_vm4, %v2063_v17  ;;  %v1021_v62 = vpop.permute.xlu1 %1020  ;;  %v1019_v25 = vpop.permute.xlu0 %1018 }
 0x1ea   : > { %4495 = vmatpush1.bf16.msra.mxu0 %v4494_v50  ;;  %4611 = vmatpush1.bf16.msra.mxu1 %v4494_v50  ;;  %v1577_v5 = vsel %vm1556_vm8, %v1544_v36, %v1019_v25  ;;  %v3284_v50 = vld [vmem:[%s8172_s3 + $0x78] sm:$0xff]  ;;  %v3286_v36 = vld [vmem:[%s8172_s3 + $0x88] sm:$0xff] }
 0x1eb   : > { %748 = vrot.lane.b32.xlu1 %v6416_v27, %s5165_s10  ;;  %1416 = vrot.lane.b32.xlu0 %v6524_v54, %s5171_s6  ;;  %v4497_v27 = vpack.c.bf16 %v3274_v40, %v3273_v13  ;;  %v6662_v13 = vsel %vm583_vm2, %v672_v45, %v673_v52  ;;  %v675_v40 = vrot.slane %v6597_v18, 2  ;;  %v4512_v26 = vpack.c.bf16 %v3284_v50, %v3283_v44  ;;  %v6764_v45 = vld [vmem:[#allocation2 + $0x1a8] sm:$0x3] }
 0x1ec   : > { %4496 = vmatprep.subr.bf16.mxu0 %v5172_v21  ;;  %4596 = vmatprep.subr.bf16.mxu1 %v5172_v21 }
 0x1ed   : > { %v1117_v46 = vpop.permute.xlu1 %1116  ;;  %v1115_v37 = vpop.permute.xlu0 %1114 }
 0x1ee   : > { %4498 = vmatpush1.bf16.msra.mxu0 %v4497_v27  ;;  %4612 = vmatpush1.bf16.msra.mxu1 %v4497_v27  ;;  %v1610_v22 = vsel %vm1589_vm9, %v1577_v5, %v1115_v37  ;;  %v3287_v5 = vld [vmem:[%s8172_s3 + $0x90] sm:$0xff] }
 0x1ef   : > { %844 = vrot.lane.b32.xlu1 %v6436_v28, %s5164_s9  ;;  %842 = vrot.lane.b32.xlu0 %v6427_v16, %s5164_s9  ;;  %v3275_v16 = vld [vmem:[%s8172_s3 + $0x30] sm:$0xff]  ;;  %v3276_v28 = vld [vmem:[%s8172_s3 + $0x38] sm:$0xff] }
 0x1f0   : > { %4499 = vmatprep.subr.bf16.mxu0 %v5172_v21  ;;  %4597 = vmatprep.subr.bf16.mxu1 %v5172_v21  ;;  %v4500_v12 = vpack.c.bf16 %v3276_v28, %v3275_v16 }
 0x1f1   : > { %v1213_v63 = vpop.permute.xlu1 %1212  ;;  %v1211_v34 = vpop.permute.xlu0 %1210 }
 0x1f2   : > { %v1643_v14 = vsel %vm1622_vm10, %v1610_v22, %v1211_v34  ;;  %4501 = vmatpush1.bf16.msra.mxu0 %v4500_v12  ;;  %4613 = vmatpush1.bf16.msra.mxu1 %v4500_v12  ;;  %v4515_v12 = vpack.c.bf16 %v3286_v36, %v3285_v53  ;;  %v6804_v36 = vld [vmem:[#allocation3 + $0x20] sm:$0xff] }
 0x1f3   : > { %940 = vrot.lane.b32.xlu1 %v6467_v58, %s5166_s11  ;;  %938 = vrot.lane.b32.xlu0 %v6469_v60, %s5166_s11  ;;  %v1512_v58 = vsel %vm1490_vm6, %v1479_v7, %v6499_v31  ;;  %v4503_v60 = vpack.c.bf16 %v3278_v32, %v3277_v2  ;;  %v667_v31 = vrot.slane %v6595_v10, 1  ;;  %v3288_v7 = vld [vmem:[%s8172_s3 + $0x98] sm:$0xff] }
 0x1f4   : > { %v1545_v11 = vsel %vm1523_vm7, %v1512_v58, %v6510_v38  ;;  %4502 = vmatprep.subr.bf16.mxu0 %v5172_v21  ;;  %4598 = vmatprep.subr.bf16.mxu1 %v5172_v21  ;;  %v3281_v38 = vld [vmem:[%s8172_s3 + $0x60] sm:$0xff]  ;;  %v4518_v32 = vpack.c.bf16 %v3288_v7, %v3287_v5  ;;  %v3290_v58 = vld [vmem:[%s8172_s3 + $0xa8] sm:$0xff] }
 0x1f5   : > { %v1309_v6 = vpop.permute.xlu1 %1308  ;;  %v1307_v15 = vpop.permute.xlu0 %1306  ;;  %v1578_v59 = vsel %vm1556_vm8, %v1545_v11, %v1021_v62  ;;  %v6642_v17 = vsel %vm502_vm3, %v667_v31, %v668_v9  ;;  %v4509_v25 = vpack.c.bf16 %v3282_v51, %v3281_v38  ;;  %v6760_v51 = vld [vmem:[#allocation2 + $0x1a0] sm:$0xff] }
 0x1f6   : > { %v1676_v4 = vsel %vm1655_vm11, %v1643_v14, %v1307_v15  ;;  %v1611_v0 = vsel %vm1589_vm9, %v1578_v59, %v1117_v46  ;;  %4504 = vmatpush1.bf16.msra.mxu0 %v4503_v60  ;;  %4614 = vmatpush1.bf16.msra.mxu1 %v4503_v60  ;;  %v681_v50 = vrot.slane %v6760_v51, 1  ;;  %v686_v53 = vrot.slane %v6760_v51, 2 }
 0x1f7   : > { %1036 = vrot.lane.b32.xlu1 %v6492_v29, %s5167_s12  ;;  %1034 = vrot.lane.b32.xlu0 %v6495_v61, %s5167_s12  ;;  %v1644_v56 = vsel %vm1622_vm10, %v1611_v0, %v1213_v63 }
 0x1f8   : > { %v1677_v24 = vsel %vm1655_vm11, %v1644_v56, %v1309_v6  ;;  %4505 = vmatprep.subr.bf16.mxu0 %v5172_v21  ;;  %4599 = vmatprep.subr.bf16.mxu1 %v5172_v21  ;;  %v6682_v6 = vsel %vm583_vm2, %v673_v52, %v675_v40  ;;  %v6762_v52 = vld [vmem:[#allocation2 + $0x198] sm:$0xff]  ;;  %v6787_v40 = vld [vmem:[#allocation3] sm:$0xff] }
 0x1f9   : > { %v6591_v48 = vpop.permute.xlu1 %734  ;;  %v1403_v42 = vpop.permute.xlu0 %1402 }
 0x1fa   : > { %v1709_v55 = vsel %vm1688_vm4, %v1676_v4, %v1403_v42  ;;  %4507 = vmatpush1.bf16.msra.mxu0 %v4506_v35  ;;  %4615 = vmatpush1.bf16.msra.mxu1 %v4506_v35  ;;  %v1480_v4 = vsel %vm311_vm0, %v6198_v20, %v6591_v48 }
 0x1fb   : > { %1132 = vrot.lane.b32.xlu1 %v6524_v54, %s5168_s13  ;;  %1130 = vrot.lane.b32.xlu0 %v6507_v43, %s5168_s13 }
 0x1fc   : > { %4408 = vmatprep.mubr.msk.f32.mxu0 %vm1733_vm12, %v1709_v55  ;;  %4508 = vmatprep.subr.bf16.mxu0 %v5172_v21 }
 0x1fd   : > { %v6620_v3 = vpop.permute.xlu1 %736  ;;  %v1405_v8 = vpop.permute.xlu0 %1404  ;;  %4600 = vmatprep.subr.bf16.mxu1 %v5172_v21 }
 0x1fe   : > { %v1710_v57 = vsel %vm1688_vm4, %v1677_v24, %v1405_v8  ;;  %4510 = vmatpush1.bf16.msra.mxu0 %v4509_v25  ;;  %4616 = vmatpush1.bf16.msra.mxu1 %v4509_v25  ;;  %v1481_v56 = vsel %vm311_vm0, %v6196_v41, %v6620_v3  ;;  %v3294_v24 = vld [vmem:[%s8172_s3 + $0xc8] sm:$0xff]  ;;  %v3295_v25 = vld [vmem:[%s8172_s3 + $0xd0] sm:$0xff] }
 0x1ff   : > { %1228 = vrot.lane.b32.xlu1 %v6593_v1, %s5169_s18  ;;  %1226 = vrot.lane.b32.xlu0 %v6595_v10, %s5169_s18 }
 0x200   : > { %4409 = vmatmul.mubr.msk.f32.gmra.mrb[20].mxu0 %vm1733_vm12, %v1710_v57  ;;  %4511 = vmatprep.subr.bf16.mxu0 %v5172_v21 }
 0x201   : > { %v6644_v19 = vpop.permute.xlu1 %832  ;;  %v6646_v62 = vpop.permute.xlu0 %830  ;;  %4601 = vmatprep.subr.bf16.mxu1 %v5172_v21 }
 0x202   : > { %4513 = vmatpush1.bf16.msra.mxu0 %v4512_v26  ;;  %4617 = vmatpush1.bf16.msra.mxu1 %v4512_v26  ;;  %v1513_v18 = vsel %vm1490_vm6, %v1480_v4, %v6646_v62  ;;  %v1514_v41 = vsel %vm1490_vm6, %v1481_v56, %v6644_v19  ;;  %v6826_v4 = vld [vmem:[#allocation3 + $0x30] sm:$0xff] }
 0x203   : > { %v4389_v23 = vpop.f32.mrb[6].mxu0  ;;  %1324 = vrot.lane.b32.xlu1 %v6639_v30, %s5170_s23  ;;  %1322 = vrot.lane.b32.xlu0 %v6642_v17, %s5170_s23 }
 0x204   : > { %v1936_v46 = vadd.f32 %v4389_v23, %v6355_v33  ;;  %v1930_v37 = vpop.f32.mrb[7].mxu0  ;;  %4514 = vmatprep.subr.bf16.mxu0 %v5172_v21  ;;  %4602 = vmatprep.subr.bf16.mxu1 %v5172_v21  ;;  %v3296_v23 = vld [vmem:[%s8172_s3 + $0xd8] sm:$0xff] }
 0x205   : > { %v1931_v27 = vadd.f32 %v6355_v33, %v1930_v37  ;;  %v6666_v63 = vpop.permute.xlu1 %928  ;;  %v927_v34 = vpop.permute.xlu0 %926  ;;  %v683_v37 = vrot.slane %v6764_v45, 1 }
 0x206   : > { %v2066_v16 = vmax.f32 %v1936_v46, 0.0  ;;  %4516 = vmatpush1.bf16.msra.mxu0 %v4515_v12  ;;  %4618 = vmatpush1.bf16.msra.mxu1 %v4515_v12  ;;  %v1546_v59 = vsel %vm1523_vm7, %v1513_v18, %v927_v34  ;;  %v1547_v8 = vsel %vm1523_vm7, %v1514_v41, %v6666_v63  ;;  %v680_v46 = vrot.slane %v6762_v52, 1  ;;  %v6835_v18 = vld [vmem:[#allocation3 + $0x38] sm:$0xff]  ;;  %v6861_v41 = vld [vmem:[#allocation3 + $0x40] sm:$0x3] }
 0x207   : > { %v2065_v28 = vmax.f32 %v1931_v27, 0.0  ;;  %750 = vrot.lane.b32.xlu1 %v6495_v61, %s5165_s10  ;;  %1418 = vrot.lane.b32.xlu0 %v6662_v13, %s5171_s6  ;;  %v4530_v34 = vpack.c.bf16 %v3296_v23, %v3295_v25  ;;  %v685_v12 = vrot.slane %v6762_v52, 2  ;;  %v684_v5 = vsel %vm502_vm3, %v681_v50, %v683_v37  ;;  %v6889_v37 = vld [vmem:[#allocation3 + $0x48] sm:$0xff] }
 0x208   : > { %2154 = vst.msk [vmem:[#allocation3 + $0x69] sm:$0xff] %vm1688_vm4, %v2066_v16  ;;  %4517 = vmatprep.subr.bf16.mxu0 %v5172_v21  ;;  %4603 = vmatprep.subr.bf16.mxu1 %v5172_v21  ;;  %v6794_v16 = vld [vmem:[#allocation3 + $0x8] sm:$0xff]  ;;  %v682_v7 = vsel %vm502_vm3, %v680_v46, %v681_v50  ;;  %v2371_v23 = vrot.slane %v6826_v4, 2 }
 0x209   : > { %2153 = vst.msk [vmem:[#allocation3 + $0x61] sm:$0xff] %vm1688_vm4, %v2065_v28  ;;  %v6685_v15 = vpop.permute.xlu1 %1024  ;;  %v1023_v61 = vpop.permute.xlu0 %1022  ;;  %v6796_v28 = vld [vmem:[#allocation3 + $0x18] sm:$0xff] }
 0x20a   : > { %4519 = vmatpush1.bf16.msra.mxu0 %v4518_v32  ;;  %4619 = vmatpush1.bf16.msra.mxu1 %v4518_v32  ;;  %v1579_v39 = vsel %vm1556_vm8, %v1546_v59, %v1023_v61  ;;  %v3298_v61 = vld [vmem:[%s8172_s3 + $0xe8] sm:$0xff] }
 0x20b   : > { %752 = vrot.lane.b32.xlu1 %v6492_v29, %s5165_s10  ;;  %1420 = vrot.lane.b32.xlu0 %v6682_v6, %s5171_s6  ;;  %v3289_v29 = vld [vmem:[%s8172_s3 + $0xa0] sm:$0xff] }
 0x20c   : > { %v4521_v11 = vpack.c.bf16 %v3290_v58, %v3289_v29  ;;  %4520 = vmatprep.subr.bf16.mxu0 %v5172_v21  ;;  %4604 = vmatprep.subr.bf16.mxu1 %v5172_v21  ;;  %v2361_v29 = vrot.slane %v6787_v40, 2  ;;  %v2362_v58 = vrot.slane %v6794_v16, 2 }
 0x20d   : > { %v6699_v22 = vpop.permute.xlu1 %1120  ;;  %v1119_v2 = vpop.permute.xlu0 %1118 }
 0x20e   : > { %4522 = vmatpush1.bf16.msra.mxu0 %v4521_v11  ;;  %4620 = vmatpush1.bf16.msra.mxu1 %v4521_v11  ;;  %v1612_v9 = vsel %vm1589_vm9, %v1579_v39, %v1119_v2 }
 0x20f   : > { %848 = vrot.lane.b32.xlu1 %v6524_v54, %s5164_s9  ;;  %846 = vrot.lane.b32.xlu0 %v6507_v43, %s5164_s9  ;;  %v3291_v43 = vld [vmem:[%s8172_s3 + $0xb0] sm:$0xff]  ;;  %v3292_v54 = vld [vmem:[%s8172_s3 + $0xb8] sm:$0xff]  ;;  %s5174_s9 = smov 96  }
 0x210   : > { %v4524_v0 = vpack.c.bf16 %v3292_v54, %v3291_v43  ;;  %4523 = vmatprep.subr.bf16.mxu0 %v5172_v21  ;;  %4605 = vmatprep.subr.bf16.mxu1 %v5172_v21  ;;  %v2367_v43 = vrot.slane %v6804_v36, 2  ;;  %v6830_v54 = vld [vmem:[#allocation3 + $0x28] sm:$0x3] }
 0x211   : > { %v1217_v14 = vpop.permute.xlu1 %1216  ;;  %v1215_v60 = vpop.permute.xlu0 %1214 }
 0x212   : > { %v1645_v3 = vsel %vm1622_vm10, %v1612_v9, %v1215_v60  ;;  %4525 = vmatpush1.bf16.msra.mxu0 %v4524_v0  ;;  %4621 = vmatpush1.bf16.msra.mxu1 %v4524_v0  ;;  %v2181_v60 = vld [vmem:[#allocation3 + $0x10] sm:$0x3]  ;;  %v2363_v0 = vsel %vm583_vm2, %v2361_v29, %v2362_v58 }
 0x213   : > { %v4392_v42 = vpop.f32.mrb[8].mxu0  ;;  %944 = vrot.lane.b32.xlu1 %v6593_v1, %s5166_s11  ;;  %942 = vrot.lane.b32.xlu0 %v6595_v10, %s5166_s11  ;;  %s278_s11 = scalar_lea.vmem %s8176_s7, %s4157_s8 }
 0x214   : > { %v1946_v20 = vadd.f32 %v4392_v42, %v6355_v33  ;;  %v1940_v48 = vpop.f32.mrb[9].mxu0  ;;  %4526 = vmatprep.subr.bf16.mxu0 %v5172_v21  ;;  %4606 = vmatprep.subr.bf16.mxu1 %v5172_v21  ;;  %v2366_v42 = vrot.slane %v6796_v28, 2 }
 0x215   : > { %v1941_v1 = vadd.f32 %v6355_v33, %v1940_v48  ;;  %v1313_v55 = vpop.permute.xlu1 %1312  ;;  %v1311_v10 = vpop.permute.xlu0 %1310  ;;  %v3300_v48 = vld [vmem:[%s8172_s3 + $0xf8] sm:$0xff] }
 0x216   : > { %v2068_v49 = vmax.f32 %v1946_v20, 0.0  ;;  %v1678_v35 = vsel %vm1655_vm11, %v1645_v3, %v1311_v10  ;;  %v3299_v20 = vld [vmem:[%s8172_s3 + $0xf0] sm:$0xff]  ;;  %v6853_v9 = vsel %vm583_vm2, %v2366_v42, %v2367_v43  ;;  %v2374_v42 = vrot.slane %v6861_v41, 2 }
 0x217   : > { %v2067_v31 = vmax.f32 %v1941_v1, 0.0  ;;  %1040 = vrot.lane.b32.xlu1 %v6639_v30, %s5167_s12  ;;  %1038 = vrot.lane.b32.xlu0 %v6642_v17, %s5167_s12  ;;  %v4527_v30 = vpack.c.bf16 %v3294_v24, %v3293_v47  ;;  %v1580_v17 = vsel %vm1556_vm8, %v1547_v8, %v6685_v15  ;;  %v3297_v15 = vld [vmem:[%s8172_s3 + $0xe0] sm:$0xff]  ;;  %v687_v1 = vsel %vm583_vm2, %v685_v12, %v686_v53 }
 0x218   : > { %2156 = vst.msk [vmem:[#allocation3 + $0x81] sm:$0xff] %vm1688_vm4, %v2068_v49  ;;  %v1613_v62 = vsel %vm1589_vm9, %v1580_v17, %v6699_v22  ;;  %v688_v22 = vrot.slane %v6764_v45, 2  ;;  %v4533_v11 = vpack.c.bf16 %v3298_v61, %v3297_v15  ;;  %v2284_v49 = vrot.slane %v2181_v60, 1 }
 0x219   : > { %2155 = vst.msk [vmem:[#allocation3 + $0x79] sm:$0xff] %vm1688_vm4, %v2067_v31  ;;  %v6758_v57 = vpop.permute.xlu1 %738  ;;  %v1407_v38 = vpop.permute.xlu0 %1406  ;;  %v1646_v44 = vsel %vm1622_vm10, %v1613_v62, %v1217_v14  ;;  %4528 = vmatpush1.bf16.msra.mxu0 %v4527_v30  ;;  %4622 = vmatpush1.bf16.msra.mxu1 %v4527_v30  ;;  %v2282_v14 = vrot.slane %v6794_v16, 1  ;;  %v4536_v56 = vpack.c.bf16 %v3300_v48, %v3299_v20  ;;  %v2369_v31 = vrot.slane %v6830_v54, 2 }
 0x21a   : > { %v1711_v19 = vsel %vm1688_vm4, %v1678_v35, %v1407_v38  ;;  %4529 = vmatprep.subr.bf16.mxu0 %v5172_v21  ;;  %4607 = vmatprep.subr.bf16.mxu1 %v5172_v21  ;;  %v689_v59 = vsel %vm583_vm2, %v686_v53, %v688_v22  ;;  %v2291_v47 = vrot.slane %v6826_v4, 1  ;;  %v2292_v24 = vrot.slane %v6835_v18, 1 }
 0x21b   : > { %1136 = vrot.lane.b32.xlu1 %v6682_v6, %s5168_s13  ;;  %1134 = vrot.lane.b32.xlu0 %v6662_v13, %s5168_s13  ;;  %v1679_v13 = vsel %vm1655_vm11, %v1646_v44, %v1313_v55  ;;  %v2281_v6 = vrot.slane %v6787_v40, 1  ;;  %v4653_v35 = vpack.i.bf16 %v2363_v0, %v6826_v4  ;;  %v2294_v30 = vrot.slane %v6861_v41, 1 }
 0x21c   : > { %4411 = vmatprep.mubr.msk.f32.mxu0 %vm1733_vm12, %v1711_v19  ;;  %v6873_v45 = vsel %vm502_vm3, %v2291_v47, %v2292_v24  ;;  %v2364_v17 = vrot.slane %v2181_v60, 2  ;;  %v2372_v44 = vrot.slane %v6835_v18, 2  ;;  %v2287_v53 = vrot.slane %v6804_v36, 1 }
 0x21d   : > { %v6791_v27 = vpop.permute.xlu1 %740  ;;  %v1409_v63 = vpop.permute.xlu0 %1408  ;;  %4531 = vmatpush1.bf16.msra.mxu0 %v4530_v34  ;;  %4623 = vmatpush1.bf16.msra.mxu1 %v4530_v34  ;;  %v2283_v39 = vsel %vm502_vm3, %v2281_v6, %v2282_v14  ;;  %v4658_v25 = vpack.i.bf16 %v6796_v28, %v6873_v45  ;;  %v6886_v50 = vsel %vm502_vm3, %v2292_v24, %v2294_v30  ;;  %v6897_v34 = vld [vmem:[#allocation3 + $0x68] sm:$0xff] }
 0x21e   : > { %v1712_v26 = vsel %vm1688_vm4, %v1679_v13, %v1409_v63  ;;  %4532 = vmatprep.subr.bf16.mxu0 %v5172_v21  ;;  %4608 = vmatprep.subr.bf16.mxu1 %v5172_v21  ;;  %v4648_v38 = vpack.i.bf16 %v2283_v39, %v6853_v9  ;;  %v2365_v46 = vsel %vm583_vm2, %v2362_v58, %v2364_v17  ;;  %v6893_v13 = vld [vmem:[#allocation3 + $0x50] sm:$0xff]  ;;  %v6895_v63 = vld [vmem:[#allocation3 + $0x60] sm:$0xff]  ;;  %v2382_v58 = vrot.slane %v6897_v34, 2 }
 0x21f   : > { %1232 = vrot.lane.b32.xlu1 %v6760_v51, %s5169_s18  ;;  %1230 = vrot.lane.b32.xlu0 %v6762_v52, %s5169_s18  ;;  %v2285_v51 = vsel %vm502_vm3, %v2282_v14, %v2284_v49  ;;  %v6870_v52 = vsel %vm583_vm2, %v2367_v43, %v2369_v31  ;;  %v4673_v61 = vpack.i.bf16 %v6804_v36, %v6886_v50  ;;  %v2297_v22 = vrot.slane %v6893_v13, 1  ;;  %v5130_v14 = vld [vmem:[#allocation2 + $0x120] sm:$0xff] }
 0x220   : > { %4412 = vmatmul.mubr.msk.f32.gmra.mrb[22].mxu0 %vm1733_vm12, %v1712_v26  ;;  %v4663_v62 = vpack.i.bf16 %v2285_v51, %v6870_v52  ;;  %v2286_v26 = vrot.slane %v6796_v28, 1  ;;  %v4668_v12 = vpack.i.bf16 %v2365_v46, %v6835_v18  ;;  %v2381_v29 = vrot.slane %v6895_v63, 2 }
 0x221   : > { %v6819_v2 = vpop.permute.xlu1 %836  ;;  %v6821_v32 = vpop.permute.xlu0 %834  ;;  %4534 = vmatpush1.bf16.msra.mxu0 %v4533_v11  ;;  %4624 = vmatpush1.bf16.msra.mxu1 %v4533_v11  ;;  %v1482_v60 = vsel %vm311_vm0, %v5130_v14, %v6758_v57  ;;  %v2289_v57 = vrot.slane %v6830_v54, 1  ;;  %v2377_v17 = vrot.slane %v6893_v13, 2 }
 0x222   : > { %4535 = vmatprep.subr.bf16.mxu0 %v5172_v21  ;;  %4609 = vmatprep.subr.bf16.mxu1 %v5172_v21  ;;  %v1515_v43 = vsel %vm1490_vm6, %v1482_v60, %v6821_v32  ;;  %v4683_v32 = vpack.i.bf16 %v6853_v9, %v6889_v37 }
 0x223   : > { %1328 = vrot.lane.b32.xlu1 %v684_v5, %s5170_s23  ;;  %1326 = vrot.lane.b32.xlu0 %v682_v7, %s5170_s23  ;;  %s5173_s23 = smov 64   ;;  %v6905_v5 = vsel %vm583_vm2, %v2371_v23, %v2372_v44  ;;  %v2296_v7 = vrot.slane %v6889_v37, 1 }
 0x225   : > { %v6846_v55 = vpop.permute.xlu1 %932  ;;  %v6848_v10 = vpop.permute.xlu0 %930  ;;  %4537 = vmatpush1.bf16.msra.mxu0 %v4536_v56  ;;  %4625 = vmatpush1.bf16.msra.mxu1 %v4536_v56  ;;  %v6936_v54 = vsel %vm502_vm3, %v2296_v7, %v2297_v22  ;;  %v6980_v7 = vld [vmem:[#allocation3 + $0x70] sm:$0x3] }
 0x227   : > { %1424 = vrot.lane.b32.xlu1 %v689_v59, %s5171_s6  ;;  %1422 = vrot.lane.b32.xlu0 %v687_v1, %s5171_s6  ;;  %v6922_v59 = vsel %vm502_vm3, %v2286_v26, %v2287_v53  ;;  %v1548_v1 = vsel %vm1523_vm7, %v1515_v43, %v6848_v10  ;;  %v5131_v10 = vld [vmem:[#allocation2 + $0x128] sm:$0xff] }
 0x228   : > { %v4678_v56 = vpack.i.bf16 %v6922_v59, %v6905_v5  ;;  %v1483_v9 = vsel %vm311_vm0, %v5131_v10, %v6791_v27  ;;  %v2376_v27 = vrot.slane %v6889_v37, 2 }
 0x229   : > { %v6864_v3 = vpop.permute.xlu1 %1028  ;;  %v1027_v8 = vpop.permute.xlu0 %1026  ;;  %v1516_v51 = vsel %vm1490_vm6, %v1483_v9, %v6819_v2 }
 0x22a   : > { %v1581_v31 = vsel %vm1556_vm8, %v1548_v1, %v1027_v8  ;;  %v6948_v8 = vld [vmem:[#allocation3 + $0x78] sm:$0xff]  ;;  %v4708_v1 = vpack.i.bf16 %v6870_v52, %v6893_v13 }
 0x22b   : > { %4654 = vrot.lane.b32.xlu1 %v4653_v35, %s5173_s23  ;;  %4649 = vrot.lane.b32.xlu0 %v4648_v38, %s5171_s6  ;;  %v6951_v35 = vsel %vm583_vm2, %v2372_v44, %v2374_v42  ;;  %v6953_v38 = vld [vmem:[#allocation3 + $0x80] sm:$0xff]  ;;  %v4688_v44 = vpack.i.bf16 %v6826_v4, %v6936_v54 }
 0x22d   : > { %v6878_v21 = vpop.permute.xlu1 %1124  ;;  %v1123_v19 = vpop.permute.xlu0 %1122 }
 0x22e   : > { %v1614_v24 = vsel %vm1589_vm9, %v1581_v31, %v1123_v19  ;;  %v1549_v19 = vsel %vm1523_vm7, %v1516_v51, %v6846_v55  ;;  %v2306_v55 = vrot.slane %v6948_v8, 1 }
 0x22f   : > { %4664 = vrot.lane.b32.xlu1 %v4663_v62, %s5171_s6  ;;  %4659 = vrot.lane.b32.xlu0 %v4658_v25, %s5174_s9  ;;  %v1582_v46 = vsel %vm1556_vm8, %v1549_v19, %v6864_v3  ;;  %v6985_v3 = vsel %vm583_vm2, %v2376_v27, %v2377_v17  ;;  %v2386_v27 = vrot.slane %v6948_v8, 2 }
 0x231   : > { %v1221_v6 = vpop.permute.xlu1 %1220  ;;  %v1219_v15 = vpop.permute.xlu0 %1218 }
 0x232   : > { %v1647_v30 = vsel %vm1622_vm10, %v1614_v24, %v1219_v15  ;;  %v2307_v15 = vrot.slane %v6953_v38, 1 }
 0x233   : > { %v4395_v11 = vpop.f32.mrb[10].mxu0  ;;  %4674 = vrot.lane.b32.xlu1 %v4673_v61, %s5174_s9  ;;  %4669 = vrot.lane.b32.xlu0 %v4668_v12, %s5173_s23  ;;  %v1615_v61 = vsel %vm1589_vm9, %v1582_v46, %v6878_v21  ;;  %v2190_v12 = vld [vmem:[#allocation3 + $0x58] sm:$0x3] }
 0x234   : > { %v1956_v20 = vadd.f32 %v4395_v11, %v6355_v33  ;;  %v1950_v48 = vpop.f32.mrb[11].mxu0  ;;  %v1648_v4 = vsel %vm1622_vm10, %v1615_v61, %v1221_v6  ;;  %v4703_v11 = vpack.i.bf16 %v6985_v3, %v6948_v8  ;;  %v7001_v43 = vsel %vm502_vm3, %v2306_v55, %v2307_v15 }
 0x235   : > { %v1951_v0 = vadd.f32 %v6355_v33, %v1950_v48  ;;  %v1317_v39 = vpop.permute.xlu1 %1316  ;;  %v1315_v49 = vpop.permute.xlu0 %1314  ;;  %v6941_v33 = vsel %vm583_vm2, %v2381_v29, %v2382_v58  ;;  %v6990_v29 = vsel %vm502_vm3, %v2287_v53, %v2289_v57  ;;  %v2299_v36 = vrot.slane %v2190_v12, 1 }
 0x236   : > { %v2070_v47 = vmax.f32 %v1956_v20, 0.0  ;;  %v1680_v62 = vsel %vm1655_vm11, %v1647_v30, %v1315_v49  ;;  %v4693_v2 = vpack.i.bf16 %v6936_v54, %v6941_v33  ;;  %v1681_v21 = vsel %vm1655_vm11, %v1648_v4, %v1317_v39  ;;  %v7025_v49 = vld [vmem:[#allocation3 + $0x88] sm:$0x3] }
 0x237   : > { %v2069_v41 = vmax.f32 %v1951_v0, 0.0  ;;  %4684 = vrot.lane.b32.xlu1 %v4683_v32, %s5173_s23  ;;  %4679 = vrot.lane.b32.xlu0 %v4678_v56, %s5171_s6  ;;  %v4698_v6 = vpack.i.bf16 %v6990_v29, %v6951_v35  ;;  %v2384_v53 = vrot.slane %v6980_v7, 2  ;;  %v4713_v57 = vpack.i.bf16 %v6895_v63, %v7001_v43 }
 0x238   : > { %2158 = vst.msk [vmem:[#allocation3 + $0x99] sm:$0xff] %vm1688_vm4, %v2070_v47  ;;  %v7016_v0 = vsel %vm502_vm3, %v2297_v22, %v2299_v36  ;;  %v2379_v32 = vrot.slane %v2190_v12, 2  ;;  %v2309_v47 = vrot.slane %v7025_v49, 1  ;;  %v2302_v30 = vrot.slane %v6897_v34, 1  ;;  %v7090_v36 = vld [vmem:[%s8171_s2] ss:$0 sm:$0xff] }
 0x239   : > { %2157 = vst.msk [vmem:[#allocation3 + $0x91] sm:$0xff] %vm1688_vm4, %v2069_v41  ;;  %v6965_v25 = vpop.permute.xlu1 %742  ;;  %v1411_v23 = vpop.permute.xlu0 %1410  ;;  %v7021_v39 = vsel %vm583_vm2, %v2382_v58, %v2384_v53  ;;  %v4718_v22 = vpack.i.bf16 %v6835_v18, %v7016_v0  ;;  %v4728_v41 = vpack.i.bf16 %v6873_v45, %v6985_v3  ;;  %v2301_v18 = vrot.slane %v6895_v63, 1 }
 0x23a   : > { %v1713_v26 = vsel %vm1688_vm4, %v1680_v62, %v1411_v23  ;;  %v4723_v31 = vpack.i.bf16 %v7016_v0, %v7021_v39  ;;  %v7037_v58 = vsel %vm583_vm2, %v2377_v17, %v2379_v32  ;;  %v7047_v51 = vsel %vm502_vm3, %v2307_v15, %v2309_v47  ;;  %v3301_v32 = vld [vmem:[%s8172_s3 + $0x100] sm:$0xff] }
 0x23b   : > { %4694 = vrot.lane.b32.xlu1 %v4693_v2, %s5171_s6  ;;  %4689 = vrot.lane.b32.xlu0 %v4688_v44, %s5174_s9  ;;  %v4733_v24 = vpack.i.bf16 %v7037_v58, %v6953_v38  ;;  %v2387_v17 = vrot.slane %v6953_v38, 2  ;;  %v4743_v23 = vpack.i.bf16 %v6897_v34, %v7047_v51  ;;  %v4738_v2 = vpack.i.bf16 %v6905_v5, %v6895_v63 }
 0x23c   : > { %4414 = vmatprep.mubr.msk.f32.mxu0 %vm1733_vm12, %v1713_v26  ;;  %v7063_v44 = vsel %vm502_vm3, %v2301_v18, %v2302_v30 }
 0x23d   : > { %v6993_v14 = vpop.permute.xlu1 %744  ;;  %v1413_v60 = vpop.permute.xlu0 %1412  ;;  %v7068_v46 = vsel %vm583_vm2, %v2386_v27, %v2387_v17  ;;  %v4748_v12 = vpack.i.bf16 %v6889_v37, %v7063_v44 }
 0x23e   : > { %v1714_v42 = vsel %vm1688_vm4, %v1681_v21, %v1413_v60  ;;  %v4753_v61 = vpack.i.bf16 %v7063_v44, %v7068_v46  ;;  %v5132_v60 = vld [vmem:[#allocation2 + $0x138] sm:$0xff] }
 0x23f   : > { %4704 = vrot.lane.b32.xlu1 %v4703_v11, %s5173_s23  ;;  %4699 = vrot.lane.b32.xlu0 %v4698_v6, %s5171_s6  ;;  %v1484_v11 = vsel %vm311_vm0, %v5132_v60, %v6965_v25  ;;  %v2304_v25 = vrot.slane %v6980_v7, 1 }
 0x240   : > { %4415 = vmatmul.mubr.msk.f32.gmra.mrb[24].mxu0 %vm1733_vm12, %v1714_v42  ;;  %v7072_v26 = vld [vmem:[#allocation3 + $0x90] sm:$0xff]  ;;  %v7074_v55 = vld [vmem:[#allocation3 + $0x98] sm:$0xff] }
 0x241   : > { %v7007_v20 = vpop.permute.xlu1 %840  ;;  %v839_v48 = vpop.permute.xlu0 %838  ;;  %v2311_v4 = vrot.slane %v7072_v26, 1  ;;  %v2312_v21 = vrot.slane %v7074_v55, 1 }
 0x242   : > { %v1517_v42 = vsel %vm1490_vm6, %v1484_v11, %v839_v48  ;;  %v3302_v48 = vld [vmem:[%s8172_s3 + $0x108] sm:$0xff]  ;;  %v2199_v11 = vld [vmem:[#allocation3 + $0xa0] sm:$0x3] }
 0x243   : > { %4714 = vrot.lane.b32.xlu1 %v4713_v57, %s5174_s9  ;;  %4709 = vrot.lane.b32.xlu0 %v4708_v1, %s5173_s23  ;;  %v4758_v1 = vpack.i.bf16 %v6886_v50, %v7037_v58  ;;  %v7106_v18 = vpack.c.bf16 %v3302_v48, %v3301_v32 }
 0x245   : > { %v7027_v56 = vpop.permute.xlu1 %936  ;;  %v935_v52 = vpop.permute.xlu0 %934  ;;  %4539 = vmatprep.subr.bf16.mxu0 %v7106_v18 }
 0x247   : > { %4724 = vrot.lane.b32.xlu1 %v4723_v31, %s5171_s6  ;;  %4719 = vrot.lane.b32.xlu0 %v4718_v22, %s5174_s9  ;;  %v1550_v31 = vsel %vm1523_vm7, %v1517_v42, %v935_v52 }
 0x249   : > { %v7039_v10 = vpop.permute.xlu1 %1032  ;;  %v1031_v9 = vpop.permute.xlu0 %1030 }
 0x24a   : > { %v1583_v7 = vsel %vm1556_vm8, %v1550_v31, %v1031_v9  ;;  %v2392_v31 = vrot.slane %v7074_v55, 2 }
 0x24b   : > { %4734 = vrot.lane.b32.xlu1 %v4733_v24, %s5173_s23  ;;  %4729 = vrot.lane.b32.xlu0 %v4728_v41, %s5171_s6  ;;  %v4763_v41 = vpack.i.bf16 %v6941_v33, %v7072_v26 }
 0x24d   : > { %v7054_v19 = vpop.permute.xlu1 %1128  ;;  %v1127_v62 = vpop.permute.xlu0 %1126 }
 0x24f   : > { %4744 = vrot.lane.b32.xlu1 %v4743_v23, %s5174_s9  ;;  %4739 = vrot.lane.b32.xlu0 %v4738_v2, %s5173_s23  ;;  %v7110_v23 = vsel %vm502_vm3, %v2311_v4, %v2312_v21  ;;  %v2389_v2 = vrot.slane %v7025_v49, 2  ;;  %v4768_v49 = vpack.i.bf16 %v6951_v35, %v6897_v34 }
 0x251   : > { %v1225_v15 = vpop.permute.xlu1 %1224  ;;  %v1223_v63 = vpop.permute.xlu0 %1222 }
 0x253   : > { %v4398_v6 = vpop.f32.mrb[12].mxu0  ;;  %4754 = vrot.lane.b32.xlu1 %v4753_v61, %s5171_s6  ;;  %4749 = vrot.lane.b32.xlu0 %v4748_v12, %s5174_s9  ;;  %v5134_v61 = vld [vmem:[#allocation2 + $0x140] sm:$0xff]  ;;  %v1616_v12 = vsel %vm1589_vm9, %v1583_v7, %v1127_v62  ;;  %v4788_v7 = vpack.i.bf16 %v7021_v39, %v7074_v55 }
 0x254   : > { %v1966_v53 = vadd.f32 %v7090_v36, %v4398_v6  ;;  %v1960_v57 = vpop.f32.mrb[13].mxu0  ;;  %v1485_v52 = vsel %vm311_vm0, %v5134_v61, %v6993_v14  ;;  %v1649_v4 = vsel %vm1622_vm10, %v1616_v12, %v1223_v63  ;;  %v7136_v63 = vsel %vm502_vm3, %v2302_v30, %v2304_v25 }
 0x255   : > { %v1961_v22 = vadd.f32 %v7090_v36, %v1960_v57  ;;  %v1321_v47 = vpop.permute.xlu1 %1320  ;;  %v1319_v24 = vpop.permute.xlu0 %1318  ;;  %v1518_v9 = vsel %vm1490_vm6, %v1485_v52, %v7007_v20  ;;  %v4773_v20 = vpack.i.bf16 %v6948_v8, %v7110_v23  ;;  %v7144_v57 = vsel %vm583_vm2, %v2387_v17, %v2389_v2 }
 0x256   : > { %v2072_v27 = vmax.f32 %v1966_v53, 0.0  ;;  %v1551_v14 = vsel %vm1523_vm7, %v1518_v9, %v7027_v56  ;;  %v1682_v62 = vsel %vm1655_vm11, %v1649_v4, %v1319_v24  ;;  %v4783_v17 = vpack.i.bf16 %v7136_v63, %v7144_v57 }
 0x257   : > { %v2071_v60 = vmax.f32 %v1961_v22, 0.0  ;;  %4764 = vrot.lane.b32.xlu1 %v4763_v41, %s5173_s23  ;;  %4759 = vrot.lane.b32.xlu0 %v4758_v1, %s5171_s6  ;;  %v1584_v53 = vsel %vm1556_vm8, %v1551_v14, %v7039_v10  ;;  %v2314_v1 = vrot.slane %v2199_v11, 1  ;;  %v4778_v25 = vpack.i.bf16 %v6893_v13, %v7136_v63 }
 0x258   : > { %2160 = vst.msk [vmem:[#allocation3 + $0xb1] sm:$0xff] %vm1688_vm4, %v2072_v27  ;;  %v1617_v32 = vsel %vm1589_vm9, %v1584_v53, %v7054_v19  ;;  %v2394_v2 = vrot.slane %v2199_v11, 2 }
 0x259   : > { %2159 = vst.msk [vmem:[#allocation3 + $0xa9] sm:$0xff] %vm1688_vm4, %v2071_v60  ;;  %v7129_v6 = vpop.permute.xlu1 %746  ;;  %v1415_v42 = vpop.permute.xlu0 %1414  ;;  %v1650_v34 = vsel %vm1622_vm10, %v1617_v32, %v1225_v15  ;;  %v7161_v48 = vsel %vm502_vm3, %v2312_v21, %v2314_v1  ;;  %v2391_v15 = vrot.slane %v7072_v26, 2 }
 0x25a   : > { %v1715_v56 = vsel %vm1688_vm4, %v1682_v62, %v1415_v42  ;;  %v1683_v8 = vsel %vm1655_vm11, %v1650_v34, %v1321_v47  ;;  %v4793_v21 = vpack.i.bf16 %v6953_v38, %v7161_v48  ;;  %v7190_v11 = vsel %vm583_vm2, %v2392_v31, %v2394_v2 }
 0x25b   : > { %4774 = vrot.lane.b32.xlu1 %v4773_v20, %s5174_s9  ;;  %4769 = vrot.lane.b32.xlu0 %v4768_v49, %s5173_s23  ;;  %v7177_v27 = vsel %vm583_vm2, %v2391_v15, %v2392_v31  ;;  %v4813_v20 = vpack.i.bf16 %v7047_v51, %v7190_v11  ;;  %v5135_v31 = vld [vmem:[#allocation2 + $0x150] sm:$0xff] }
 0x25c   : > { %4417 = vmatprep.mubr.msk.f32.mxu0 %vm1733_vm12, %v1715_v56  ;;  %v4798_v4 = vpack.i.bf16 %v7001_v43, %v7177_v27 }
 0x25d   : > { %v7153_v10 = vpop.permute.xlu1 %748  ;;  %v1417_v30 = vpop.permute.xlu0 %1416 }
 0x25e   : > { %v1716_v19 = vsel %vm1688_vm4, %v1683_v8, %v1417_v30 }
 0x25f   : > { %4784 = vrot.lane.b32.xlu1 %v4783_v17, %s5171_s6  ;;  %4779 = vrot.lane.b32.xlu0 %v4778_v25, %s5174_s9  ;;  %v7183_v12 = vld [vmem:[#allocation3 + $0xb8] sm:$0x3] }
 0x260   : > { %4418 = vmatmul.mubr.msk.f32.gmra.mrb[26].mxu0 %vm1733_vm12, %v1716_v19  ;;  %v7168_v22 = vld [vmem:[#allocation3 + $0xa8] sm:$0xff]  ;;  %v7170_v47 = vld [vmem:[#allocation3 + $0xb0] sm:$0xff]  ;;  %v2319_v14 = vrot.slane %v7183_v12, 1 }
 0x261   : > { %v845_v24 = vpop.permute.xlu1 %844  ;;  %v843_v41 = vpop.permute.xlu0 %842  ;;  %v2316_v61 = vrot.slane %v7168_v22, 1  ;;  %v2317_v52 = vrot.slane %v7170_v47, 1  ;;  %v4803_v38 = vpack.i.bf16 %v7068_v46, %v7168_v22  ;;  %v2396_v1 = vrot.slane %v7168_v22, 2 }
 0x262   : > { %v2397_v32 = vrot.slane %v7170_v47, 2  ;;  %v4818_v17 = vpack.i.bf16 %v7144_v57, %v7170_v47 }
 0x263   : > { %4794 = vrot.lane.b32.xlu1 %v4793_v21, %s5174_s9  ;;  %4789 = vrot.lane.b32.xlu0 %v4788_v7, %s5173_s23  ;;  %v7193_v49 = vsel %vm502_vm3, %v2316_v61, %v2317_v52  ;;  %v7203_v56 = vsel %vm502_vm3, %v2317_v52, %v2319_v14  ;;  %v1486_v21 = vsel %vm311_vm0, %v5135_v31, %v7129_v6 }
 0x264   : > { %8180 = vst [vmem:[#allocation5_spill] sm:$0xff] %v7193_v49  ;;  %v4808_v53 = vpack.i.bf16 %v7072_v26, %v7193_v49  ;;  %v4823_v30 = vpack.i.bf16 %v7074_v55, %v7203_v56  ;;  %v7214_v26 = vsel %vm583_vm2, %v2396_v1, %v2397_v32  ;;  %v1519_v7 = vsel %vm1490_vm6, %v1486_v21, %v843_v41  ;;  %v5136_v1 = vld [vmem:[#allocation2 + $0x158] sm:$0xff] }
 0x265   : > { %v941_v60 = vpop.permute.xlu1 %940  ;;  %v939_v9 = vpop.permute.xlu0 %938  ;;  %v4828_v15 = vpack.i.bf16 %v7110_v23, %v7214_v26  ;;  %v1487_v6 = vsel %vm311_vm0, %v5136_v1, %v7153_v10 }
 0x266   : > { %v1552_v52 = vsel %vm1523_vm7, %v1519_v7, %v939_v9  ;;  %v1520_v41 = vsel %vm1490_vm6, %v1487_v6, %v845_v24 }
 0x267   : > { %4804 = vrot.lane.b32.xlu1 %v4803_v38, %s5173_s23  ;;  %4799 = vrot.lane.b32.xlu0 %v4798_v4, %s5171_s6  ;;  %v1553_v9 = vsel %vm1523_vm7, %v1520_v41, %v941_v60 }
 0x269   : > { %v1037_v62 = vpop.permute.xlu1 %1036  ;;  %v1035_v42 = vpop.permute.xlu0 %1034 }
 0x26b   : > { %4814 = vrot.lane.b32.xlu1 %v4813_v20, %s5171_s6  ;;  %4809 = vrot.lane.b32.xlu0 %v4808_v53, %s5174_s9  ;;  %v1585_v20 = vsel %vm1556_vm8, %v1552_v52, %v1035_v42 }
 0x26d   : > { %v1133_v34 = vpop.permute.xlu1 %1132  ;;  %v1131_v8 = vpop.permute.xlu0 %1130 }
 0x26f   : > { %4824 = vrot.lane.b32.xlu1 %v4823_v30, %s5174_s9  ;;  %4819 = vrot.lane.b32.xlu0 %v4818_v17, %s5173_s23  ;;  %v1618_v30 = vsel %vm1589_vm9, %v1585_v20, %v1131_v8 }
 0x271   : > { %v1229_v25 = vpop.permute.xlu1 %1228  ;;  %v1227_v19 = vpop.permute.xlu0 %1226 }
 0x273   : > { %v4401_v55 = vpop.f32.mrb[14].mxu0  ;;  %4829 = vrot.lane.b32.xlu0 %v4828_v15, %s5171_s6  ;;  %v1651_v15 = vsel %vm1622_vm10, %v1618_v30, %v1227_v19 }
 0x274   : > { %v1976_v2 = vadd.f32 %v7090_v36, %v4401_v55  ;;  %v1970_v61 = vpop.f32.mrb[15].mxu0  ;;  %v1586_v55 = vsel %vm1556_vm8, %v1553_v9, %v1037_v62 }
 0x275   : > { %v1971_v38 = vadd.f32 %v7090_v36, %v1970_v61  ;;  %v1325_v4 = vpop.permute.xlu1 %1324  ;;  %v1323_v14 = vpop.permute.xlu0 %1322  ;;  %v1619_v8 = vsel %vm1589_vm9, %v1586_v55, %v1133_v34  ;;  %v2399_v61 = vrot.slane %v7183_v12, 2 }
 0x276   : > { %v2074_v53 = vmax.f32 %v1976_v2, 0.0  ;;  %v1684_v42 = vsel %vm1655_vm11, %v1651_v15, %v1323_v14  ;;  %v1652_v24 = vsel %vm1622_vm10, %v1619_v8, %v1229_v25 }
 0x277   : > { %v2073_v17 = vmax.f32 %v1971_v38, 0.0  ;;  %v1685_v19 = vsel %vm1655_vm11, %v1652_v24, %v1325_v4 }
 0x278   : > { %2162 = vst.msk [vmem:[#allocation3 + $0xc9] sm:$0xff] %vm1688_vm4, %v2074_v53  ;;  %v7257_v53 = vsel %vm583_vm2, %v2397_v32, %v2399_v61  ;;  %v5137_v61 = vld [vmem:[#allocation2 + $0x168] sm:$0xff] }
 0x279   : > { %2161 = vst.msk [vmem:[#allocation3 + $0xc1] sm:$0xff] %vm1688_vm4, %v2073_v17  ;;  %v751_v31 = vpop.permute.xlu1 %750  ;;  %v1419_v21 = vpop.permute.xlu0 %1418  ;;  %v4843_v41 = vpack.i.bf16 %v7161_v48, %v7257_v53 }
 0x27a   : > { %v1717_v10 = vsel %vm1688_vm4, %v1684_v42, %v1419_v21 }
 0x27b   : > { %4420 = vmatprep.mubr.msk.f32.mxu0 %vm1733_vm12, %v1717_v10 }
 0x27d   : > { %v753_v7 = vpop.permute.xlu1 %752  ;;  %v1421_v60 = vpop.permute.xlu0 %1420 }
 0x27e   : > { %v1718_v2 = vsel %vm1688_vm4, %v1685_v19, %v1421_v60 }
 0x27f   : > { %4421 = vmatmul.mubr.msk.f32.gmra.mrb[28].mxu0 %vm1733_vm12, %v1718_v2  ;;  %v7246_v52 = vld [vmem:[#allocation3 + $0xd0] sm:$0x3] }
 0x280   : > { %v7248_v62 = vld [vmem:[#allocation3 + $0xc0] sm:$0xff]  ;;  %v7250_v38 = vld [vmem:[#allocation3 + $0xc8] sm:$0xff]  ;;  %v2324_v12 = vrot.slane %v7246_v52, 1 }
 0x281   : > { %v849_v34 = vpop.permute.xlu1 %848  ;;  %v847_v14 = vpop.permute.xlu0 %846  ;;  %v4833_v25 = vpack.i.bf16 %v7177_v27, %v7248_v62  ;;  %v2321_v4 = vrot.slane %v7248_v62, 1  ;;  %v2322_v20 = vrot.slane %v7250_v38, 1  ;;  %v2401_v15 = vrot.slane %v7248_v62, 2 }
 0x282   : > { %v8177_v32 = vrot.slane %v7250_v38, 2  ;;  %v4848_v42 = vpack.i.bf16 %v7190_v11, %v7250_v38 }
 0x283   : > { %4834 = vrot.lane.b32.xlu1 %v4833_v25, %s5173_s23  ;;  %v7262_v1 = vsel %vm502_vm3, %v2321_v4, %v2322_v20  ;;  %v7272_v9 = vsel %vm502_vm3, %v2322_v20, %v2324_v12  ;;  %v5138_v25 = vld [vmem:[#allocation2 + $0x170] sm:$0xff] }
 0x284   : > { %v4838_v6 = vpack.i.bf16 %v7168_v22, %v7262_v1  ;;  %v4853_v55 = vpack.i.bf16 %v7170_v47, %v7272_v9  ;;  %v7282_v10 = vsel %vm583_vm2, %v2401_v15, %v8177_v32  ;;  %v1488_v47 = vsel %vm311_vm0, %v5137_v61, %v751_v31 }
 0x285   : > { %v945_v30 = vpop.permute.xlu1 %944  ;;  %v943_v17 = vpop.permute.xlu0 %942  ;;  %v4858_v8 = vpack.i.bf16 %v7193_v49, %v7282_v10  ;;  %v1489_v4 = vsel %vm311_vm0, %v5138_v25, %v753_v7  ;;  %vm8082_vm0 = vmpackc.low %vm1688_vm4, %vm1688_vm4 }
 0x286   : > { %4839 = vrot.lane.b32.xlu0 %v4838_v6, %s5174_s9  ;;  %v1522_v12 = vsel %vm1490_vm6, %v1489_v4, %v849_v34  ;;  %v1521_v6 = vsel %vm1490_vm6, %v1488_v47, %v847_v14 }
 0x287   : > { %4844 = vrot.lane.b32.xlu1 %v4843_v41, %s5171_s6 }
 0x289   : > { %v1041_v22 = vpop.permute.xlu1 %1040  ;;  %v1039_v21 = vpop.permute.xlu0 %1038 }
 0x28a   : > { %4849 = vrot.lane.b32.xlu0 %v4848_v42, %s5173_s23  ;;  %v1555_v42 = vsel %vm1523_vm7, %v1522_v12, %v945_v30 }
 0x28b   : > { %4854 = vrot.lane.b32.xlu1 %v4853_v55, %s5174_s9  ;;  %v1554_v55 = vsel %vm1523_vm7, %v1521_v6, %v943_v17  ;;  %v1588_v31 = vsel %vm1556_vm8, %v1555_v42, %v1041_v22 }
 0x28c   : > { %v1587_v7 = vsel %vm1556_vm8, %v1554_v55, %v1039_v21 }
 0x28d   : > { %v1137_v24 = vpop.permute.xlu1 %1136  ;;  %v1135_v19 = vpop.permute.xlu0 %1134 }
 0x28e   : > { %4859 = vrot.lane.b32.xlu0 %v4858_v8, %s5171_s6  ;;  %v1621_v34 = vsel %vm1589_vm9, %v1588_v31, %v1137_v24  ;;  %v1620_v14 = vsel %vm1589_vm9, %v1587_v7, %v1135_v19 }
 0x291   : > { %v1233_v60 = vpop.permute.xlu1 %1232  ;;  %v1231_v2 = vpop.permute.xlu0 %1230 }
 0x292   : > { %v1654_v25 = vsel %vm1622_vm10, %v1621_v34, %v1233_v60  ;;  %v1653_v30 = vsel %vm1622_vm10, %v1620_v14, %v1231_v2 }
 0x293   : > { %v4404_v20 = vpop.f32.mrb[16].mxu0 }
 0x294   : > { %v1986_v41 = vadd.f32 %v7090_v36, %v4404_v20  ;;  %v1980_v15 = vpop.f32.mrb[17].mxu0 }
 0x295   : > { %v1981_v8 = vadd.f32 %v7090_v36, %v1980_v15  ;;  %v1329_v32 = vpop.permute.xlu1 %1328  ;;  %v1327_v49 = vpop.permute.xlu0 %1326 }
 0x296   : > { %v2076_v61 = vmax.f32 %v1986_v41, 0.0  ;;  %v1687_v17 = vsel %vm1655_vm11, %v1654_v25, %v1329_v32  ;;  %v1686_v22 = vsel %vm1655_vm11, %v1653_v30, %v1327_v49  ;;  %v2404_v41 = vrot.slane %v7246_v52, 2 }
 0x297   : > { %v2075_v47 = vmax.f32 %v1981_v8, 0.0 }
 0x298   : > { %2164 = vst.msk [vmem:[#allocation3 + $0xe1] sm:$0xff] %vm1688_vm4, %v2076_v61 }
 0x299   : > { %2163 = vst.msk [vmem:[#allocation3 + $0xd9] sm:$0xff] %vm1688_vm4, %v2075_v47  ;;  %v1425_v4 = vpop.permute.xlu1 %1424  ;;  %v1423_v21 = vpop.permute.xlu0 %1422  ;;  %v3304_v47 = vld [vmem:[%s8172_s3 + $0x118] sm:$0xff] }
 0x29a   : > { %v1720_v20 = vsel %vm1688_vm4, %v1687_v17, %v1425_v4  ;;  %v1719_v24 = vsel %vm1688_vm4, %v1686_v22, %v1423_v21  ;;  %v8181_v17 = vrot.slane %v7250_v38, 2 }
 0x29b   : > { %4423 = vmatprep.mubr.msk.f32.mxu0 %vm1733_vm12, %v1719_v24 }
 0x29c   : > { %4424 = vmatmul.mubr.msk.f32.gmra.mrb[30].mxu0 %vm1733_vm12, %v1720_v20  ;;  %v7337_v22 = vsel %vm583_vm2, %v8181_v17, %v2404_v41 }
 0x29d   : > { %v4655_v19 = vpop.permute.xlu1 %4654  ;;  %v4650_v60 = vpop.permute.xlu0 %4649 }
 0x29e   : > { %v4656_v2 = vunpack.i.l.bf16 %v4655_v19  ;;  %v4652_v12 = vunpack.i.h.bf16 %v4650_v60  ;;  %v4651_v6 = vunpack.i.l.bf16 %v4650_v60  ;;  %v4657_v32 = vunpack.i.h.bf16 %v4655_v19 }
 0x29f   : > { %v7312_v49 = vld [vmem:[#allocation3 + $0xe8] sm:$0x3] }
 0x2a0   : > { %v3075_v15 = vsel %vm1688_vm4, %v6787_v40, %v4652_v12  ;;  %v7316_v42 = vld [vmem:[#allocation3 + $0xd8] sm:$0xff]  ;;  %v7318_v55 = vld [vmem:[#allocation3 + $0xe0] sm:$0xff]  ;;  %v3173_v8 = vsel %vm1688_vm4, %v6922_v59, %v4651_v6  ;;  %v2329_v14 = vrot.slane %v7312_v49, 1 }
 0x2a1   : > { %v4665_v31 = vpop.permute.xlu1 %4664  ;;  %v4660_v7 = vpop.permute.xlu0 %4659  ;;  %v4863_v52 = vpack.i.bf16 %v7214_v26, %v7316_v42  ;;  %v2326_v61 = vrot.slane %v7316_v42, 1  ;;  %v2327_v34 = vrot.slane %v7318_v55, 1  ;;  %v3303_v40 = vld [vmem:[%s8172_s3 + $0x110] sm:$0xff]  ;;  %v3205_v30 = vsel %vm3107_vm14, %v3173_v8, %v4656_v2 }
 0x2a2   : > { %v4662_v59 = vunpack.i.h.bf16 %v4660_v7  ;;  %v4661_v25 = vunpack.i.l.bf16 %v4660_v7  ;;  %v4667_v4 = vunpack.i.h.bf16 %v4665_v31  ;;  %v4666_v21 = vunpack.i.l.bf16 %v4665_v31 }
 0x2a3   : > { %4864 = vrot.lane.b32.xlu1 %v4863_v52, %s5173_s23  ;;  %v7341_v20 = vsel %vm502_vm3, %v2326_v61, %v2327_v34  ;;  %v3108_v24 = vsel %vm3107_vm14, %v3075_v15, %v4657_v32  ;;  %v4542_v12 = vpack.c.bf16 %v3304_v47, %v3303_v40  ;;  %v4873_v8 = vpack.i.bf16 %v7203_v56, %v7337_v22 }
 0x2a4   : > { %v4868_v19 = vpack.i.bf16 %v7248_v62, %v7341_v20  ;;  %v3237_v60 = vsel %vm3140_vm15, %v3205_v30, %v4661_v25  ;;  %v3141_v2 = vsel %vm3140_vm15, %v3108_v24, %v4662_v59  ;;  %v7351_v31 = vsel %vm502_vm3, %v2327_v34, %v2329_v14 }
 0x2a5   : > { %v4675_v6 = vpop.permute.xlu1 %4674  ;;  %v4670_v41 = vpop.permute.xlu0 %4669  ;;  %3440 = vmatprep.mubr.f32.mxu0 %v3237_v60  ;;  %v2406_v7 = vrot.slane %v7316_v42, 2  ;;  %v2407_v32 = vrot.slane %v7318_v55, 2  ;;  %v3174_v40 = vsel %vm1688_vm4, %v6990_v29, %v4666_v21  ;;  %v3076_v34 = vsel %vm1688_vm4, %v6794_v16, %v4667_v4 }
 0x2a6   : > { %v4677_v15 = vunpack.i.h.bf16 %v4675_v6  ;;  %v4676_v62 = vunpack.i.l.bf16 %v4675_v6  ;;  %4869 = vrot.lane.b32.xlu0 %v4868_v19, %s5174_s9  ;;  %v4672_v52 = vunpack.i.h.bf16 %v4670_v41  ;;  %v4671_v61 = vunpack.i.l.bf16 %v4670_v41  ;;  %3441 = vmatmul.mubr.f32.vlgmr.msra.gmra.mrb[32].mxu0 %v3141_v2 }
 0x2a7   : > { %4874 = vrot.lane.b32.xlu1 %v4873_v8, %s5171_s6  ;;  %4541 = vmatpush3.bf16.msra.mxu0 %v7106_v18  ;;  %v4878_v14 = vpack.i.bf16 %v7257_v53, %v7318_v55  ;;  %v4883_v17 = vpack.i.bf16 %v7250_v38, %v7351_v31  ;;  %v7373_v16 = vsel %vm583_vm2, %v2406_v7, %v2407_v32 }
 0x2a8   : > { %v3206_v47 = vsel %vm3107_vm14, %v3174_v40, %v4671_v61  ;;  %v3109_v59 = vsel %vm3107_vm14, %v3076_v34, %v4672_v52  ;;  %4543 = vmatprep.subr.bf16.mxu0 %v4542_v12  ;;  %v4888_v38 = vpack.i.bf16 %v7262_v1, %v7373_v16 }
 0x2a9   : > { %v4685_v25 = vpop.permute.xlu1 %4684  ;;  %v4680_v30 = vpop.permute.xlu0 %4679  ;;  %v3238_v29 = vsel %vm3140_vm15, %v3206_v47, %v4676_v62  ;;  %v3142_v21 = vsel %vm3140_vm15, %v3109_v59, %v4677_v15 }
 0x2aa   : > { %4879 = vrot.lane.b32.xlu0 %v4878_v14, %s5173_s23  ;;  %v4682_v18 = vunpack.i.h.bf16 %v4680_v30  ;;  %v4681_v4 = vunpack.i.l.bf16 %v4680_v30  ;;  %3445 = vmatprep.mubr.f32.mxu0 %v3238_v29  ;;  %v4687_v24 = vunpack.i.h.bf16 %v4685_v25  ;;  %v4686_v19 = vunpack.i.l.bf16 %v4685_v25 }
 0x2ab   : > { %4884 = vrot.lane.b32.xlu1 %v4883_v17, %s5174_s9  ;;  %3446 = vmatmul.mubr.f32.gmra.mrb[34].mxu0 %v3142_v21 }
 0x2ac   : > { %v3175_v60 = vsel %vm1688_vm4, %v6873_v45, %v4681_v4  ;;  %v3077_v2 = vsel %vm1688_vm4, %v6796_v28, %v4682_v18  ;;  %4545 = vmatpush3.bf16.msra.mxu0 %v4542_v12 }
 0x2ad   : > { %v4695_v6 = vpop.permute.xlu1 %4694  ;;  %v4690_v41 = vpop.permute.xlu0 %4689  ;;  %v3207_v15 = vsel %vm3107_vm14, %v3175_v60, %v4686_v19  ;;  %v3110_v62 = vsel %vm3107_vm14, %v3077_v2, %v4687_v24 }
 0x2ae   : > { %4889 = vrot.lane.b32.xlu0 %v4888_v38, %s5171_s6  ;;  %v4692_v8 = vunpack.i.h.bf16 %v4690_v41  ;;  %v4691_v7 = vunpack.i.l.bf16 %v4690_v41  ;;  %v4696_v52 = vunpack.i.l.bf16 %v4695_v6  ;;  %v4697_v45 = vunpack.i.h.bf16 %v4695_v6 }
 0x2b0   : > { %v3239_v61 = vsel %vm3140_vm15, %v3207_v15, %v4691_v7  ;;  %v3143_v40 = vsel %vm3140_vm15, %v3110_v62, %v4692_v8  ;;  %v3179_v30 = vsel %vm1688_vm4, %v7063_v44, %v4696_v52  ;;  %v3081_v24 = vsel %vm1688_vm4, %v6889_v37, %v4697_v45  ;;  %v5139_v45 = vld [vmem:[#allocation3 + $0x20] sm:$0xff] }
 0x2b1   : > { %v4705_v34 = vpop.permute.xlu1 %4704  ;;  %v4700_v14 = vpop.permute.xlu0 %4699  ;;  %3450 = vmatprep.mubr.f32.mxu0 %v3239_v61 }
 0x2b2   : > { %v4706_v28 = vunpack.i.l.bf16 %v4705_v34  ;;  %3451 = vmatmul.mubr.f32.gmra.mrb[36].mxu0 %v3143_v40  ;;  %v4707_v12 = vunpack.i.h.bf16 %v4705_v34  ;;  %v4702_v17 = vunpack.i.h.bf16 %v4700_v14  ;;  %v4701_v29 = vunpack.i.l.bf16 %v4700_v14 }
 0x2b3   : > { %v4407_v47 = vpop.f32.mrb[18].mxu0 }
 0x2b4   : > { %v1996_v59 = vadd.f32 %v7090_v36, %v4407_v47  ;;  %v1990_v25 = vpop.f32.mrb[19].mxu0  ;;  %v3211_v2 = vsel %vm3107_vm14, %v3179_v30, %v4706_v28  ;;  %v3114_v7 = vsel %vm3107_vm14, %v3081_v24, %v4707_v12  ;;  %v3176_v40 = vsel %vm1688_vm4, %v6886_v50, %v4701_v29 }
 0x2b5   : > { %v1991_v21 = vadd.f32 %v7090_v36, %v1990_v25  ;;  %v4715_v18 = vpop.permute.xlu1 %4714  ;;  %v4710_v4 = vpop.permute.xlu0 %4709  ;;  %v3078_v34 = vsel %vm1688_vm4, %v5139_v45, %v4702_v17  ;;  %v2409_v12 = vrot.slane %v7312_v49, 2 }
 0x2b6   : > { %v2078_v19 = vmax.f32 %v1996_v59, 0.0  ;;  %v4717_v38 = vunpack.i.h.bf16 %v4715_v18  ;;  %v4716_v60 = vunpack.i.l.bf16 %v4715_v18  ;;  %v4712_v41 = vunpack.i.h.bf16 %v4710_v4 }
 0x2b7   : > { %v2077_v6 = vmax.f32 %v1991_v21, 0.0  ;;  %v4711_v8 = vunpack.i.l.bf16 %v4710_v4 }
 0x2b8   : > { %2166 = vst.msk [vmem:[#allocation3 + $0xf9] sm:$0xff] %vm1688_vm4, %v2078_v19  ;;  %v3243_v44 = vsel %vm3140_vm15, %v3211_v2, %v4716_v60  ;;  %v3147_v15 = vsel %vm3140_vm15, %v3114_v7, %v4717_v38  ;;  %v3111_v28 = vsel %vm3107_vm14, %v3078_v34, %v4712_v41  ;;  %v7421_v60 = vsel %vm583_vm2, %v2407_v32, %v2409_v12 }
 0x2b9   : > { %2165 = vst.msk [vmem:[#allocation3 + $0xf1] sm:$0xff] %vm1688_vm4, %v2077_v6  ;;  %v4725_v62 = vpop.permute.xlu1 %4724  ;;  %3470 = vmatprep.mubr.f32.mxu1 %v3243_v44  ;;  %v4720_v37 = vpop.permute.xlu0 %4719  ;;  %v3208_v14 = vsel %vm3107_vm14, %v3176_v40, %v4711_v8  ;;  %v4903_v12 = vpack.i.bf16 %v7272_v9, %v7421_v60 }
 0x2ba   : > { %v4722_v52 = vunpack.i.h.bf16 %v4720_v37  ;;  %v4721_v61 = vunpack.i.l.bf16 %v4720_v37  ;;  %3471 = vmatmul.mubr.f32.vlgmr.msra.gmra.mrb[0].mxu1 %v3147_v15  ;;  %v4727_v47 = vunpack.i.h.bf16 %v4725_v62  ;;  %v4726_v59 = vunpack.i.l.bf16 %v4725_v62 }
 0x2bc   : > { %v3240_v25 = vsel %vm3140_vm15, %v3208_v14, %v4721_v61  ;;  %v3144_v30 = vsel %vm3140_vm15, %v3111_v28, %v4722_v52  ;;  %v3180_v49 = vsel %vm1688_vm4, %v7136_v63, %v4726_v59  ;;  %v3082_v38 = vsel %vm1688_vm4, %v6893_v13, %v4727_v47 }
 0x2bd   : > { %v4735_v21 = vpop.permute.xlu1 %4734  ;;  %v4730_v18 = vpop.permute.xlu0 %4729  ;;  %3455 = vmatprep.mubr.f32.mxu0 %v3240_v25 }
 0x2be   : > { %v4736_v4 = vunpack.i.l.bf16 %v4735_v21  ;;  %3456 = vmatmul.mubr.f32.gmra.mrb[38].mxu0 %v3144_v30  ;;  %v4737_v50 = vunpack.i.h.bf16 %v4735_v21  ;;  %v4732_v17 = vunpack.i.h.bf16 %v4730_v18  ;;  %v4731_v2 = vunpack.i.l.bf16 %v4730_v18  ;;  %v5140_v18 = vld [vmem:[#allocation3 + $0x30] sm:$0xff] }
 0x2bf   : > { %v7408_v29 = vld [vmem:[#allocation3 + $0x100] sm:$0x3] }
 0x2c0   : > { %v7410_v24 = vld [vmem:[#allocation3 + $0xf0] sm:$0xff]  ;;  %v7414_v19 = vld [vmem:[#allocation3 + $0xf8] sm:$0xff]  ;;  %v3212_v62 = vsel %vm3107_vm14, %v3180_v49, %v4736_v4  ;;  %v2334_v13 = vrot.slane %v7408_v29, 1  ;;  %v3115_v61 = vsel %vm3107_vm14, %v3082_v38, %v4737_v50  ;;  %v3177_v47 = vsel %vm1688_vm4, %v6936_v54, %v4731_v2 }
 0x2c1   : > { %v4745_v6 = vpop.permute.xlu1 %4744  ;;  %v4740_v41 = vpop.permute.xlu0 %4739  ;;  %v4893_v8 = vpack.i.bf16 %v7282_v10, %v7410_v24  ;;  %v2331_v7 = vrot.slane %v7410_v24, 1  ;;  %v2332_v63 = vrot.slane %v7414_v19, 1  ;;  %v2411_v59 = vrot.slane %v7410_v24, 2 }
 0x2c2   : > { %v4747_v44 = vunpack.i.h.bf16 %v4745_v6  ;;  %v4746_v15 = vunpack.i.l.bf16 %v4745_v6  ;;  %v4742_v37 = vunpack.i.h.bf16 %v4740_v41  ;;  %v4741_v52 = vunpack.i.l.bf16 %v4740_v41 }
 0x2c3   : > { %4894 = vrot.lane.b32.xlu1 %v4893_v8, %s5173_s23  ;;  %v7431_v32 = vsel %vm502_vm3, %v2331_v7, %v2332_v63  ;;  %v2412_v25 = vrot.slane %v7414_v19, 2  ;;  %v3079_v4 = vsel %vm1688_vm4, %v5140_v18, %v4732_v17  ;;  %v4908_v49 = vpack.i.bf16 %v7337_v22, %v7414_v19 }
 0x2c4   : > { %v3244_v40 = vsel %vm3140_vm15, %v3212_v62, %v4746_v15  ;;  %v4898_v45 = vpack.i.bf16 %v7316_v42, %v7431_v32  ;;  %v3148_v34 = vsel %vm3140_vm15, %v3115_v61, %v4747_v44  ;;  %v7446_v42 = vsel %vm502_vm3, %v2332_v63, %v2334_v13 }
 0x2c5   : > { %v4755_v14 = vpop.permute.xlu1 %4754  ;;  %3475 = vmatprep.mubr.f32.mxu1 %v3244_v40  ;;  %v4750_v28 = vpop.permute.xlu0 %4749  ;;  %v3209_v50 = vsel %vm3107_vm14, %v3177_v47, %v4741_v52  ;;  %v3112_v54 = vsel %vm3107_vm14, %v3079_v4, %v4742_v37  ;;  %v4913_v17 = vpack.i.bf16 %v7318_v55, %v7446_v42  ;;  %v7461_v63 = vsel %vm583_vm2, %v2411_v59, %v2412_v25  ;;  %v5141_v52 = vld [vmem:[#allocation3 + $0x60] sm:$0xff] }
 0x2c6   : > { %4899 = vrot.lane.b32.xlu0 %v4898_v45, %s5174_s9  ;;  %v4752_v30 = vunpack.i.h.bf16 %v4750_v28  ;;  %v4751_v21 = vunpack.i.l.bf16 %v4750_v28  ;;  %3476 = vmatmul.mubr.f32.gmra.mrb[2].mxu1 %v3148_v34  ;;  %v4757_v6 = vunpack.i.h.bf16 %v4755_v14  ;;  %v4756_v41 = vunpack.i.l.bf16 %v4755_v14 }
 0x2c7   : > { %4904 = vrot.lane.b32.xlu1 %v4903_v12, %s5171_s6  ;;  %v4918_v62 = vpack.i.bf16 %v7341_v20, %v7461_v63 }
 0x2c8   : > { %v3241_v38 = vsel %vm3140_vm15, %v3209_v50, %v4751_v21  ;;  %v3145_v2 = vsel %vm3140_vm15, %v3112_v54, %v4752_v30  ;;  %v3181_v55 = vsel %vm1688_vm4, %v7001_v43, %v4756_v41  ;;  %v3083_v61 = vsel %vm1688_vm4, %v5141_v52, %v4757_v6 }
 0x2c9   : > { %v4765_v8 = vpop.permute.xlu1 %4764  ;;  %v4760_v7 = vpop.permute.xlu0 %4759  ;;  %3460 = vmatprep.mubr.f32.mxu0 %v3241_v38 }
 0x2ca   : > { %4909 = vrot.lane.b32.xlu0 %v4908_v49, %s5173_s23  ;;  %3461 = vmatmul.mubr.f32.gmra.mrb[40].mxu0 %v3145_v2  ;;  %v4767_v44 = vunpack.i.h.bf16 %v4765_v8  ;;  %v4766_v15 = vunpack.i.l.bf16 %v4765_v8  ;;  %v4762_v40 = vunpack.i.h.bf16 %v4760_v7  ;;  %v4761_v45 = vunpack.i.l.bf16 %v4760_v7  ;;  %v5142_v49 = vld [vmem:[#allocation3 + $0x38] sm:$0xff] }
 0x2cb   : > { %4914 = vrot.lane.b32.xlu1 %v4913_v17, %s5174_s9 }
 0x2cc   : > { %v3213_v47 = vsel %vm3107_vm14, %v3181_v55, %v4766_v15  ;;  %v3116_v59 = vsel %vm3107_vm14, %v3083_v61, %v4767_v44  ;;  %v3178_v54 = vsel %vm1688_vm4, %v7016_v0, %v4761_v45  ;;  %v3080_v38 = vsel %vm1688_vm4, %v5142_v49, %v4762_v40 }
 0x2cd   : > { %v4775_v13 = vpop.permute.xlu1 %4774  ;;  %v4770_v37 = vpop.permute.xlu0 %4769 }
 0x2ce   : > { %v4777_v34 = vunpack.i.h.bf16 %v4775_v13  ;;  %v4776_v14 = vunpack.i.l.bf16 %v4775_v13  ;;  %4919 = vrot.lane.b32.xlu0 %v4918_v62, %s5171_s6  ;;  %v4772_v28 = vunpack.i.h.bf16 %v4770_v37  ;;  %v4771_v12 = vunpack.i.l.bf16 %v4770_v37 }
 0x2d0   : > { %v3245_v30 = vsel %vm3140_vm15, %v3213_v47, %v4776_v14  ;;  %v3149_v21 = vsel %vm3140_vm15, %v3116_v59, %v4777_v34  ;;  %v3210_v41 = vsel %vm3107_vm14, %v3178_v54, %v4771_v12  ;;  %v3113_v8 = vsel %vm3107_vm14, %v3080_v38, %v4772_v28  ;;  %v5143_v14 = vld [vmem:[#allocation3 + $0x68] sm:$0xff]  ;;  %v5144_v54 = vld [vmem:[#allocation3 + $0x78] sm:$0xff] }
 0x2d1   : > { %v4785_v43 = vpop.permute.xlu1 %4784  ;;  %3480 = vmatprep.mubr.f32.mxu1 %v3245_v30  ;;  %v4780_v18 = vpop.permute.xlu0 %4779 }
 0x2d2   : > { %v4782_v4 = vunpack.i.h.bf16 %v4780_v18  ;;  %v4781_v50 = vunpack.i.l.bf16 %v4780_v18  ;;  %3481 = vmatmul.mubr.f32.gmra.mrb[4].mxu1 %v3149_v21  ;;  %v4787_v2 = vunpack.i.h.bf16 %v4785_v43  ;;  %v4786_v7 = vunpack.i.l.bf16 %v4785_v43 }
 0x2d3   : > { %v4410_v6 = vpop.f32.mrb[20].mxu0 }
 0x2d4   : > { %v2006_v17 = vadd.f32 %v7090_v36, %v4410_v6  ;;  %v2000_v44 = vpop.f32.mrb[21].mxu0  ;;  %v3242_v15 = vsel %vm3140_vm15, %v3210_v41, %v4781_v50  ;;  %v3146_v62 = vsel %vm3140_vm15, %v3113_v8, %v4782_v4  ;;  %v3084_v28 = vsel %vm1688_vm4, %v5143_v14, %v4787_v2  ;;  %v5145_v14 = vld [vmem:[#allocation3 + $0x80] sm:$0xff] }
 0x2d5   : > { %v2001_v13 = vadd.f32 %v7090_v36, %v2000_v44  ;;  %v4795_v0 = vpop.permute.xlu1 %4794  ;;  %v4790_v37 = vpop.permute.xlu0 %4789  ;;  %3465 = vmatprep.mubr.f32.mxu0 %v3242_v15  ;;  %v3182_v36 = vsel %vm1688_vm4, %v7047_v51, %v4786_v7 }
 0x2d6   : > { %v2080_v55 = vmax.f32 %v2006_v17, 0.0  ;;  %v4797_v52 = vunpack.i.h.bf16 %v4795_v0  ;;  %v4792_v61 = vunpack.i.h.bf16 %v4790_v37  ;;  %3466 = vmatmul.mubr.f32.gmra.mrb[42].mxu0 %v3146_v62  ;;  %v4796_v45 = vunpack.i.l.bf16 %v4795_v0 }
 0x2d7   : > { %v2079_v40 = vmax.f32 %v2001_v13, 0.0  ;;  %v4791_v34 = vunpack.i.l.bf16 %v4790_v37  ;;  %4434 = vmatprep.mubr.msk.f32.mxu0 %vm1688_vm4, %v6905_v5 }
 0x2d8   : > { %2168 = vst.msk [vmem:[#allocation3 + $0x111] sm:$0xff] %vm1688_vm4, %v2080_v55  ;;  %v3117_v12 = vsel %vm3107_vm14, %v3084_v28, %v4792_v61 }
 0x2d9   : > { %2167 = vst.msk [vmem:[#allocation3 + $0x109] sm:$0xff] %vm1688_vm4, %v2079_v40  ;;  %v4805_v47 = vpop.permute.xlu1 %4804  ;;  %v4800_v59 = vpop.permute.xlu0 %4799  ;;  %v3214_v30 = vsel %vm3107_vm14, %v3182_v36, %v4791_v34  ;;  %v3150_v5 = vsel %vm3140_vm15, %v3117_v12, %v4797_v52 }
 0x2da   : > { %v4802_v21 = vunpack.i.h.bf16 %v4800_v59  ;;  %v4801_v43 = vunpack.i.l.bf16 %v4800_v59  ;;  %4435 = vmatmul.mubr.msk.f32.vlgmr.msra.gmra.mrb[44].mxu0 %vm1688_vm4, %v6951_v35  ;;  %v4807_v18 = vunpack.i.h.bf16 %v4805_v47  ;;  %v4806_v4 = vunpack.i.l.bf16 %v4805_v47 }
 0x2db   : > { %v3246_v50 = vsel %vm3140_vm15, %v3214_v30, %v4796_v45  ;;  %4437 = vmatprep.mubr.msk.f32.mxu0 %vm1688_vm4, %v6985_v3  ;;  %v2414_v35 = vrot.slane %v7408_v29, 2 }
 0x2dc   : > { %3485 = vmatprep.mubr.f32.mxu1 %v3246_v50  ;;  %v3183_v51 = vsel %vm1688_vm4, %v7110_v23, %v4801_v43  ;;  %v3085_v49 = vsel %vm1688_vm4, %v5144_v54, %v4802_v21 }
 0x2dd   : > { %3486 = vmatmul.mubr.f32.gmra.mrb[6].mxu1 %v3150_v5  ;;  %v4815_v38 = vpop.permute.xlu1 %4814  ;;  %v4810_v2 = vpop.permute.xlu0 %4809  ;;  %v3215_v3 = vsel %vm3107_vm14, %v3183_v51, %v4806_v4  ;;  %v3118_v23 = vsel %vm3107_vm14, %v3085_v49, %v4807_v18  ;;  %v7524_v55 = vsel %vm583_vm2, %v2412_v25, %v2414_v35 }
 0x2de   : > { %v4812_v6 = vunpack.i.h.bf16 %v4810_v2  ;;  %v4811_v41 = vunpack.i.l.bf16 %v4810_v2  ;;  %4438 = vmatmul.mubr.msk.f32.gmra.mrb[46].mxu0 %vm1688_vm4, %v7037_v58  ;;  %v4817_v8 = vunpack.i.h.bf16 %v4815_v38  ;;  %v4816_v7 = vunpack.i.l.bf16 %v4815_v38 }
 0x2df   : > { %4440 = vmatprep.mubr.msk.f32.mxu0 %vm1688_vm4, %v6941_v33  ;;  %v7515_v62 = vld [vmem:[#allocation3 + $0x118] sm:$0x3] }
 0x2e0   : > { %v3247_v17 = vsel %vm3140_vm15, %v3215_v3, %v4811_v41  ;;  %v7510_v44 = vld [vmem:[#allocation3 + $0x108] sm:$0xff]  ;;  %v3151_v29 = vsel %vm3140_vm15, %v3118_v23, %v4812_v6  ;;  %v7513_v15 = vld [vmem:[#allocation3 + $0x110] sm:$0xff]  ;;  %v3184_v25 = vsel %vm1688_vm4, %v7161_v48, %v4816_v7  ;;  %v3086_v28 = vsel %vm1688_vm4, %v5145_v14, %v4817_v8 }
 0x2e1   : > { %v4825_v58 = vpop.permute.xlu1 %4824  ;;  %v4820_v13 = vpop.permute.xlu0 %4819  ;;  %3490 = vmatprep.mubr.f32.mxu1 %v3247_v17  ;;  %v4923_v33 = vpack.i.bf16 %v7373_v16, %v7510_v44  ;;  %v2336_v0 = vrot.slane %v7510_v44, 1  ;;  %v2337_v37 = vrot.slane %v7513_v15, 1  ;;  %v2339_v36 = vrot.slane %v7515_v62, 1  ;;  %v8182_v3 = vld [vmem:[#allocation5_spill] sm:$0xff] }
 0x2e2   : > { %v4827_v52 = vunpack.i.h.bf16 %v4825_v58  ;;  %v4826_v61 = vunpack.i.l.bf16 %v4825_v58  ;;  %v4822_v40 = vunpack.i.h.bf16 %v4820_v13  ;;  %v4821_v45 = vunpack.i.l.bf16 %v4820_v13  ;;  %3491 = vmatmul.mubr.f32.gmra.mrb[8].mxu1 %v3151_v29  ;;  %4441 = vmatmul.mubr.msk.f32.gmra.mrb[48].mxu0 %vm1688_vm4, %v7021_v39  ;;  %v5147_v17 = vld [vmem:[#allocation3 + $0x90] sm:$0xff] }
 0x2e3   : > { %4924 = vrot.lane.b32.xlu1 %v4923_v33, %s5173_s23  ;;  %4443 = vmatprep.mubr.msk.f32.mxu0 %vm1688_vm4, %v7068_v46  ;;  %v7532_v34 = vsel %vm502_vm3, %v2336_v0, %v2337_v37  ;;  %v4933_v39 = vpack.i.bf16 %v7351_v31, %v7524_v55  ;;  %v2416_v48 = vrot.slane %v7510_v44, 2  ;;  %v2417_v21 = vrot.slane %v7513_v15, 2 }
 0x2e4   : > { %v4928_v12 = vpack.i.bf16 %v7410_v24, %v7532_v34  ;;  %v3216_v47 = vsel %vm3107_vm14, %v3184_v25, %v4821_v45  ;;  %v3119_v46 = vsel %vm3107_vm14, %v3086_v28, %v4822_v40  ;;  %v7550_v43 = vsel %vm502_vm3, %v2337_v37, %v2339_v36  ;;  %v5148_v36 = vld [vmem:[#allocation3 + $0x98] sm:$0xff] }
 0x2e5   : > { %v3248_v59 = vsel %vm3140_vm15, %v3216_v47, %v4826_v61  ;;  %v3152_v30 = vsel %vm3140_vm15, %v3119_v46, %v4827_v52  ;;  %v4938_v5 = vpack.i.bf16 %v7421_v60, %v7513_v15  ;;  %v4943_v18 = vpack.i.bf16 %v7414_v19, %v7550_v43 }
 0x2e6   : > { %4929 = vrot.lane.b32.xlu0 %v4928_v12, %s5174_s9  ;;  %3495 = vmatprep.mubr.f32.mxu1 %v3248_v59  ;;  %v7562_v4 = vsel %vm583_vm2, %v2416_v48, %v2417_v21 }
 0x2e7   : > { %4934 = vrot.lane.b32.xlu1 %v4933_v39, %s5171_s6  ;;  %4444 = vmatmul.mubr.msk.f32.gmra.mrb[50].mxu0 %vm1688_vm4, %v7144_v57  ;;  %v4948_v57 = vpack.i.bf16 %v7431_v32, %v7562_v4 }
 0x2e8   : > { %3496 = vmatmul.mubr.f32.gmra.mrb[10].mxu1 %v3152_v30  ;;  %4446 = vmatprep.mubr.msk.f32.mxu0 %vm1688_vm4, %v7177_v27  ;;  %v4830_v27 = vpop.permute.xlu0 %4829 }
 0x2e9   : > { %v4831_v54 = vunpack.i.l.bf16 %v4830_v27 }
 0x2ea   : > { %4939 = vrot.lane.b32.xlu0 %v4938_v5, %s5173_s23 }
 0x2eb   : > { %4944 = vrot.lane.b32.xlu1 %v4943_v18, %s5174_s9  ;;  %4447 = vmatmul.mubr.msk.f32.gmra.mrb[52].mxu0 %vm1688_vm4, %v7190_v11  ;;  %v7582_v11 = vld [vmem:[%s8171_s2] ss:$0 sm:$0xff]  ;;  %v3185_v23 = vsel %vm1688_vm4, %v8182_v3, %v4831_v54 }
 0x2ec   : > { %4449 = vmatprep.mubr.msk.f32.mxu0 %vm1688_vm4, %v7214_v26 }
 0x2ee   : > { %4949 = vrot.lane.b32.xlu0 %v4948_v57, %s5171_s6 }
 0x2ef   : > { %4450 = vmatmul.mubr.msk.f32.gmra.mrb[54].mxu0 %vm1688_vm4, %v7257_v53  ;;  %v4832_v53 = vunpack.i.h.bf16 %v4830_v27 }
 0x2f0   : > { %4452 = vmatprep.mubr.msk.f32.mxu0 %vm1688_vm4, %v7282_v10 }
 0x2f1   : > { %v3087_v29 = vsel %vm1688_vm4, %v5147_v17, %v4832_v53 }
 0x2f3   : > { %v4413_v50 = vpop.f32.mrb[22].mxu0  ;;  %4453 = vmatmul.mubr.msk.f32.gmra.mrb[56].mxu0 %vm1688_vm4, %v7337_v22 }
 0x2f4   : > { %v2016_v26 = vadd.f32 %v7582_v11, %v4413_v50  ;;  %v2010_v51 = vpop.f32.mrb[23].mxu0  ;;  %4455 = vmatprep.mubr.msk.f32.mxu0 %vm1688_vm4, %v7373_v16  ;;  %v2419_v16 = vrot.slane %v7515_v62, 2 }
 0x2f5   : > { %v2011_v10 = vadd.f32 %v7582_v11, %v2010_v51  ;;  %v4835_v49 = vpop.permute.xlu1 %4834 }
 0x2f6   : > { %v2082_v38 = vmax.f32 %v2016_v26, 0.0  ;;  %v4837_v2 = vunpack.i.h.bf16 %v4835_v49  ;;  %v4836_v35 = vunpack.i.l.bf16 %v4835_v49  ;;  %v7607_v45 = vsel %vm583_vm2, %v2417_v21, %v2419_v16 }
 0x2f7   : > { %v2081_v22 = vmax.f32 %v2011_v10, 0.0  ;;  %4456 = vmatmul.mubr.msk.f32.gmra.mrb[58].mxu0 %vm1688_vm4, %v7421_v60  ;;  %v4963_v54 = vpack.i.bf16 %v7446_v42, %v7607_v45 }
 0x2f8   : > { %2170 = vst.msk [vmem:[#allocation3 + $0x129] sm:$0xff] %vm1688_vm4, %v2082_v38  ;;  %v4840_v6 = vpop.permute.xlu0 %4839  ;;  %4458 = vmatprep.mubr.msk.f32.mxu0 %vm1688_vm4, %v7461_v63  ;;  %v3217_v13 = vsel %vm3107_vm14, %v3185_v23, %v4836_v35  ;;  %v3120_v33 = vsel %vm3107_vm14, %v3087_v29, %v4837_v2 }
 0x2f9   : > { %2169 = vst.msk [vmem:[#allocation3 + $0x121] sm:$0xff] %vm1688_vm4, %v2081_v22  ;;  %v4842_v41 = vunpack.i.h.bf16 %v4840_v6  ;;  %v4841_v8 = vunpack.i.l.bf16 %v4840_v6  ;;  %v4845_v7 = vpop.permute.xlu1 %4844 }
 0x2fa   : > { %v4847_v60 = vunpack.i.h.bf16 %v4845_v7  ;;  %v4846_v58 = vunpack.i.l.bf16 %v4845_v7 }
 0x2fb   : > { %4459 = vmatmul.mubr.msk.f32.gmra.mrb[60].mxu0 %vm1688_vm4, %v7524_v55  ;;  %v3249_v62 = vsel %vm3140_vm15, %v3217_v13, %v4841_v8  ;;  %v3153_v0 = vsel %vm3140_vm15, %v3120_v33, %v4842_v41 }
 0x2fc   : > { %v4850_v37 = vpop.permute.xlu0 %4849  ;;  %3500 = vmatprep.mubr.f32.mxu1 %v3249_v62  ;;  %4461 = vmatprep.mubr.msk.f32.mxu0 %vm1688_vm4, %v7562_v4  ;;  %v3186_v28 = vsel %vm1688_vm4, %v7203_v56, %v4846_v58  ;;  %v3088_v12 = vsel %vm1688_vm4, %v5148_v36, %v4847_v60 }
 0x2fd   : > { %v4852_v52 = vunpack.i.h.bf16 %v4850_v37  ;;  %v4851_v61 = vunpack.i.l.bf16 %v4850_v37  ;;  %v4855_v40 = vpop.permute.xlu1 %4854  ;;  %3501 = vmatmul.mubr.f32.gmra.mrb[12].mxu1 %v3153_v0  ;;  %v5149_v37 = vld [vmem:[#allocation3 + $0xa8] sm:$0xff] }
 0x2fe   : > { %v4857_v25 = vunpack.i.h.bf16 %v4855_v40  ;;  %v4856_v14 = vunpack.i.l.bf16 %v4855_v40 }
 0x2ff   : > { %4462 = vmatmul.mubr.msk.f32.gmra.mrb[62].mxu0 %vm1688_vm4, %v7607_v45  ;;  %v3218_v39 = vsel %vm3107_vm14, %v3186_v28, %v4851_v61  ;;  %v3121_v47 = vsel %vm3107_vm14, %v3088_v12, %v4852_v52  ;;  %v2217_v46 = vld [vmem:[#allocation3 + $0x130] sm:$0x3] }
 0x300   : > { %v3250_v59 = vsel %vm3140_vm15, %v3218_v39, %v4856_v14  ;;  %v3154_v30 = vsel %vm3140_vm15, %v3121_v47, %v4857_v25  ;;  %v7618_v48 = vld [vmem:[#allocation3 + $0x120] sm:$0xff]  ;;  %v7620_v21 = vld [vmem:[#allocation3 + $0x128] sm:$0xff]  ;;  %v2424_v56 = vrot.slane %v2217_v46, 2  ;;  %v2344_v27 = vrot.slane %v2217_v46, 1  ;;  %v4860_v22 = vpop.permute.xlu0 %4859 }
 0x301   : > { %3505 = vmatprep.mubr.f32.mxu1 %v3250_v59  ;;  %v4953_v5 = vpack.i.bf16 %v7461_v63, %v7618_v48  ;;  %v2421_v18 = vrot.slane %v7618_v48, 2  ;;  %v2422_v57 = vrot.slane %v7620_v21, 2  ;;  %v2341_v50 = vrot.slane %v7618_v48, 1 }
 0x302   : > { %3506 = vmatmul.mubr.f32.gmra.mrb[14].mxu1 %v3154_v30  ;;  %v2342_v26 = vrot.slane %v7620_v21, 1  ;;  %v4968_v38 = vpack.i.bf16 %v7524_v55, %v7620_v21  ;;  %v4862_v8 = vunpack.i.h.bf16 %v4860_v22  ;;  %v4861_v7 = vunpack.i.l.bf16 %v4860_v22 }
 0x303   : > { %4954 = vrot.lane.b32.xlu1 %v4953_v5, %s5173_s23  ;;  %v7630_v51 = vsel %vm583_vm2, %v2421_v18, %v2422_v57  ;;  %v7633_v53 = vsel %vm583_vm2, %v2422_v57, %v2424_v56  ;;  %v5150_v56 = vld [vmem:[#allocation3 + $0xb0] sm:$0xff] }
 0x304   : > { %v7636_v63 = vsel %vm502_vm3, %v2341_v50, %v2342_v26  ;;  %4464 = vmatprep.mubr.msk.f32.mxu0 %vm1688_vm4, %v7630_v51  ;;  %v7647_v49 = vsel %vm502_vm3, %v2342_v26, %v2344_v27  ;;  %v4978_v35 = vpack.i.bf16 %v7532_v34, %v7630_v51  ;;  %v3187_v0 = vsel %vm1688_vm4, %v7262_v1, %v4861_v7 }
 0x305   : > { %v4958_v10 = vpack.i.bf16 %v7510_v44, %v7636_v63  ;;  %4465 = vmatmul.mubr.msk.f32.gmra.mrb[64].mxu0 %vm1688_vm4, %v7633_v53  ;;  %v4973_v2 = vpack.i.bf16 %v7513_v15, %v7647_v49  ;;  %v3089_v52 = vsel %vm1688_vm4, %v5149_v37, %v4862_v8  ;;  %v4993_v7 = vpack.i.bf16 %v7550_v43, %v7633_v53 }
 0x307   : > { %4959 = vrot.lane.b32.xlu0 %v4958_v10, %s5174_s9  ;;  %4964 = vrot.lane.b32.xlu1 %v4963_v54, %s5171_s6 }
 0x30b   : > { %4969 = vrot.lane.b32.xlu0 %v4968_v38, %s5173_s23  ;;  %4974 = vrot.lane.b32.xlu1 %v4973_v2, %s5174_s9 }
 0x30f   : > { %4979 = vrot.lane.b32.xlu0 %v4978_v35, %s5171_s6 }
 0x313   : > { %v4416_v6 = vpop.f32.mrb[24].mxu0 }
 0x314   : > { %v2026_v16 = vadd.f32 %v7582_v11, %v4416_v6  ;;  %v2020_v41 = vpop.f32.mrb[25].mxu0 }
 0x315   : > { %v2021_v55 = vadd.f32 %v7582_v11, %v2020_v41  ;;  %v4865_v3 = vpop.permute.xlu1 %4864 }
 0x316   : > { %v2084_v23 = vmax.f32 %v2026_v16, 0.0  ;;  %v4867_v17 = vunpack.i.h.bf16 %v4865_v3  ;;  %v4866_v29 = vunpack.i.l.bf16 %v4865_v3 }
 0x317   : > { %v2083_v60 = vmax.f32 %v2021_v55, 0.0 }
 0x318   : > { %2172 = vst.msk [vmem:[#allocation3 + $0x141] sm:$0xff] %vm1688_vm4, %v2084_v23  ;;  %v4870_v58 = vpop.permute.xlu0 %4869  ;;  %v3219_v25 = vsel %vm3107_vm14, %v3187_v0, %v4866_v29  ;;  %v3122_v14 = vsel %vm3107_vm14, %v3089_v52, %v4867_v17 }
 0x319   : > { %2171 = vst.msk [vmem:[#allocation3 + $0x139] sm:$0xff] %vm1688_vm4, %v2083_v60  ;;  %v4872_v13 = vunpack.i.h.bf16 %v4870_v58  ;;  %v4871_v33 = vunpack.i.l.bf16 %v4870_v58  ;;  %v4875_v62 = vpop.permute.xlu1 %4874 }
 0x31a   : > { %v4877_v61 = vunpack.i.h.bf16 %v4875_v62  ;;  %v4876_v40 = vunpack.i.l.bf16 %v4875_v62 }
 0x31b   : > { %v3251_v28 = vsel %vm3140_vm15, %v3219_v25, %v4871_v33  ;;  %v3155_v36 = vsel %vm3140_vm15, %v3122_v14, %v4872_v13 }
 0x31c   : > { %v4880_v12 = vpop.permute.xlu0 %4879  ;;  %3510 = vmatprep.mubr.f32.mxu1 %v3251_v28  ;;  %v3188_v30 = vsel %vm1688_vm4, %v7272_v9, %v4876_v40  ;;  %v3090_v5 = vsel %vm1688_vm4, %v5150_v56, %v4877_v61 }
 0x31d   : > { %v4882_v39 = vunpack.i.h.bf16 %v4880_v12  ;;  %v4881_v47 = vunpack.i.l.bf16 %v4880_v12  ;;  %v4885_v46 = vpop.permute.xlu1 %4884  ;;  %3511 = vmatmul.mubr.f32.gmra.mrb[16].mxu1 %v3155_v36 }
 0x31e   : > { %v4887_v1 = vunpack.i.h.bf16 %v4885_v46  ;;  %v4886_v59 = vunpack.i.l.bf16 %v4885_v46 }
 0x31f   : > { %v3220_v18 = vsel %vm3107_vm14, %v3188_v30, %v4881_v47  ;;  %v3123_v57 = vsel %vm3107_vm14, %v3090_v5, %v4882_v39  ;;  %v2220_v27 = vld [vmem:[#allocation3 + $0x148] sm:$0x3]  ;;  %v5151_v47 = vld [vmem:[#allocation3 + $0xc0] sm:$0xff] }
 0x320   : > { %v3252_v50 = vsel %vm3140_vm15, %v3220_v18, %v4886_v59  ;;  %v3156_v26 = vsel %vm3140_vm15, %v3123_v57, %v4887_v1  ;;  %v7678_v54 = vld [vmem:[#allocation3 + $0x138] sm:$0xff]  ;;  %v7680_v10 = vld [vmem:[#allocation3 + $0x140] sm:$0xff]  ;;  %v2429_v38 = vrot.slane %v2220_v27, 2  ;;  %v2349_v22 = vrot.slane %v2220_v27, 1  ;;  %v4890_v60 = vpop.permute.xlu0 %4889 }
 0x321   : > { %3515 = vmatprep.mubr.f32.mxu1 %v3252_v50  ;;  %v4983_v9 = vpack.i.bf16 %v7562_v4, %v7678_v54  ;;  %v2426_v2 = vrot.slane %v7678_v54, 2  ;;  %v2427_v35 = vrot.slane %v7680_v10, 2  ;;  %v2346_v6 = vrot.slane %v7678_v54, 1 }
 0x322   : > { %3516 = vmatmul.mubr.f32.gmra.mrb[18].mxu1 %v3156_v26  ;;  %v2347_v16 = vrot.slane %v7680_v10, 1  ;;  %v4998_v23 = vpack.i.bf16 %v7607_v45, %v7680_v10  ;;  %v4892_v62 = vunpack.i.h.bf16 %v4890_v60  ;;  %v4891_v0 = vunpack.i.l.bf16 %v4890_v60 }
 0x323   : > { %4984 = vrot.lane.b32.xlu1 %v4983_v9, %s5173_s23  ;;  %v7690_v41 = vsel %vm583_vm2, %v2426_v2, %v2427_v35  ;;  %v7693_v8 = vsel %vm583_vm2, %v2427_v35, %v2429_v38  ;;  %v5152_v2 = vld [vmem:[#allocation3 + $0xc8] sm:$0xff] }
 0x324   : > { %v7696_v4 = vsel %vm502_vm3, %v2346_v6, %v2347_v16  ;;  %4467 = vmatprep.mubr.msk.f32.mxu0 %vm1688_vm4, %v7690_v41  ;;  %v7707_v3 = vsel %vm502_vm3, %v2347_v16, %v2349_v22  ;;  %v5008_v29 = vpack.i.bf16 %v7636_v63, %v7690_v41  ;;  %v3189_v39 = vsel %vm1688_vm4, %v7341_v20, %v4891_v0 }
 0x325   : > { %v4988_v55 = vpack.i.bf16 %v7618_v48, %v7696_v4  ;;  %4468 = vmatmul.mubr.msk.f32.gmra.mrb[66].mxu0 %vm1688_vm4, %v7693_v8  ;;  %v5003_v17 = vpack.i.bf16 %v7620_v21, %v7707_v3  ;;  %v3091_v46 = vsel %vm1688_vm4, %v5151_v47, %v4892_v62 }
 0x327   : > { %4989 = vrot.lane.b32.xlu0 %v4988_v55, %s5174_s9  ;;  %4994 = vrot.lane.b32.xlu1 %v4993_v7, %s5171_s6 }
 0x32b   : > { %4999 = vrot.lane.b32.xlu0 %v4998_v23, %s5173_s23  ;;  %5004 = vrot.lane.b32.xlu1 %v5003_v17, %s5174_s9 }
 0x32f   : > { %5009 = vrot.lane.b32.xlu0 %v5008_v29, %s5171_s6 }
 0x333   : > { %v4419_v58 = vpop.f32.mrb[26].mxu0 }
 0x334   : > { %v2036_v13 = vadd.f32 %v7582_v11, %v4419_v58  ;;  %v2030_v33 = vpop.f32.mrb[27].mxu0 }
 0x335   : > { %v2031_v45 = vadd.f32 %v7582_v11, %v2030_v33  ;;  %v4895_v37 = vpop.permute.xlu1 %4894 }
 0x336   : > { %v2086_v52 = vmax.f32 %v2036_v13, 0.0  ;;  %v4897_v61 = vunpack.i.h.bf16 %v4895_v37  ;;  %v4896_v40 = vunpack.i.l.bf16 %v4895_v37  ;;  %v5023_v37 = vpack.i.bf16 %v7647_v49, %v7693_v8 }
 0x337   : > { %v2085_v25 = vmax.f32 %v2031_v45, 0.0 }
 0x338   : > { %2174 = vst.msk [vmem:[#allocation3 + $0x159] sm:$0xff] %vm1688_vm4, %v2086_v52  ;;  %v4900_v14 = vpop.permute.xlu0 %4899  ;;  %v3221_v30 = vsel %vm3107_vm14, %v3189_v39, %v4896_v40  ;;  %v3124_v56 = vsel %vm3107_vm14, %v3091_v46, %v4897_v61 }
 0x339   : > { %2173 = vst.msk [vmem:[#allocation3 + $0x151] sm:$0xff] %vm1688_vm4, %v2085_v25  ;;  %v4902_v28 = vunpack.i.h.bf16 %v4900_v14  ;;  %v4901_v36 = vunpack.i.l.bf16 %v4900_v14  ;;  %v4905_v12 = vpop.permute.xlu1 %4904 }
 0x33a   : > { %v4907_v1 = vunpack.i.h.bf16 %v4905_v12  ;;  %v4906_v59 = vunpack.i.l.bf16 %v4905_v12 }
 0x33b   : > { %v3253_v5 = vsel %vm3140_vm15, %v3221_v30, %v4901_v36  ;;  %v3157_v18 = vsel %vm3140_vm15, %v3124_v56, %v4902_v28 }
 0x33c   : > { %v4910_v57 = vpop.permute.xlu0 %4909  ;;  %3520 = vmatprep.mubr.f32.mxu1 %v3253_v5  ;;  %v3190_v9 = vsel %vm1688_vm4, %v7351_v31, %v4906_v59  ;;  %v3092_v35 = vsel %vm1688_vm4, %v5152_v2, %v4907_v1 }
 0x33d   : > { %v4912_v27 = vunpack.i.h.bf16 %v4910_v57  ;;  %v4911_v50 = vunpack.i.l.bf16 %v4910_v57  ;;  %v4915_v26 = vpop.permute.xlu1 %4914  ;;  %3521 = vmatmul.mubr.f32.gmra.mrb[20].mxu1 %v3157_v18 }
 0x33e   : > { %v4917_v20 = vunpack.i.h.bf16 %v4915_v26  ;;  %v4916_v38 = vunpack.i.l.bf16 %v4915_v26 }
 0x33f   : > { %v3222_v22 = vsel %vm3107_vm14, %v3190_v9, %v4911_v50  ;;  %v3125_v6 = vsel %vm3107_vm14, %v3092_v35, %v4912_v27  ;;  %v2223_v16 = vld [vmem:[#allocation3 + $0x160] sm:$0x3] }
 0x340   : > { %v3254_v7 = vsel %vm3140_vm15, %v3222_v22, %v4916_v38  ;;  %v3158_v55 = vsel %vm3140_vm15, %v3125_v6, %v4917_v20  ;;  %v7738_v23 = vld [vmem:[#allocation3 + $0x150] sm:$0xff]  ;;  %v7740_v17 = vld [vmem:[#allocation3 + $0x158] sm:$0xff]  ;;  %v2434_v29 = vrot.slane %v2223_v16, 2  ;;  %v2354_v13 = vrot.slane %v2223_v16, 1  ;;  %v4920_v28 = vpop.permute.xlu0 %4919 }
 0x341   : > { %3525 = vmatprep.mubr.f32.mxu1 %v3254_v7  ;;  %v5013_v31 = vpack.i.bf16 %v7630_v51, %v7738_v23  ;;  %v2431_v60 = vrot.slane %v7738_v23, 2  ;;  %v2432_v58 = vrot.slane %v7740_v17, 2  ;;  %v2351_v33 = vrot.slane %v7738_v23, 1  ;;  %v5153_v20 = vld [vmem:[#allocation3 + $0xd8] sm:$0xff] }
 0x342   : > { %3526 = vmatmul.mubr.f32.gmra.mrb[22].mxu1 %v3158_v55  ;;  %v2352_v62 = vrot.slane %v7740_v17, 1  ;;  %v5028_v40 = vpack.i.bf16 %v7633_v53, %v7740_v17  ;;  %v4922_v53 = vunpack.i.h.bf16 %v4920_v28  ;;  %v4921_v46 = vunpack.i.l.bf16 %v4920_v28 }
 0x343   : > { %5014 = vrot.lane.b32.xlu1 %v5013_v31, %s5173_s23  ;;  %v7750_v0 = vsel %vm583_vm2, %v2431_v60, %v2432_v58  ;;  %v7753_v45 = vsel %vm583_vm2, %v2432_v58, %v2434_v29 }
 0x344   : > { %v7756_v51 = vsel %vm502_vm3, %v2351_v33, %v2352_v62  ;;  %4470 = vmatprep.mubr.msk.f32.mxu0 %vm1688_vm4, %v7750_v0  ;;  %v7767_v61 = vsel %vm502_vm3, %v2352_v62, %v2354_v13  ;;  %v5038_v14 = vpack.i.bf16 %v7696_v4, %v7750_v0  ;;  %v3191_v26 = vsel %vm1688_vm4, %v7431_v32, %v4921_v46  ;;  %v5154_v13 = vld [vmem:[#allocation3 + $0xe0] sm:$0xff] }
 0x345   : > { %v5018_v52 = vpack.i.bf16 %v7678_v54, %v7756_v51  ;;  %4471 = vmatmul.mubr.msk.f32.gmra.mrb[68].mxu0 %vm1688_vm4, %v7753_v45  ;;  %v5033_v25 = vpack.i.bf16 %v7680_v10, %v7767_v61  ;;  %v3093_v38 = vsel %vm1688_vm4, %v5153_v20, %v4922_v53 }
 0x347   : > { %5019 = vrot.lane.b32.xlu0 %v5018_v52, %s5174_s9  ;;  %5024 = vrot.lane.b32.xlu1 %v5023_v37, %s5171_s6 }
 0x34b   : > { %5029 = vrot.lane.b32.xlu0 %v5028_v40, %s5173_s23  ;;  %5034 = vrot.lane.b32.xlu1 %v5033_v25, %s5174_s9 }
 0x34f   : > { %5039 = vrot.lane.b32.xlu0 %v5038_v14, %s5171_s6 }
 0x352   : > { %v4422_v36 = vpop.f32.mrb[28].mxu0 }
 0x353   : > { %v2046_v12 = vadd.f32 %v7582_v11, %v4422_v36  ;;  %v2040_v39 = vpop.f32.mrb[29].mxu0 }
 0x354   : > { %v2041_v47 = vadd.f32 %v7582_v11, %v2040_v39 }
 0x355   : > { %v2088_v1 = vmax.f32 %v2046_v12, 0.0  ;;  %v4925_v59 = vpop.permute.xlu1 %4924 }
 0x356   : > { %v2087_v30 = vmax.f32 %v2041_v47, 0.0  ;;  %v4927_v56 = vunpack.i.h.bf16 %v4925_v59  ;;  %v4926_v5 = vunpack.i.l.bf16 %v4925_v59 }
 0x357   : > { %2176 = vst.msk [vmem:[#allocation3 + $0x171] sm:$0xff] %vm1688_vm4, %v2088_v1 }
 0x358   : > { %2175 = vst.msk [vmem:[#allocation3 + $0x169] sm:$0xff] %vm1688_vm4, %v2087_v30  ;;  %v4930_v18 = vpop.permute.xlu0 %4929  ;;  %v3223_v35 = vsel %vm3107_vm14, %v3191_v26, %v4926_v5  ;;  %v3126_v22 = vsel %vm3107_vm14, %v3093_v38, %v4927_v56 }
 0x359   : > { %v4932_v57 = vunpack.i.h.bf16 %v4930_v18  ;;  %v4931_v27 = vunpack.i.l.bf16 %v4930_v18  ;;  %v4935_v50 = vpop.permute.xlu1 %4934 }
 0x35a   : > { %v4937_v9 = vunpack.i.h.bf16 %v4935_v50  ;;  %v4936_v2 = vunpack.i.l.bf16 %v4935_v50 }
 0x35b   : > { %v3255_v6 = vsel %vm3140_vm15, %v3223_v35, %v4931_v27  ;;  %v3159_v16 = vsel %vm3140_vm15, %v3126_v22, %v4932_v57 }
 0x35c   : > { %v4940_v7 = vpop.permute.xlu0 %4939  ;;  %3530 = vmatprep.mubr.f32.mxu1 %v3255_v6  ;;  %v3192_v58 = vsel %vm1688_vm4, %v7446_v42, %v4936_v2  ;;  %v3094_v33 = vsel %vm1688_vm4, %v5154_v13, %v4937_v9 }
 0x35d   : > { %v4942_v55 = vunpack.i.h.bf16 %v4940_v7  ;;  %v4941_v29 = vunpack.i.l.bf16 %v4940_v7  ;;  %v4945_v31 = vpop.permute.xlu1 %4944  ;;  %3531 = vmatmul.mubr.f32.gmra.mrb[24].mxu1 %v3159_v16 }
 0x35e   : > { %v4947_v32 = vunpack.i.h.bf16 %v4945_v31  ;;  %v4946_v60 = vunpack.i.l.bf16 %v4945_v31  ;;  %v2226_v62 = vld [vmem:[#allocation3 + $0x178] sm:$0x3] }
 0x35f   : > { %v3224_v37 = vsel %vm3107_vm14, %v3192_v58, %v4941_v29  ;;  %v3127_v52 = vsel %vm3107_vm14, %v3094_v33, %v4942_v55  ;;  %v7796_v40 = vld [vmem:[#allocation3 + $0x168] sm:$0xff]  ;;  %v7798_v25 = vld [vmem:[#allocation3 + $0x170] sm:$0xff]  ;;  %v2439_v14 = vrot.slane %v2226_v62, 2  ;;  %v2359_v47 = vrot.slane %v2226_v62, 1 }
 0x360   : > { %v3256_v28 = vsel %vm3140_vm15, %v3224_v37, %v4946_v60  ;;  %v3160_v36 = vsel %vm3140_vm15, %v3127_v52, %v4947_v32  ;;  %v5043_v42 = vpack.i.bf16 %v7690_v41, %v7796_v40  ;;  %v2436_v12 = vrot.slane %v7796_v40, 2  ;;  %v4950_v9 = vpop.permute.xlu0 %4949 }
 0x361   : > { %3535 = vmatprep.mubr.f32.mxu1 %v3256_v28  ;;  %v2437_v39 = vrot.slane %v7798_v25, 2  ;;  %v2356_v53 = vrot.slane %v7796_v40, 1  ;;  %v2357_v46 = vrot.slane %v7798_v25, 1  ;;  %v5053_v41 = vpack.i.bf16 %v7707_v3, %v7753_v45 }
 0x362   : > { %3536 = vmatmul.mubr.f32.gmra.mrb[26].mxu1 %v3160_v36  ;;  %5044 = vrot.lane.b32.xlu1 %v5043_v42, %s5173_s23  ;;  %v5058_v57 = vpack.i.bf16 %v7693_v8, %v7798_v25  ;;  %v4952_v8 = vunpack.i.h.bf16 %v4950_v9  ;;  %v4951_v22 = vunpack.i.l.bf16 %v4950_v9 }
 0x363   : > { %v7810_v1 = vsel %vm583_vm2, %v2436_v12, %v2437_v39  ;;  %v7813_v59 = vsel %vm583_vm2, %v2437_v39, %v2439_v14  ;;  %v7822_v30 = vsel %vm502_vm3, %v2356_v53, %v2357_v46  ;;  %v7825_v56 = vsel %vm502_vm3, %v2357_v46, %v2359_v47 }
 0x364   : > { %4473 = vmatprep.mubr.msk.f32.mxu0 %vm1688_vm4, %v7810_v1  ;;  %v5048_v5 = vpack.i.bf16 %v7738_v23, %v7822_v30  ;;  %v5063_v18 = vpack.i.bf16 %v7740_v17, %v7825_v56  ;;  %v5068_v27 = vpack.i.bf16 %v7756_v51, %v7810_v1  ;;  %v3193_v31 = vsel %vm1688_vm4, %v7532_v34, %v4951_v22 }
 0x365   : > { %4474 = vmatmul.mubr.msk.f32.gmra.mrb[70].mxu0 %vm1688_vm4, %v7813_v59 }
 0x366   : > { %5054 = vrot.lane.b32.xlu1 %v5053_v41, %s5171_s6  ;;  %5049 = vrot.lane.b32.xlu0 %v5048_v5, %s5174_s9 }
 0x36a   : > { %5064 = vrot.lane.b32.xlu1 %v5063_v18, %s5174_s9  ;;  %5059 = vrot.lane.b32.xlu0 %v5058_v57, %s5173_s23 }
 0x36e   : > { %5069 = vrot.lane.b32.xlu0 %v5068_v27, %s5171_s6 }
 0x36f   : > { %v4425_v50 = vpop.f32.mrb[30].mxu0 }
 0x370   : > { %v2056_v26 = vadd.f32 %v7582_v11, %v4425_v50  ;;  %v2050_v20 = vpop.f32.mrb[31].mxu0 }
 0x371   : > { %v2051_v38 = vadd.f32 %v7582_v11, %v2050_v20  ;;  %v3095_v11 = vsel %vm1688_vm4, %v7410_v24, %v4952_v8 }
 0x372   : > { %v2090_v2 = vmax.f32 %v2056_v26, 0.0 }
 0x373   : > { %v2089_v35 = vmax.f32 %v2051_v38, 0.0 }
 0x374   : > { %2178 = vst.msk [vmem:[#allocation3 + $0x189] sm:$0xff] %vm1688_vm4, %v2090_v2 }
 0x375   : > { %2177 = vst.msk [vmem:[#allocation3 + $0x181] sm:$0xff] %vm1688_vm4, %v2089_v35  ;;  %v4955_v6 = vpop.permute.xlu1 %4954  ;;  %v5083_v35 = vpack.i.bf16 %v7767_v61, %v7813_v59 }
 0x376   : > { %v4957_v16 = vunpack.i.h.bf16 %v4955_v6  ;;  %v4956_v7 = vunpack.i.l.bf16 %v4955_v6 }
 0x378   : > { %v3225_v37 = vsel %vm3107_vm14, %v3193_v31, %v4956_v7  ;;  %v3128_v52 = vsel %vm3107_vm14, %v3095_v11, %v4957_v16  ;;  %v2230_v11 = vld [vmem:[#allocation3 + $0x198] sm:$0xff] }
 0x379   : > { %v4960_v55 = vpop.permute.xlu0 %4959  ;;  %v4965_v29 = vpop.permute.xlu1 %4964 }
 0x37a   : > { %v4962_v32 = vunpack.i.h.bf16 %v4960_v55  ;;  %v4961_v60 = vunpack.i.l.bf16 %v4960_v55  ;;  %v4967_v58 = vunpack.i.h.bf16 %v4965_v29  ;;  %v4966_v13 = vunpack.i.l.bf16 %v4965_v29  ;;  %v7848_v33 = vpop.f32.mrb[32].mxu0 }
 0x37b   : > { %v3444_v62 = vpop.f32.mrb[33].mxu0  ;;  %v2229_v42 = vld [vmem:[#allocation3 + $0x190] sm:$0x3] }
 0x37c   : > { %v3257_v14 = vsel %vm3140_vm15, %v3225_v37, %v4961_v60  ;;  %v3161_v28 = vsel %vm3140_vm15, %v3128_v52, %v4962_v32  ;;  %v7854_v36 = vld [vmem:[#allocation3 + $0x180] sm:$0xff]  ;;  %v3194_v24 = vsel %vm1688_vm4, %v7550_v43, %v4966_v13  ;;  %v7858_v34 = vld [vmem:[#allocation3 + $0x188] sm:$0xff]  ;;  %v3096_v41 = vsel %vm1688_vm4, %v7414_v19, %v4967_v58 }
 0x37d   : > { %v4970_v12 = vpop.permute.xlu0 %4969  ;;  %3540 = vmatprep.mubr.f32.mxu1 %v3257_v14  ;;  %v4975_v39 = vpop.permute.xlu1 %4974  ;;  %v5073_v47 = vpack.i.bf16 %v7750_v0, %v7854_v36  ;;  %v2481_v53 = vrot.slane %v7854_v36, 2  ;;  %v2482_v46 = vrot.slane %v7858_v34, 2  ;;  %v2447_v0 = vrot.slane %v2229_v42, 1  ;;  %v2231_v58 = vld [vmem:[#allocation3 + $0x1a0] sm:$0xff]  ;;  %v2232_v62 = vld [vmem:[#allocation3 + $0x1a8] sm:$0x3] }
 0x37e   : > { %v4972_v5 = vunpack.i.h.bf16 %v4970_v12  ;;  %v4971_v18 = vunpack.i.l.bf16 %v4970_v12  ;;  %v4977_v57 = vunpack.i.h.bf16 %v4975_v39  ;;  %v4976_v43 = vunpack.i.l.bf16 %v4975_v39  ;;  %3541 = vmatmul.mubr.f32.gmra.mrb[28].mxu1 %v3161_v28  ;;  %v7866_v27 = vpop.f32.mrb[34].mxu0 }
 0x37f   : > { %5074 = vrot.lane.b32.xlu1 %v5073_v47, %s5173_s23  ;;  %v3449_v50 = vpop.f32.mrb[35].mxu0  ;;  %v2483_v26 = vsel %vm583_vm2, %v2481_v53, %v2482_v46  ;;  %v2484_v20 = vrot.slane %v2229_v42, 2  ;;  %v2444_v38 = vrot.slane %v7854_v36, 1  ;;  %v2445_v2 = vrot.slane %v7858_v34, 1 }
 0x380   : > { %v3226_v9 = vsel %vm3107_vm14, %v3194_v24, %v4971_v18  ;;  %4476 = vmatprep.mubr.msk.f32.mxu0 %vm1688_vm4, %v2483_v26  ;;  %v3129_v19 = vsel %vm3107_vm14, %v3096_v41, %v4972_v5  ;;  %v2489_v60 = vrot.slane %v2230_v11, 1  ;;  %v5088_v13 = vpack.i.bf16 %v7753_v45, %v7858_v34 }
 0x381   : > { %v3258_v8 = vsel %vm3140_vm15, %v3226_v9, %v4976_v43  ;;  %v3162_v22 = vsel %vm3140_vm15, %v3129_v19, %v4977_v57  ;;  %v2485_v6 = vsel %vm583_vm2, %v2482_v46, %v2484_v20  ;;  %v7882_v16 = vsel %vm502_vm3, %v2444_v38, %v2445_v2 }
 0x382   : > { %3545 = vmatprep.mubr.f32.mxu1 %v3258_v8  ;;  %4477 = vmatmul.mubr.msk.f32.gmra.mrb[72].mxu0 %vm1688_vm4, %v2485_v6  ;;  %v5078_v7 = vpack.i.bf16 %v7796_v40, %v7882_v16  ;;  %v7888_v55 = vsel %vm502_vm3, %v2445_v2, %v2447_v0  ;;  %v2490_v37 = vrot.slane %v2231_v58, 1  ;;  %v2494_v52 = vrot.slane %v2230_v11, 2 }
 0x383   : > { %3546 = vmatmul.mubr.f32.gmra.mrb[30].mxu1 %v3162_v22  ;;  %5084 = vrot.lane.b32.xlu1 %v5083_v35, %s5171_s6  ;;  %v5093_v31 = vpack.i.bf16 %v7798_v25, %v7888_v55  ;;  %v2495_v14 = vrot.slane %v2231_v58, 2  ;;  %v2497_v28 = vrot.slane %v2232_v62, 2  ;;  %v5103_v24 = vpack.i.bf16 %v7810_v1, %v2230_v11 }
 0x384   : > { %5079 = vrot.lane.b32.xlu0 %v5078_v7, %s5174_s9  ;;  %v2492_v42 = vrot.slane %v2232_v62, 1  ;;  %v5098_v47 = vpack.i.bf16 %v7822_v30, %v2483_v26  ;;  %v2491_v45 = vsel %vm502_vm3, %v2489_v60, %v2490_v37  ;;  %v5113_v53 = vpack.i.bf16 %v7825_v56, %v2485_v6  ;;  %v4980_v26 = vpop.permute.xlu0 %4979 }
 0x385   : > { %v7891_v29 = vpop.f32.mrb[36].mxu0  ;;  %v2496_v12 = vsel %vm583_vm2, %v2494_v52, %v2495_v14  ;;  %v2498_v39 = vsel %vm583_vm2, %v2495_v14, %v2497_v28  ;;  %v5108_v5 = vpack.i.bf16 %v7854_v36, %v2491_v45  ;;  %v5118_v50 = vpack.i.bf16 %v7813_v59, %v2231_v58 }
 0x386   : > { %v3454_v32 = vpop.f32.mrb[37].mxu0  ;;  %4479 = vmatprep.mubr.msk.f32.mxu0 %vm1688_vm4, %v2496_v12  ;;  %v2493_v41 = vsel %vm502_vm3, %v2490_v37, %v2492_v42  ;;  %v4982_v20 = vunpack.i.h.bf16 %v4980_v26  ;;  %v4981_v38 = vunpack.i.l.bf16 %v4980_v26 }
 0x387   : > { %5094 = vrot.lane.b32.xlu1 %v5093_v31, %s5174_s9  ;;  %4480 = vmatmul.mubr.msk.f32.gmra.mrb[74].mxu0 %vm1688_vm4, %v2498_v39  ;;  %v5123_v57 = vpack.i.bf16 %v7858_v34, %v2493_v41 }
 0x388   : > { %5089 = vrot.lane.b32.xlu0 %v5088_v13, %s5173_s23  ;;  %v3195_v34 = vsel %vm1688_vm4, %v7636_v63, %v4981_v38  ;;  %v3097_v59 = vsel %vm1688_vm4, %v7510_v44, %v4982_v20 }
 0x38b   : > { %5104 = vrot.lane.b32.xlu1 %v5103_v24, %s5173_s23 }
 0x38c   : > { %5099 = vrot.lane.b32.xlu0 %v5098_v47, %s5171_s6 }
 0x38d   : > { %v7909_v1 = vpop.f32.mrb[0].mxu1 }
 0x38e   : > { %v3474_v46 = vpop.f32.mrb[1].mxu1 }
 0x38f   : > { %5114 = vrot.lane.b32.xlu1 %v5113_v53, %s5171_s6 }
 0x390   : > { %5109 = vrot.lane.b32.xlu0 %v5108_v5, %s5174_s9 }
 0x391   : > { %v3457_v18 = vpop.f32.mrb[38].mxu0 }
 0x392   : > { %v3459_v43 = vpop.f32.mrb[39].mxu0 }
 0x393   : > { %5124 = vrot.lane.b32.xlu1 %v5123_v57, %s5174_s9 }
 0x394   : > { %5119 = vrot.lane.b32.xlu0 %v5118_v50, %s5173_s23 }
 0x395   : > { %v4985_v0 = vpop.permute.xlu1 %4984 }
 0x396   : > { %v4987_v9 = vunpack.i.h.bf16 %v4985_v0  ;;  %v4986_v36 = vunpack.i.l.bf16 %v4985_v0 }
 0x398   : > { %v3227_v11 = vsel %vm3107_vm14, %v3195_v34, %v4986_v36  ;;  %v3130_v32 = vsel %vm3107_vm14, %v3097_v59, %v4987_v9 }
 0x399   : > { %v4990_v19 = vpop.permute.xlu0 %4989  ;;  %v4995_v2 = vpop.permute.xlu1 %4994 }
 0x39a   : > { %v4992_v35 = vunpack.i.h.bf16 %v4990_v19  ;;  %v4991_v8 = vunpack.i.l.bf16 %v4990_v19  ;;  %v7919_v22 = vpop.f32.mrb[2].mxu1  ;;  %v4997_v6 = vunpack.i.h.bf16 %v4995_v2  ;;  %v4996_v7 = vunpack.i.l.bf16 %v4995_v2 }
 0x39b   : > { %v3479_v31 = vpop.f32.mrb[3].mxu1 }
 0x39c   : > { %v3259_v60 = vsel %vm3140_vm15, %v3227_v11, %v4991_v8  ;;  %v3163_v58 = vsel %vm3140_vm15, %v3130_v32, %v4992_v35  ;;  %v3196_v24 = vsel %vm1688_vm4, %v7647_v49, %v4996_v7  ;;  %v3098_v42 = vsel %vm1688_vm4, %v7513_v15, %v4997_v6  ;;  %v7940_v49 = vld [vmem:[%s8173_s4] ss:$0 sm:$0xff] }
 0x39d   : > { %v5000_v13 = vpop.permute.xlu0 %4999  ;;  %3550 = vmatprep.mubr.f32.mxu1 %v3259_v60  ;;  %v5005_v62 = vpop.permute.xlu1 %5004  ;;  %v3448_v15 = vadd.f32 %v7940_v49, %v7866_v27  ;;  %v3443_v57 = vadd.f32 %v7940_v49, %v7848_v33  ;;  %v3458_v20 = vadd.f32 %v7940_v49, %v3457_v18  ;;  %v3453_v36 = vadd.f32 %v7940_v49, %v7891_v29 }
 0x39e   : > { %v5002_v37 = vunpack.i.h.bf16 %v5000_v13  ;;  %v5001_v52 = vunpack.i.l.bf16 %v5000_v13  ;;  %v5007_v63 = vunpack.i.h.bf16 %v5005_v62  ;;  %v5006_v14 = vunpack.i.l.bf16 %v5005_v62  ;;  %3551 = vmatmul.mubr.f32.gmra.mrb[32].mxu1 %v3163_v58  ;;  %v3462_v44 = vpop.f32.mrb[40].mxu0 }
 0x39f   : > { %v3464_v28 = vpop.f32.mrb[41].mxu0  ;;  %v3463_v60 = vadd.f32 %v7940_v49, %v3462_v44 }
 0x3a0   : > { %v3228_v12 = vsel %vm3107_vm14, %v3196_v24, %v5001_v52  ;;  %v3131_v39 = vsel %vm3107_vm14, %v3098_v42, %v5002_v37  ;;  %v3473_v24 = vadd.f32 %v7940_v49, %v7909_v1  ;;  %v3478_v42 = vadd.f32 %v7940_v49, %v7919_v22 }
 0x3a1   : > { %v3260_v47 = vsel %vm3140_vm15, %v3228_v12, %v5006_v14  ;;  %v3164_v45 = vsel %vm3140_vm15, %v3131_v39, %v5007_v63  ;;  %v5010_v8 = vpop.permute.xlu0 %5009 }
 0x3a2   : > { %3555 = vmatprep.mubr.f32.mxu1 %v3260_v47  ;;  %v5011_v7 = vunpack.i.l.bf16 %v5010_v8  ;;  %v5012_v58 = vunpack.i.h.bf16 %v5010_v8 }
 0x3a3   : > { %3556 = vmatmul.mubr.f32.gmra.mrb[34].mxu1 %v3164_v45 }
 0x3a4   : > { %v3197_v44 = vsel %vm1688_vm4, %v7696_v4, %v5011_v7 }
 0x3a5   : > { %v3482_v53 = vpop.f32.mrb[4].mxu1 }
 0x3a6   : > { %v3484_v46 = vpop.f32.mrb[5].mxu1 }
 0x3a9   : > { %v3467_v41 = vpop.f32.mrb[42].mxu0 }
 0x3aa   : > { %v3469_v5 = vpop.f32.mrb[43].mxu0  ;;  %v3468_v31 = vadd.f32 %v7940_v49, %v3467_v41 }
 0x3ad   : > { %v4436_v43 = vpop.f32.mrb[44].mxu0 }
 0x3ae   : > { %v3673_v50 = vadd.f32 %v4436_v43, %v3448_v15  ;;  %v3667_v26 = vpop.f32.mrb[45].mxu0  ;;  %v3099_v15 = vsel %vm1688_vm4, %v7618_v48, %v5012_v58 }
 0x3af   : > { %v3668_v0 = vadd.f32 %v3667_v26, %v3443_v57 }
 0x3b0   : > { %v3827_v38 = vmax.f32 %v3673_v50, 0.0  ;;  %v3487_v9 = vpop.f32.mrb[6].mxu1 }
 0x3b1   : > { %v3826_v19 = vmax.f32 %v3668_v0, 0.0  ;;  %v3489_v2 = vpop.f32.mrb[7].mxu1  ;;  %v4439_v35 = vpop.f32.mrb[46].mxu0 }
 0x3b2   : > { %v3683_v34 = vadd.f32 %v4439_v35, %v3458_v20  ;;  %v3677_v27 = vpop.f32.mrb[47].mxu0  ;;  %v3488_v2 = vadd.f32 %v7940_v49, %v3487_v9 }
 0x3b3   : > { %v7949_v59 = vpack.c.bf16 %v3827_v38, %v3826_v19  ;;  %v3678_v33 = vadd.f32 %v3677_v27, %v3453_v36  ;;  %v3483_v19 = vadd.f32 %v7940_v49, %v3482_v53 }
 0x3b4   : > { %v3829_v6 = vmax.f32 %v3683_v34, 0.0 }
 0x3b5   : > { %v3828_v11 = vmax.f32 %v3678_v33, 0.0  ;;  %v5015_v18 = vpop.permute.xlu1 %5014  ;;  %v3492_v32 = vpop.f32.mrb[8].mxu1 }
 0x3b6   : > { %v4442_v29 = vpop.f32.mrb[48].mxu0  ;;  %v3494_v13 = vpop.f32.mrb[9].mxu1  ;;  %v5016_v37 = vunpack.i.l.bf16 %v5015_v18  ;;  %v5017_v14 = vunpack.i.h.bf16 %v5015_v18 }
 0x3b7   : > { %v7953_v62 = vpack.c.bf16 %v3829_v6, %v3828_v11  ;;  %v3693_v52 = vadd.f32 %v4442_v29, %v3468_v31  ;;  %v3687_v63 = vpop.f32.mrb[49].mxu0 }
 0x3b8   : > { %v3688_v28 = vadd.f32 %v3687_v63, %v3463_v60  ;;  %v3229_v22 = vsel %vm3107_vm14, %v3197_v44, %v5016_v37  ;;  %v3132_v36 = vsel %vm3107_vm14, %v3099_v15, %v5017_v14 }
 0x3b9   : > { %v3831_v12 = vmax.f32 %v3693_v52, 0.0  ;;  %v5020_v39 = vpop.permute.xlu0 %5019  ;;  %v5025_v47 = vpop.permute.xlu1 %5024 }
 0x3ba   : > { %v3830_v45 = vmax.f32 %v3688_v28, 0.0  ;;  %v5022_v46 = vunpack.i.h.bf16 %v5020_v39  ;;  %v5021_v41 = vunpack.i.l.bf16 %v5020_v39  ;;  %v4445_v5 = vpop.f32.mrb[50].mxu0  ;;  %v5027_v57 = vunpack.i.h.bf16 %v5025_v47 }
 0x3bb   : > { %v5026_v43 = vunpack.i.l.bf16 %v5025_v47  ;;  %v3703_v50 = vadd.f32 %v4445_v5, %v3478_v42  ;;  %v3497_v1 = vpop.f32.mrb[10].mxu1  ;;  %v3697_v26 = vpop.f32.mrb[51].mxu0 }
 0x3bc   : > { %v7964_v0 = vpack.c.bf16 %v3831_v12, %v3830_v45  ;;  %v3698_v20 = vadd.f32 %v3697_v26, %v3473_v24  ;;  %v3499_v38 = vpop.f32.mrb[11].mxu1  ;;  %v3261_v4 = vsel %vm3140_vm15, %v3229_v22, %v5021_v41  ;;  %v3165_v34 = vsel %vm3140_vm15, %v3132_v36, %v5022_v46 }
 0x3bd   : > { %v3833_v48 = vmax.f32 %v3703_v50, 0.0  ;;  %v5030_v35 = vpop.permute.xlu0 %5029  ;;  %3560 = vmatprep.mubr.f32.mxu1 %v3261_v4  ;;  %v5035_v8 = vpop.permute.xlu1 %5034  ;;  %v3198_v53 = vsel %vm1688_vm4, %v7707_v3, %v5026_v43  ;;  %v3100_v9 = vsel %vm1688_vm4, %v7620_v21, %v5027_v57  ;;  %v3498_v52 = vadd.f32 %v7940_v49, %v3497_v1 }
 0x3be   : > { %v3832_v27 = vmax.f32 %v3698_v20, 0.0  ;;  %v5032_v33 = vunpack.i.h.bf16 %v5030_v35  ;;  %v5031_v6 = vunpack.i.l.bf16 %v5030_v35  ;;  %v5037_v7 = vunpack.i.h.bf16 %v5035_v8  ;;  %3561 = vmatmul.mubr.f32.gmra.mrb[36].mxu1 %v3165_v34  ;;  %v4448_v31 = vpop.f32.mrb[52].mxu0 }
 0x3bf   : > { %v5036_v11 = vunpack.i.l.bf16 %v5035_v8  ;;  %v3713_v18 = vadd.f32 %v4448_v31, %v3488_v2  ;;  %v3707_v60 = vpop.f32.mrb[53].mxu0  ;;  %v3493_v24 = vadd.f32 %v7940_v49, %v3492_v32 }
 0x3c0   : > { %v7975_v58 = vpack.c.bf16 %v3833_v48, %v3832_v27  ;;  %v3708_v29 = vadd.f32 %v3707_v60, %v3483_v19  ;;  %v3230_v13 = vsel %vm3107_vm14, %v3198_v53, %v5031_v6  ;;  %v3133_v37 = vsel %vm3107_vm14, %v3100_v9, %v5032_v33 }
 0x3c1   : > { %v3835_v63 = vmax.f32 %v3713_v18, 0.0  ;;  %v3262_v14 = vsel %vm3140_vm15, %v3230_v13, %v5036_v11  ;;  %v3166_v28 = vsel %vm3140_vm15, %v3133_v37, %v5037_v7  ;;  %v5040_v20 = vpop.permute.xlu0 %5039 }
 0x3c2   : > { %v3834_v3 = vmax.f32 %v3708_v29, 0.0  ;;  %3565 = vmatprep.mubr.f32.mxu1 %v3262_v14  ;;  %v4451_v42 = vpop.f32.mrb[54].mxu0  ;;  %v5041_v2 = vunpack.i.l.bf16 %v5040_v20  ;;  %v5042_v8 = vunpack.i.h.bf16 %v5040_v20 }
 0x3c3   : > { %3566 = vmatmul.mubr.f32.gmra.mrb[38].mxu1 %v3166_v28  ;;  %v3723_v21 = vadd.f32 %v4451_v42, %v3498_v52  ;;  %v3717_v12 = vpop.f32.mrb[55].mxu0 }
 0x3c4   : > { %v7983_v39 = vpack.c.bf16 %v3835_v63, %v3834_v3  ;;  %v3718_v47 = vadd.f32 %v3717_v12, %v3493_v24  ;;  %v3199_v53 = vsel %vm1688_vm4, %v7756_v51, %v5041_v2  ;;  %v3101_v37 = vsel %vm1688_vm4, %v7678_v54, %v5042_v8 }
 0x3c5   : > { %v3837_v44 = vmax.f32 %v3723_v21, 0.0 }
 0x3c6   : > { %v3836_v45 = vmax.f32 %v3718_v47, 0.0  ;;  %v4454_v46 = vpop.f32.mrb[56].mxu0 }
 0x3c7   : > { %v3727_v41 = vpop.f32.mrb[57].mxu0 }
 0x3c8   : > { %v7985_v5 = vpack.c.bf16 %v3837_v44, %v3836_v45 }
 0x3ca   : > { %v7987_v15 = vpop.f32.mrb[58].mxu0 }
 0x3cb   : > { %v3737_v57 = vpop.f32.mrb[59].mxu0 }
 0x3ce   : > { %v7989_v43 = vpop.f32.mrb[60].mxu0 }
 0x3cf   : > { %v7991_v32 = vpop.f32.mrb[61].mxu0 }
 0x3d0   : > { %v3502_v50 = vpop.f32.mrb[12].mxu1 }
 0x3d1   : > { %v3503_v1 = vadd.f32 %v7940_v49, %v3502_v50  ;;  %v3504_v26 = vpop.f32.mrb[13].mxu1 }
 0x3d2   : > { %v7994_v22 = vpop.f32.mrb[62].mxu0 }
 0x3d3   : > { %v3728_v38 = vadd.f32 %v3727_v41, %v3503_v1  ;;  %v7996_v4 = vpop.f32.mrb[63].mxu0 }
 0x3d4   : > { %v5045_v36 = vpop.permute.xlu1 %5044 }
 0x3d5   : > { %v3507_v19 = vpop.f32.mrb[14].mxu1  ;;  %v5046_v34 = vunpack.i.l.bf16 %v5045_v36  ;;  %v5047_v27 = vunpack.i.h.bf16 %v5045_v36  ;;  %v3838_v31 = vmax.f32 %v3728_v38, 0.0 }
 0x3d6   : > { %v3508_v48 = vadd.f32 %v7940_v49, %v3507_v19  ;;  %v3509_v35 = vpop.f32.mrb[15].mxu1 }
 0x3d7   : > { %v3231_v13 = vsel %vm3107_vm14, %v3199_v53, %v5046_v34  ;;  %v3134_v24 = vsel %vm3107_vm14, %v3101_v37, %v5047_v27 }
 0x3d8   : > { %v3733_v33 = vadd.f32 %v4454_v46, %v3508_v48  ;;  %v5055_v6 = vpop.permute.xlu1 %5054  ;;  %v7999_v7 = vpop.f32.mrb[64].mxu0  ;;  %v3858_v46 = vld [vmem:[%s8174_s5] sm:$0xff] }
 0x3d9   : > { %v5050_v18 = vpop.permute.xlu0 %5049  ;;  %v8001_v60 = vpop.f32.mrb[65].mxu0  ;;  %v5057_v63 = vunpack.i.h.bf16 %v5055_v6  ;;  %v5056_v14 = vunpack.i.l.bf16 %v5055_v6  ;;  %3872 = vxpose.xlu0.b32.start [1/4] (short) (narrow) %v3858_v46, 8 }
 0x3da   : > { %v3839_v11 = vmax.f32 %v3733_v33, 0.0  ;;  %v5052_v9 = vunpack.i.h.bf16 %v5050_v18  ;;  %v5051_v29 = vunpack.i.l.bf16 %v5050_v18 }
 0x3db   : > { %v3200_v54 = vsel %vm1688_vm4, %v7767_v61, %v5056_v14  ;;  %v3102_v45 = vsel %vm1688_vm4, %v7680_v10, %v5057_v63 }
 0x3dc   : > { %v8008_v52 = vpack.c.bf16 %v3839_v11, %v3838_v31  ;;  %v5065_v28 = vpop.permute.xlu1 %5064  ;;  %v3263_v3 = vsel %vm3140_vm15, %v3231_v13, %v5051_v29  ;;  %v3167_v42 = vsel %vm3140_vm15, %v3134_v24, %v5052_v9  ;;  %v3859_v31 = vld [vmem:[%s8174_s5 + $0x8] sm:$0xff]  ;;  %v3860_v29 = vld [vmem:[%s8174_s5 + $0x10] sm:$0xff] }
 0x3dd   : > { %v5060_v21 = vpop.permute.xlu0 %5059  ;;  %3570 = vmatprep.mubr.f32.mxu1 %v3263_v3  ;;  %v5067_v51 = vunpack.i.h.bf16 %v5065_v28  ;;  %v5066_v12 = vunpack.i.l.bf16 %v5065_v28  ;;  %3873 = vxpose.xlu0.b32.cont [2/4] (short) (narrow) %v3859_v31, 8 }
 0x3de   : > { %v5062_v47 = vunpack.i.h.bf16 %v5060_v21  ;;  %v5061_v44 = vunpack.i.l.bf16 %v5060_v21  ;;  %3571 = vmatmul.mubr.f32.gmra.mrb[40].mxu1 %v3167_v42 }
 0x3e0   : > { %v3232_v41 = vsel %vm3107_vm14, %v3200_v54, %v5061_v44  ;;  %v3135_v50 = vsel %vm3107_vm14, %v3102_v45, %v5062_v47 }
 0x3e1   : > { %v3264_v1 = vsel %vm3140_vm15, %v3232_v41, %v5066_v12  ;;  %v3168_v26 = vsel %vm3140_vm15, %v3135_v50, %v5067_v51  ;;  %v5070_v20 = vpop.permute.xlu0 %5069  ;;  %3874 = vxpose.xlu0.b32.cont [3/4] (short) (narrow) %v3860_v29, 8 }
 0x3e2   : > { %3575 = vmatprep.mubr.f32.mxu1 %v3264_v1  ;;  %v5071_v2 = vunpack.i.l.bf16 %v5070_v20  ;;  %v5072_v48 = vunpack.i.h.bf16 %v5070_v20  ;;  %v3861_v1 = vld [vmem:[%s8174_s5 + $0x18] sm:$0xff] }
 0x3e3   : > { %3576 = vmatmul.mubr.f32.gmra.mrb[42].mxu1 %v3168_v26 }
 0x3e4   : > { %v3103_v24 = vsel %vm1688_vm4, %v7738_v23, %v5072_v48 }
 0x3e5   : > { %3875 = vxpose.xlu0.b32.end [4/4] (short) (narrow) %v3861_v1, 8 }
 0x3f0   : > { %v3512_v61 = vpop.f32.mrb[16].mxu1 }
 0x3f1   : > { %v3513_v38 = vadd.f32 %v7940_v49, %v3512_v61  ;;  %v3514_v10 = vpop.f32.mrb[17].mxu1  ;;  %v5075_v36 = vpop.permute.xlu1 %5074 }
 0x3f2   : > { %v5076_v35 = vunpack.i.l.bf16 %v5075_v36  ;;  %v5077_v27 = vunpack.i.h.bf16 %v5075_v36 }
 0x3f3   : > { %v3738_v19 = vadd.f32 %v3737_v57, %v3513_v38  ;;  %v3201_v57 = vsel %vm1688_vm4, %v7822_v30, %v5071_v2 }
 0x3f4   : > { %v3233_v14 = vsel %vm3107_vm14, %v3201_v57, %v5076_v35  ;;  %v3136_v30 = vsel %vm3107_vm14, %v3103_v24, %v5077_v27 }
 0x3f5   : > { %v3517_v8 = vpop.f32.mrb[18].mxu1  ;;  %v5085_v34 = vpop.permute.xlu1 %5084  ;;  %v3840_v3 = vmax.f32 %v3738_v19, 0.0 }
 0x3f6   : > { %v3518_v33 = vadd.f32 %v7940_v49, %v3517_v8  ;;  %v3519_v6 = vpop.f32.mrb[19].mxu1  ;;  %v5080_v11 = vpop.permute.xlu0 %5079  ;;  %v5087_v13 = vunpack.i.h.bf16 %v5085_v34  ;;  %v5086_v37 = vunpack.i.l.bf16 %v5085_v34 }
 0x3f7   : > { %v5082_v18 = vunpack.i.h.bf16 %v5080_v11  ;;  %v5081_v53 = vunpack.i.l.bf16 %v5080_v11 }
 0x3f8   : > { %v3743_v9 = vadd.f32 %v7987_v15, %v3518_v33  ;;  %v8035_v63 = vpop.f32.mrb[66].mxu0  ;;  %v3202_v41 = vsel %vm1688_vm4, %v7825_v56, %v5086_v37  ;;  %v3104_v50 = vsel %vm1688_vm4, %v7740_v17, %v5087_v13 }
 0x3f9   : > { %v5095_v28 = vpop.permute.xlu1 %5094  ;;  %v3265_v15 = vsel %vm3140_vm15, %v3233_v14, %v5081_v53  ;;  %v8041_v21 = vpop.f32.mrb[67].mxu0  ;;  %v3169_v44 = vsel %vm3140_vm15, %v3136_v30, %v5082_v18 }
 0x3fa   : > { %v3841_v42 = vmax.f32 %v3743_v9, 0.0  ;;  %v5090_v51 = vpop.permute.xlu0 %5089  ;;  %3580 = vmatprep.mubr.f32.mxu1 %v3265_v15  ;;  %v5097_v12 = vunpack.i.h.bf16 %v5095_v28  ;;  %v5096_v47 = vunpack.i.l.bf16 %v5095_v28 }
 0x3fb   : > { %v5092_v45 = vunpack.i.h.bf16 %v5090_v51  ;;  %v5091_v46 = vunpack.i.l.bf16 %v5090_v51  ;;  %3581 = vmatmul.mubr.f32.gmra.mrb[44].mxu1 %v3169_v44 }
 0x3fc   : > { %v8045_v54 = vpack.c.bf16 %v3841_v42, %v3840_v3 }
 0x3fd   : > { %v5105_v23 = vpop.permute.xlu1 %5104  ;;  %v3234_v26 = vsel %vm3107_vm14, %v3202_v41, %v5091_v46  ;;  %v3137_v20 = vsel %vm3107_vm14, %v3104_v50, %v5092_v45 }
 0x3fe   : > { %v5100_v61 = vpop.permute.xlu0 %5099  ;;  %v3266_v38 = vsel %vm3140_vm15, %v3234_v26, %v5096_v47  ;;  %v3170_v10 = vsel %vm3140_vm15, %v3137_v20, %v5097_v12  ;;  %v5107_v56 = vunpack.i.h.bf16 %v5105_v23  ;;  %v5106_v2 = vunpack.i.l.bf16 %v5105_v23 }
 0x3ff   : > { %v5102_v36 = vunpack.i.h.bf16 %v5100_v61  ;;  %v5101_v19 = vunpack.i.l.bf16 %v5100_v61  ;;  %3585 = vmatprep.mubr.f32.mxu1 %v3266_v38 }
 0x400   : > { %3586 = vmatmul.mubr.f32.gmra.mrb[46].mxu1 %v3170_v10 }
 0x401   : > { %v5115_v17 = vpop.permute.xlu1 %5114  ;;  %v3203_v48 = vsel %vm1688_vm4, %v7882_v16, %v5101_v19  ;;  %v3105_v35 = vsel %vm1688_vm4, %v7796_v40, %v5102_v36 }
 0x402   : > { %v5110_v8 = vpop.permute.xlu0 %5109  ;;  %v5117_v33 = vunpack.i.h.bf16 %v5115_v17  ;;  %v5116_v6 = vunpack.i.l.bf16 %v5115_v17  ;;  %v3235_v31 = vsel %vm3107_vm14, %v3203_v48, %v5106_v2  ;;  %v3138_v18 = vsel %vm3107_vm14, %v3105_v35, %v5107_v56 }
 0x403   : > { %v5112_v34 = vunpack.i.h.bf16 %v5110_v8  ;;  %v5111_v27 = vunpack.i.l.bf16 %v5110_v8 }
 0x404   : > { %v3204_v37 = vsel %vm1688_vm4, %v7888_v55, %v5116_v6  ;;  %v3106_v14 = vsel %vm1688_vm4, %v7798_v25, %v5117_v33 }
 0x405   : > { %v5125_v11 = vpop.permute.xlu1 %5124  ;;  %v3267_v53 = vsel %vm3140_vm15, %v3235_v31, %v5111_v27  ;;  %v3171_v9 = vsel %vm3140_vm15, %v3138_v18, %v5112_v34 }
 0x406   : > { %v5120_v57 = vpop.permute.xlu0 %5119  ;;  %3590 = vmatprep.mubr.f32.mxu1 %v3267_v53  ;;  %v5127_v16 = vunpack.i.h.bf16 %v5125_v11  ;;  %v5126_v29 = vunpack.i.l.bf16 %v5125_v11 }
 0x407   : > { %v5122_v13 = vunpack.i.h.bf16 %v5120_v57  ;;  %v5121_v40 = vunpack.i.l.bf16 %v5120_v57  ;;  %3591 = vmatmul.mubr.f32.gmra.mrb[48].mxu1 %v3171_v9  ;;  %v3862_v57 = vld [vmem:[#allocation4] sm:$0x1] }
 0x409   : > { %v3236_v28 = vsel %vm3107_vm14, %v3204_v37, %v5121_v40  ;;  %v3139_v24 = vsel %vm3107_vm14, %v3106_v14, %v5122_v13  ;;  %v5175_v13 = vmov 0  }
 0x40a   : > { %v3268_v3 = vsel %vm3140_vm15, %v3236_v28, %v5126_v29  ;;  %v3172_v42 = vsel %vm3140_vm15, %v3139_v24, %v5127_v16  ;;  %5128 = vset.pattern.permute.xlu1 %v5175_v13 }
 0x40b   : > { %3595 = vmatprep.mubr.f32.mxu1 %v3268_v3  ;;  %3865 = vperm.xlu1 %5128, %v3862_v57   ;;  %v5176_v57 = vmov 1966171168  }
 0x40c   : > { %3596 = vmatmul.mubr.f32.gmra.mrb[50].mxu1 %v3172_v42 }
 0x40e   : > { %5129 = vset.pattern.permute.xlu0 %v5175_v13 }
 0x410   : > { %v3522_v15 = vpop.f32.mrb[20].mxu1 }
 0x411   : > { %v3523_v30 = vadd.f32 %v7940_v49, %v3522_v15  ;;  %v3524_v51 = vpop.f32.mrb[21].mxu1 }
 0x413   : > { %v3748_v12 = vadd.f32 %v7991_v32, %v3523_v30 }
 0x415   : > { %v3527_v55 = vpop.f32.mrb[22].mxu1  ;;  %v3842_v46 = vmax.f32 %v3748_v12, 0.0 }
 0x416   : > { %v3528_v47 = vadd.f32 %v7940_v49, %v3527_v55  ;;  %v3529_v25 = vpop.f32.mrb[23].mxu1 }
 0x418   : > { %v3753_v44 = vadd.f32 %v7989_v43, %v3528_v47  ;;  %v8078_v45 = vpop.f32.mrb[68].mxu0 }
 0x419   : > { %v3787_v41 = vpop.f32.mrb[69].mxu0 }
 0x41a   : > { %v3843_v23 = vmax.f32 %v3753_v44, 0.0 }
 0x41c   : > { %v4546_v1 = vpack.c.bf16 %v3843_v23, %v3842_v46 }
 0x41e   : > { %4548 = vmatprep.subr.msk.bf16.mxu0 %vm8082_vm0, %v4546_v1 }
 0x41f   : > { %4551 = vmatpush3.bf16.xpose.msk.msra.mxu0 %vm8082_vm0, %v7949_v59 }
 0x430   : > { %v3532_v43 = vpop.f32.mrb[24].mxu1 }
 0x431   : > { %v3533_v32 = vadd.f32 %v7940_v49, %v3532_v43  ;;  %v3534_v26 = vpop.f32.mrb[25].mxu1 }
 0x433   : > { %v3758_v20 = vadd.f32 %v7996_v4, %v3533_v32 }
 0x435   : > { %v3537_v61 = vpop.f32.mrb[26].mxu1  ;;  %v3844_v2 = vmax.f32 %v3758_v20, 0.0 }
 0x436   : > { %v3538_v38 = vadd.f32 %v7940_v49, %v3537_v61  ;;  %v3539_v10 = vpop.f32.mrb[27].mxu1 }
 0x438   : > { %v3763_v36 = vadd.f32 %v7994_v22, %v3538_v38  ;;  %v8095_v19 = vpop.f32.mrb[70].mxu0 }
 0x439   : > { %v3797_v56 = vpop.f32.mrb[71].mxu0 }
 0x43a   : > { %v3845_v17 = vmax.f32 %v3763_v36, 0.0 }
 0x43c   : > { %v4552_v48 = vpack.c.bf16 %v3845_v17, %v3844_v2 }
 0x43e   : > { %4554 = vmatprep.subr.msk.bf16.mxu0 %vm8082_vm0, %v4552_v48 }
 0x43f   : > { %4557 = vmatpush3.bf16.xpose.msk.msra.mxu0 %vm8082_vm0, %v7953_v62 }
 0x451   : > { %v3542_v59 = vpop.f32.mrb[28].mxu1 }
 0x452   : > { %v3543_v4 = vadd.f32 %v7940_v49, %v3542_v59  ;;  %v3544_v35 = vpop.f32.mrb[29].mxu1 }
 0x454   : > { %v3768_v8 = vadd.f32 %v8001_v60, %v3543_v4 }
 0x455   : > { %v8104_v22 = vpop.f32.mrb[72].mxu0 }
 0x456   : > { %v3547_v34 = vpop.f32.mrb[30].mxu1  ;;  %v3807_v27 = vpop.f32.mrb[73].mxu0  ;;  %v3846_v11 = vmax.f32 %v3768_v8, 0.0 }
 0x457   : > { %v3548_v33 = vadd.f32 %v7940_v49, %v3547_v34  ;;  %v3549_v6 = vpop.f32.mrb[31].mxu1 }
 0x459   : > { %v3773_v31 = vadd.f32 %v7999_v7, %v3548_v33  ;;  %v8116_v7 = vpop.trf.xlu0 }
 0x45a   : > { %v8110_v62 = vpop.f32.mrb[74].mxu0  ;;  %4366 = vmatprep.mubr.msk.f32.mxu0 %vm1688_vm4, %v8116_v7 }
 0x45b   : > { %v3847_v18 = vmax.f32 %v3773_v31, 0.0  ;;  %v3817_v60 = vpop.f32.mrb[75].mxu0 }
 0x45d   : > { %v4558_v53 = vpack.c.bf16 %v3847_v18, %v3846_v11 }
 0x45f   : > { %4560 = vmatprep.subr.msk.bf16.mxu0 %vm8082_vm0, %v4558_v53 }
 0x460   : > { %4563 = vmatpush3.bf16.xpose.msk.msra.mxu0 %vm8082_vm0, %v7964_v0 }
 0x471   : > { %v3552_v9 = vpop.f32.mrb[32].mxu1 }
 0x472   : > { %v3553_v16 = vadd.f32 %v7940_v49, %v3552_v9  ;;  %v3554_v29 = vpop.f32.mrb[33].mxu1 }
 0x474   : > { %v3778_v40 = vadd.f32 %v8041_v21, %v3553_v16 }
 0x476   : > { %v3557_v37 = vpop.f32.mrb[34].mxu1  ;;  %v3848_v24 = vmax.f32 %v3778_v40, 0.0 }
 0x477   : > { %v3558_v0 = vadd.f32 %v7940_v49, %v3557_v37  ;;  %v3559_v14 = vpop.f32.mrb[35].mxu1 }
 0x479   : > { %v3783_v28 = vadd.f32 %v8035_v63, %v3558_v0 }
 0x47b   : > { %v3849_v3 = vmax.f32 %v3783_v28, 0.0 }
 0x47d   : > { %v4564_v42 = vpack.c.bf16 %v3849_v3, %v3848_v24 }
 0x47f   : > { %4566 = vmatprep.subr.msk.bf16.mxu0 %vm8082_vm0, %v4564_v42 }
 0x480   : > { %4569 = vmatpush3.bf16.xpose.msk.msra.mxu0 %vm8082_vm0, %v7975_v58 }
 0x48a   : > { %v3866_v9 = vpop.permute.xlu1 %3865 }
 0x491   : > { %v3562_v21 = vpop.f32.mrb[36].mxu1 }
 0x492   : > { %v3563_v15 = vadd.f32 %v7940_v49, %v3562_v21  ;;  %v3564_v30 = vpop.f32.mrb[37].mxu1 }
 0x494   : > { %v3788_v51 = vadd.f32 %v3787_v41, %v3563_v15 }
 0x496   : > { %v3567_v12 = vpop.f32.mrb[38].mxu1  ;;  %v3850_v25 = vmax.f32 %v3788_v51, 0.0 }
 0x497   : > { %v3568_v55 = vadd.f32 %v7940_v49, %v3567_v12  ;;  %v3569_v47 = vpop.f32.mrb[39].mxu1 }
 0x499   : > { %v3793_v63 = vadd.f32 %v8078_v45, %v3568_v55 }
 0x49b   : > { %v3851_v44 = vmax.f32 %v3793_v63, 0.0 }
 0x49d   : > { %v4570_v46 = vpack.c.bf16 %v3851_v44, %v3850_v25 }
 0x49f   : > { %4572 = vmatprep.subr.msk.bf16.mxu0 %vm8082_vm0, %v4570_v46 }
 0x4a0   : > { %4575 = vmatpush3.bf16.xpose.msk.msra.mxu0 %vm8082_vm0, %v7983_v39 }
 0x4b1   : > { %v3572_v58 = vpop.f32.mrb[40].mxu1 }
 0x4b2   : > { %v3573_v23 = vadd.f32 %v7940_v49, %v3572_v58  ;;  %v3574_v41 = vpop.f32.mrb[41].mxu1 }
 0x4b4   : > { %v3798_v1 = vadd.f32 %v3797_v56, %v3573_v23 }
 0x4b6   : > { %v3577_v43 = vpop.f32.mrb[42].mxu1  ;;  %v3852_v20 = vmax.f32 %v3798_v1, 0.0 }
 0x4b7   : > { %v3578_v32 = vadd.f32 %v7940_v49, %v3577_v43  ;;  %v3579_v26 = vpop.f32.mrb[43].mxu1 }
 0x4b9   : > { %v3803_v45 = vadd.f32 %v8095_v19, %v3578_v32 }
 0x4bb   : > { %v3853_v61 = vmax.f32 %v3803_v45, 0.0 }
 0x4bd   : > { %v4576_v38 = vpack.c.bf16 %v3853_v61, %v3852_v20 }
 0x4bf   : > { %4578 = vmatprep.subr.msk.bf16.mxu0 %vm8082_vm0, %v4576_v38 }
 0x4c0   : > { %4581 = vmatpush3.bf16.xpose.msk.msra.mxu0 %vm8082_vm0, %v7985_v5 }
 0x4ce   : > { %v3582_v39 = vpop.f32.mrb[44].mxu1 }
 0x4cf   : > { %v3583_v10 = vadd.f32 %v7940_v49, %v3582_v39  ;;  %v3584_v36 = vpop.f32.mrb[45].mxu1 }
 0x4d1   : > { %v3808_v56 = vadd.f32 %v3807_v27, %v3583_v10 }
 0x4d3   : > { %v3587_v2 = vpop.f32.mrb[46].mxu1  ;;  %v3854_v59 = vmax.f32 %v3808_v56, 0.0 }
 0x4d4   : > { %v3588_v17 = vadd.f32 %v7940_v49, %v3587_v2  ;;  %v3589_v48 = vpop.f32.mrb[47].mxu1 }
 0x4d6   : > { %v3813_v19 = vadd.f32 %v8104_v22, %v3588_v17 }
 0x4d8   : > { %v3855_v4 = vmax.f32 %v3813_v19, 0.0 }
 0x4da   : > { %v4582_v35 = vpack.c.bf16 %v3855_v4, %v3854_v59  ;;  %v3592_v8 = vpop.f32.mrb[48].mxu1 }
 0x4db   : > { %v3593_v34 = vadd.f32 %v7940_v49, %v3592_v8  ;;  %v3594_v33 = vpop.f32.mrb[49].mxu1 }
 0x4dc   : > { %4584 = vmatprep.subr.msk.bf16.mxu0 %vm8082_vm0, %v4582_v35 }
 0x4dd   : > { %v3818_v5 = vadd.f32 %v3817_v60, %v3593_v34  ;;  %4587 = vmatpush3.bf16.xpose.msk.msra.mxu0 %vm8082_vm0, %v8008_v52  ;;  %v3868_v52 = vlaneseq }
 0x4df   : > { %v3597_v27 = vpop.f32.mrb[50].mxu1  ;;  %v3856_v11 = vmax.f32 %v3818_v5, 0.0  ;;  %v3869_v60 = vshrl.u32 %v3868_v52, 7  ;;  %vm4094_vm1 = vcmp.lt.s32.totalorder %v3868_v52, 256 }
 0x4e0   : > { %v3598_v6 = vadd.f32 %v7940_v49, %v3597_v27  ;;  %v3599_v31 = vpop.f32.mrb[51].mxu1 }
 0x4e1   : > { %v3870_v49 = vsub.s32 0, %v3869_v60 }
 0x4e2   : > { %v3823_v22 = vadd.f32 %v8110_v62, %v3598_v6  ;;  %v4078_v62 = vunpack.c.l.s4 %v5176_v57 }
 0x4e3   : > { %v3871_v16 = vrot.slane %v3866_v9, %v3870_v49 }
 0x4e4   : > { %v3857_v18 = vmax.f32 %v3823_v22, 0.0  ;;  %v4079_v29 = vunpack.c.0.s8 %v4078_v62 }
 0x4e6   : > { %v4588_v53 = vpack.c.bf16 %v3857_v18, %v3856_v11  ;;  %v4082_v14 = vsub.s32 %v4079_v29, %v3869_v60 }
 0x4e8   : > { %4590 = vmatprep.subr.msk.bf16.mxu0 %vm8082_vm0, %v4588_v53 }
 0x4e9   : > { %4593 = vmatpush3.bf16.xpose.msk.msra.mxu0 %vm8082_vm0, %v8045_v54 }
 0x4f0   : > { %4367 = vmatmul.mubr.msk.f32.vlgmr.msra.gmra.mrb[76].mxu0 %vm1688_vm4, %v8116_v7 }
 0x5c3   : > { %v4069_v13 = vpop.f32.mrb[76].mxu0 }
 0x5c4   : > { %v4070_v40 = vadd.f32 %v4069_v13, %v3871_v16  ;;  %v4071_v37 = vpop.f32.mrb[77].mxu0 }
 0x5c5   : > { %v4072_v0 = vadd.f32 %v4071_v37, %v3871_v16 }
 0x5c7   : > { %v4076_v50 = vcombine.low %v4070_v40, %v4072_v0 }
 0x5c9   : > { %v4083_v28 = vrot.slane %v4076_v50, %v4082_v14 }
 0x5cb   : > { %v4090_v54 = vrot.slane %v4083_v28, %v4082_v14 }
 0x5cd   : > { %4096 = vst.msk [vmem:[%s278_s11] sm:$0x3] %vm4094_vm1, %v4090_v54 }
 0x5ce PF: > { %s19_s26 = sadd.s32 1, %s5161_s26  }
 0x5cf   : > { %p16_p4 = scmp.ge.s32.totalorder %s19_s26, 4  }
 0x5d1   :  { %18 = sbr.rel (!%p16_p4) target bundleno = 3 (0x3), region = 80 }

</bundles_post_ra>
